<compile_context>
chip_gen: v5e
topology: v5e:2x2
jax: 0.10.0
libtpu: 0.0.40
codegen_flags: <defaults>
</compile_context>

<pallas_src>
import functools

import jax
import jax.numpy as jnp
import numpy as np
from jax import lax
from jax.experimental import pallas as pl
from jax.experimental.pallas import tpu as pltpu

LANE = 128  # pad channel dims to multiples of the 128-wide lane dimension


def _round_up(x, m):
    return (x + m - 1) // m * m


# -----------------------------------------------------------------------------
# Kernels
# -----------------------------------------------------------------------------
def _conv3x3_bn_relu_kernel(hout, wout, stride, x_ref, w_ref, b_ref, o_ref):
    """3x3/stride conv + folded-BN bias + ReLU.  One grid step = one image.

    x_ref: (1, Hin+2, Win+2, Cin_p) f32 zero-padded image block.
    w_ref: (9, Cin_p, Cout_p) bf16, BN scale folded in.   b_ref: (1, Cout_p) f32.
    The 9 taps are accumulated in f32 on the MXU; no im2col is materialized.
    """
    cin = x_ref.shape[-1]
    cout = w_ref.shape[-1]
    hw = hout * wout
    acc = jnp.zeros((hw, cout), jnp.float32)
    t = 0
    for kh in range(3):
        for kw in range(3):
            if stride == 1:
                xs = x_ref[0, kh:kh + hout, kw:kw + wout, :]
            else:  # generic stride via strided ref slices (untested path here)
                xs = x_ref[0, pl.ds(kh, hout, stride), pl.ds(kw, wout, stride), :]
            xs = xs.reshape(hw, cin).astype(jnp.bfloat16)
            acc += jnp.dot(xs, w_ref[t], preferred_element_type=jnp.float32)
            t += 1
    y = jnp.maximum(acc + b_ref[...], 0.0)
    o_ref[...] = y.reshape(1, hout, wout, cout).astype(o_ref.dtype)


def _conv3x3_bn_add_relu_kernel(hout, wout, skip_conv,
                                y_ref, w_ref, b_ref, *rest):
    """Second conv: 3x3/1 conv + folded-BN bias, fused with the skip path
    (1x1 conv + folded BN, or identity), residual add and final ReLU."""
    if skip_conv:
        xs_ref, ws_ref, bs_ref, o_ref = rest
    else:
        r_ref, o_ref = rest
    cin = y_ref.shape[-1]
    cout = w_ref.shape[-1]
    hw = hout * wout

    acc = jnp.zeros((hw, cout), jnp.float32)
    t = 0
    for kh in range(3):
        for kw in range(3):
            ys = y_ref[0, kh:kh + hout, kw:kw + wout, :]
            ys = ys.reshape(hw, cin).astype(jnp.bfloat16)
            acc += jnp.dot(ys, w_ref[t], preferred_element_type=jnp.float32)
            t += 1
    acc = acc + b_ref[...]

    if skip_conv:  # 1x1 projection conv + folded BN, fused on the same M tile
        xsk = xs_ref[0].reshape(hw, xs_ref.shape[-1]).astype(jnp.bfloat16)
        res = jnp.dot(xsk, ws_ref[...], preferred_element_type=jnp.float32)
        res = res + bs_ref[...]
    else:          # identity skip (kept in f32 for exactness)
        res = r_ref[0].reshape(hw, cout)

    out = jnp.maximum(acc + res, 0.0)
    o_ref[...] = out.reshape(1, hout, wout, cout).astype(o_ref.dtype)


# -----------------------------------------------------------------------------
# Parameter preparation (BN folding, lane padding) and wrapper
# -----------------------------------------------------------------------------
def fold_bn(gamma, beta, mean, var, eps=1e-5):
    scale = gamma / jnp.sqrt(var + eps)
    bias = beta - mean * scale
    return scale, bias


def _pad_weight(w_hwio, scale, cin_p, cout_p):
    """Fold BN scale into an HWIO weight, pad channels to 128 multiples and
    flatten taps -> (KH*KW, Cin_p, Cout_p) bf16."""
    kh, kw, cin, cout = w_hwio.shape
    w = w_hwio * scale  # per-output-channel BN scale folds into the weight
    w = jnp.pad(w, ((0, 0), (0, 0), (0, cin_p - cin), (0, cout_p - cout)))
    return w.reshape(kh * kw, cin_p, cout_p).astype(jnp.bfloat16)


def _pad_bias(bias_1d, cout_p):
    cout = bias_1d.shape[0]
    return jnp.pad(bias_1d, (0, cout_p - cout)).reshape(1, cout_p).astype(jnp.float32)


@functools.partial(jax.jit, static_argnums=(2,))
def residual_block_forward(x_nchw, params, stride):
    x = jnp.transpose(x_nchw, (0, 2, 3, 1)).astype(jnp.float32)  # NCHW -> NHWC
    n, h, w, cin = x.shape
    cout = params["w1"].shape[-1]
    cin_p, cout_p = _round_up(cin, LANE), _round_up(cout, LANE)
    hout = (h + 2 - 3) // stride + 1
    wout = (w + 2 - 3) // stride + 1
    skip_conv = (stride != 1) or (cin != cout)

    # Fold BN (inference mode) into weights/bias; pad to lane-dense shapes.
    s1, b1 = fold_bn(*params["bn1"])
    s2, b2 = fold_bn(*params["bn2"])
    w1 = _pad_weight(params["w1"], s1, cin_p, cout_p)
    w2 = _pad_weight(params["w2"], s2, cout_p, cout_p)
    b1p, b2p = _pad_bias(b1, cout_p), _pad_bias(b2, cout_p)

    parallel = pltpu.CompilerParams(dimension_semantics=("parallel",))

    # ---- main path: conv3x3(stride) + BN + ReLU --------------------------
    xp = jnp.pad(x, ((0, 0), (1, 1), (1, 1), (0, cin_p - cin)))  # spatial+lane pad
    y1 = pl.pallas_call(
        functools.partial(_conv3x3_bn_relu_kernel, hout, wout, stride),
        out_shape=jax.ShapeDtypeStruct((n, hout, wout, cout_p), jnp.float32),
        grid=(n,),
        in_specs=[
            pl.BlockSpec((1, h + 2, w + 2, cin_p), lambda i: (i, 0, 0, 0)),
            pl.BlockSpec((9, cin_p, cout_p), lambda i: (0, 0, 0)),   # resident
            pl.BlockSpec((1, cout_p), lambda i: (0, 0)),             # resident
        ],
        out_specs=pl.BlockSpec((1, hout, wout, cout_p), lambda i: (i, 0, 0, 0)),
        compiler_params=parallel,
    )(xp, w1, b1p)

    # ---- main path conv3x3(1) + BN, fused skip + add + ReLU --------------
    # TODO(synk): write the zero halo from kernel 1 / keep y1 in bf16 to
    # remove this small pad round trip of the intermediate.
    y1p = jnp.pad(y1, ((0, 0), (1, 1), (1, 1), (0, 0)))
    x_s = x[:, ::stride, ::stride, :]
    if skip_conv:
        ss, bs = fold_bn(*params["bns"])
        ws = _pad_weight(params["wskip"], ss, cin_p, cout_p)[0]  # (Cin_p, Cout_p)
        bsp = _pad_bias(bs, cout_p)
        xs = jnp.pad(x_s, ((0, 0), (0, 0), (0, 0), (0, cin_p - cin)))
        extra_args = (xs, ws, bsp)
        extra_specs = [
            pl.BlockSpec((1, hout, wout, cin_p), lambda i: (i, 0, 0, 0)),
            pl.BlockSpec((cin_p, cout_p), lambda i: (0, 0)),
            pl.BlockSpec((1, cout_p), lambda i: (0, 0)),
        ]
    else:
        res = jnp.pad(x_s, ((0, 0), (0, 0), (0, 0), (0, cout_p - cout)))
        extra_args = (res,)
        extra_specs = [pl.BlockSpec((1, hout, wout, cout_p), lambda i: (i, 0, 0, 0))]

    out_p = pl.pallas_call(
        functools.partial(_conv3x3_bn_add_relu_kernel, hout, wout, skip_conv),
        out_shape=jax.ShapeDtypeStruct((n, hout, wout, cout_p), jnp.float32),
        grid=(n,),
        in_specs=[
            pl.BlockSpec((1, hout + 2, wout + 2, cout_p), lambda i: (i, 0, 0, 0)),
            pl.BlockSpec((9, cout_p, cout_p), lambda i: (0, 0, 0)),
            pl.BlockSpec((1, cout_p), lambda i: (0, 0)),
        ] + extra_specs,
        out_specs=pl.BlockSpec((1, hout, wout, cout_p), lambda i: (i, 0, 0, 0)),
        compiler_params=parallel,
    )(y1p, w2, b2p, *extra_args)

    out = out_p[:, :, :, :cout]                 # drop lane padding
    return jnp.transpose(out, (0, 3, 1, 2))     # NHWC -> NCHW


# -----------------------------------------------------------------------------
# Pure-JAX f32 reference (module semantics) for correctness checking.
# -----------------------------------------------------------------------------
def _conv_nhwc(x, w_hwio, stride, pad):
    return lax.conv_general_dilated(
        x, w_hwio, window_strides=(stride, stride),
        padding=[(pad, pad), (pad, pad)],
        dimension_numbers=("NHWC", "HWIO", "NHWC"))


def _bn_eval(x, gamma, beta, mean, var, eps=1e-5):
    return (x - mean) / jnp.sqrt(var + eps) * gamma + beta


def reference_forward(x_nchw, params, stride):
    x = jnp.transpose(x_nchw, (0, 2, 3, 1))
    cin = x.shape[-1]
    cout = params["w1"].shape[-1]
    if stride != 1 or cin != cout:
        res = _conv_nhwc(x, params["wskip"], stride, 0)
        res = _bn_eval(res, *params["bns"])
    else:
        res = x
    y = _conv_nhwc(x, params["w1"], stride, 1)
    y = jnp.maximum(_bn_eval(y, *params["bn1"]), 0.0)
    y = _conv_nhwc(y, params["w2"], 1, 1)
    y = _bn_eval(y, *params["bn2"])
    out = jnp.maximum(y + res, 0.0)
    return jnp.transpose(out, (0, 3, 1, 2))


# -----------------------------------------------------------------------------
if __name__ == "__main__":
    def bn_params(k, c):
        k1, k2, k3, k4 = jax.random.split(k, 4)
        gamma = 1.0 + 0.1 * jax.random.normal(k1, (c,), jnp.float32)
        beta = 0.1 * jax.random.normal(k2, (c,), jnp.float32)
        mean = 0.1 * jax.random.normal(k3, (c,), jnp.float32)
        var = 1.0 + 0.1 * jax.random.uniform(k4, (c,), jnp.float32)
        return (gamma, beta, mean, var)

    def make_params(key, cin, cout):
        keys = jax.random.split(key, 6)
        return {
            # conv weights stored HWIO
            "w1": 0.1 * jax.random.normal(keys[0], (3, 3, cin, cout), jnp.float32),
            "w2": 0.1 * jax.random.normal(keys[1], (3, 3, cout, cout), jnp.float32),
            "wskip": 0.1 * jax.random.normal(keys[2], (1, 1, cin, cout), jnp.float32),
            "bn1": bn_params(keys[3], cout),
            "bn2": bn_params(keys[4], cout),
            "bns": bn_params(keys[5], cout),
        }

    def run_case(seed, cin, cout, stride, n=2, h=16, w=16):
        key = jax.random.PRNGKey(seed)
        kx, kp = jax.random.split(key)
        x = jax.random.normal(kx, (n, cin, h, w), jnp.float32)
        params = make_params(kp, cin, cout)
        out = jax.block_until_ready(residual_block_forward(x, params, stride))
        ref = jax.block_until_ready(reference_forward(x, params, stride))
        # bf16 MXU operands with f32 accumulation vs. the pure-f32 reference.
        np.testing.assert_allclose(np.asarray(out), np.asarray(ref),
                                   rtol=3e-2, atol=3e-2)

    run_case(0, 4, 8, 1)   # projection skip (1x1 conv + BN): in_ch != out_ch
    run_case(1, 8, 8, 1)   # identity skip: in_ch == out_ch, stride == 1
    print("KERNEL_OK")
</pallas_src>

<mosaic_0001>
module attributes {stable_mosaic.version = 11 : i64} {
  func.func @_conv3x3_bn_relu_kernel(%arg0: i32, %arg1: memref<1x18x18x128xf32, #tpu.memory_space<vmem>>, %arg2: memref<9x128x128xbf16, #tpu.memory_space<vmem>>, %arg3: memref<1x128xf32, #tpu.memory_space<vmem>>, %arg4: memref<1x16x16x128xf32, #tpu.memory_space<vmem>>) attributes {dimension_semantics = [#tpu.dimension_semantics<parallel>], iteration_bounds = array<i64: 2>, scalar_prefetch = 0 : i64, scratch_operands = 0 : i64, tpu.core_type = #tpu.core_type<tc>, window_params = [{transform_indices = @transform_0, window_bounds = array<i64: 1, 18, 18, 128>}, {pipeline_mode = #tpu.pipeline_mode<synchronous>, transform_indices = @transform_1, window_bounds = array<i64: 9, 128, 128>}, {pipeline_mode = #tpu.pipeline_mode<synchronous>, transform_indices = @transform_2, window_bounds = array<i64: 1, 128>}, {transform_indices = @transform_3, window_bounds = array<i64: 1, 16, 16, 128>}]} {
    %cst = arith.constant 0.000000e+00 : f32
    %0 = vector.broadcast %cst : f32 to vector<256x128xf32>
    %c0 = arith.constant 0 : index
    %c0_0 = arith.constant 0 : index
    %c0_1 = arith.constant 0 : index
    %c0_2 = arith.constant 0 : index
    %1 = vector.load %arg1[%c0, %c0_0, %c0_1, %c0_2] : memref<1x18x18x128xf32, #tpu.memory_space<vmem>>, vector<1x16x16x128xf32>
    %2 = vector.shape_cast %1 : vector<1x16x16x128xf32> to vector<16x16x128xf32>
    %3 = vector.shape_cast %2 : vector<16x16x128xf32> to vector<256x128xf32>
    %4 = arith.truncf %3 : vector<256x128xf32> to vector<256x128xbf16>
    %c0_3 = arith.constant 0 : index
    %c0_4 = arith.constant 0 : index
    %c0_5 = arith.constant 0 : index
    %5 = vector.load %arg2[%c0_3, %c0_4, %c0_5] : memref<9x128x128xbf16, #tpu.memory_space<vmem>>, vector<1x128x128xbf16>
    %6 = vector.shape_cast %5 : vector<1x128x128xbf16> to vector<128x128xbf16>
    %cst_6 = arith.constant dense<0.000000e+00> : vector<256x128xf32>
    %7 = tpu.matmul %4, %6, %cst_6 {dimension_numbers = #tpu.dot_dimension_numbers<[1], [0], [0], [1], [0, 0, 1, 1], [], []>} : vector<256x128xbf16>, vector<128x128xbf16>, vector<256x128xf32> -> vector<256x128xf32>
    %8 = arith.addf %0, %7 : vector<256x128xf32>
    %c0_7 = arith.constant 0 : index
    %c0_8 = arith.constant 0 : index
    %c1 = arith.constant 1 : index
    %c0_9 = arith.constant 0 : index
    %9 = vector.load %arg1[%c0_7, %c0_8, %c1, %c0_9] : memref<1x18x18x128xf32, #tpu.memory_space<vmem>>, vector<1x16x16x128xf32>
    %10 = vector.shape_cast %9 : vector<1x16x16x128xf32> to vector<16x16x128xf32>
    %11 = vector.shape_cast %10 : vector<16x16x128xf32> to vector<256x128xf32>
    %12 = arith.truncf %11 : vector<256x128xf32> to vector<256x128xbf16>
    %c1_10 = arith.constant 1 : index
    %c0_11 = arith.constant 0 : index
    %c0_12 = arith.constant 0 : index
    %13 = vector.load %arg2[%c1_10, %c0_11, %c0_12] : memref<9x128x128xbf16, #tpu.memory_space<vmem>>, vector<1x128x128xbf16>
    %14 = vector.shape_cast %13 : vector<1x128x128xbf16> to vector<128x128xbf16>
    %cst_13 = arith.constant dense<0.000000e+00> : vector<256x128xf32>
    %15 = tpu.matmul %12, %14, %cst_13 {dimension_numbers = #tpu.dot_dimension_numbers<[1], [0], [0], [1], [0, 0, 1, 1], [], []>} : vector<256x128xbf16>, vector<128x128xbf16>, vector<256x128xf32> -> vector<256x128xf32>
    %16 = arith.addf %8, %15 : vector<256x128xf32>
    %c0_14 = arith.constant 0 : index
    %c0_15 = arith.constant 0 : index
    %c2 = arith.constant 2 : index
    %c0_16 = arith.constant 0 : index
    %17 = vector.load %arg1[%c0_14, %c0_15, %c2, %c0_16] : memref<1x18x18x128xf32, #tpu.memory_space<vmem>>, vector<1x16x16x128xf32>
    %18 = vector.shape_cast %17 : vector<1x16x16x128xf32> to vector<16x16x128xf32>
    %19 = vector.shape_cast %18 : vector<16x16x128xf32> to vector<256x128xf32>
    %20 = arith.truncf %19 : vector<256x128xf32> to vector<256x128xbf16>
    %c2_17 = arith.constant 2 : index
    %c0_18 = arith.constant 0 : index
    %c0_19 = arith.constant 0 : index
    %21 = vector.load %arg2[%c2_17, %c0_18, %c0_19] : memref<9x128x128xbf16, #tpu.memory_space<vmem>>, vector<1x128x128xbf16>
    %22 = vector.shape_cast %21 : vector<1x128x128xbf16> to vector<128x128xbf16>
    %cst_20 = arith.constant dense<0.000000e+00> : vector<256x128xf32>
    %23 = tpu.matmul %20, %22, %cst_20 {dimension_numbers = #tpu.dot_dimension_numbers<[1], [0], [0], [1], [0, 0, 1, 1], [], []>} : vector<256x128xbf16>, vector<128x128xbf16>, vector<256x128xf32> -> vector<256x128xf32>
    %24 = arith.addf %16, %23 : vector<256x128xf32>
    %c0_21 = arith.constant 0 : index
    %c1_22 = arith.constant 1 : index
    %c0_23 = arith.constant 0 : index
    %c0_24 = arith.constant 0 : index
    %25 = vector.load %arg1[%c0_21, %c1_22, %c0_23, %c0_24] : memref<1x18x18x128xf32, #tpu.memory_space<vmem>>, vector<1x16x16x128xf32>
    %26 = vector.shape_cast %25 : vector<1x16x16x128xf32> to vector<16x16x128xf32>
    %27 = vector.shape_cast %26 : vector<16x16x128xf32> to vector<256x128xf32>
    %28 = arith.truncf %27 : vector<256x128xf32> to vector<256x128xbf16>
    %c3 = arith.constant 3 : index
    %c0_25 = arith.constant 0 : index
    %c0_26 = arith.constant 0 : index
    %29 = vector.load %arg2[%c3, %c0_25, %c0_26] : memref<9x128x128xbf16, #tpu.memory_space<vmem>>, vector<1x128x128xbf16>
    %30 = vector.shape_cast %29 : vector<1x128x128xbf16> to vector<128x128xbf16>
    %cst_27 = arith.constant dense<0.000000e+00> : vector<256x128xf32>
    %31 = tpu.matmul %28, %30, %cst_27 {dimension_numbers = #tpu.dot_dimension_numbers<[1], [0], [0], [1], [0, 0, 1, 1], [], []>} : vector<256x128xbf16>, vector<128x128xbf16>, vector<256x128xf32> -> vector<256x128xf32>
    %32 = arith.addf %24, %31 : vector<256x128xf32>
    %c0_28 = arith.constant 0 : index
    %c1_29 = arith.constant 1 : index
    %c1_30 = arith.constant 1 : index
    %c0_31 = arith.constant 0 : index
    %33 = vector.load %arg1[%c0_28, %c1_29, %c1_30, %c0_31] : memref<1x18x18x128xf32, #tpu.memory_space<vmem>>, vector<1x16x16x128xf32>
    %34 = vector.shape_cast %33 : vector<1x16x16x128xf32> to vector<16x16x128xf32>
    %35 = vector.shape_cast %34 : vector<16x16x128xf32> to vector<256x128xf32>
    %36 = arith.truncf %35 : vector<256x128xf32> to vector<256x128xbf16>
    %c4 = arith.constant 4 : index
    %c0_32 = arith.constant 0 : index
    %c0_33 = arith.constant 0 : index
    %37 = vector.load %arg2[%c4, %c0_32, %c0_33] : memref<9x128x128xbf16, #tpu.memory_space<vmem>>, vector<1x128x128xbf16>
    %38 = vector.shape_cast %37 : vector<1x128x128xbf16> to vector<128x128xbf16>
    %cst_34 = arith.constant dense<0.000000e+00> : vector<256x128xf32>
    %39 = tpu.matmul %36, %38, %cst_34 {dimension_numbers = #tpu.dot_dimension_numbers<[1], [0], [0], [1], [0, 0, 1, 1], [], []>} : vector<256x128xbf16>, vector<128x128xbf16>, vector<256x128xf32> -> vector<256x128xf32>
    %40 = arith.addf %32, %39 : vector<256x128xf32>
    %c0_35 = arith.constant 0 : index
    %c1_36 = arith.constant 1 : index
    %c2_37 = arith.constant 2 : index
    %c0_38 = arith.constant 0 : index
    %41 = vector.load %arg1[%c0_35, %c1_36, %c2_37, %c0_38] : memref<1x18x18x128xf32, #tpu.memory_space<vmem>>, vector<1x16x16x128xf32>
    %42 = vector.shape_cast %41 : vector<1x16x16x128xf32> to vector<16x16x128xf32>
    %43 = vector.shape_cast %42 : vector<16x16x128xf32> to vector<256x128xf32>
    %44 = arith.truncf %43 : vector<256x128xf32> to vector<256x128xbf16>
    %c5 = arith.constant 5 : index
    %c0_39 = arith.constant 0 : index
    %c0_40 = arith.constant 0 : index
    %45 = vector.load %arg2[%c5, %c0_39, %c0_40] : memref<9x128x128xbf16, #tpu.memory_space<vmem>>, vector<1x128x128xbf16>
    %46 = vector.shape_cast %45 : vector<1x128x128xbf16> to vector<128x128xbf16>
    %cst_41 = arith.constant dense<0.000000e+00> : vector<256x128xf32>
    %47 = tpu.matmul %44, %46, %cst_41 {dimension_numbers = #tpu.dot_dimension_numbers<[1], [0], [0], [1], [0, 0, 1, 1], [], []>} : vector<256x128xbf16>, vector<128x128xbf16>, vector<256x128xf32> -> vector<256x128xf32>
    %48 = arith.addf %40, %47 : vector<256x128xf32>
    %c0_42 = arith.constant 0 : index
    %c2_43 = arith.constant 2 : index
    %c0_44 = arith.constant 0 : index
    %c0_45 = arith.constant 0 : index
    %49 = vector.load %arg1[%c0_42, %c2_43, %c0_44, %c0_45] : memref<1x18x18x128xf32, #tpu.memory_space<vmem>>, vector<1x16x16x128xf32>
    %50 = vector.shape_cast %49 : vector<1x16x16x128xf32> to vector<16x16x128xf32>
    %51 = vector.shape_cast %50 : vector<16x16x128xf32> to vector<256x128xf32>
    %52 = arith.truncf %51 : vector<256x128xf32> to vector<256x128xbf16>
    %c6 = arith.constant 6 : index
    %c0_46 = arith.constant 0 : index
    %c0_47 = arith.constant 0 : index
    %53 = vector.load %arg2[%c6, %c0_46, %c0_47] : memref<9x128x128xbf16, #tpu.memory_space<vmem>>, vector<1x128x128xbf16>
    %54 = vector.shape_cast %53 : vector<1x128x128xbf16> to vector<128x128xbf16>
    %cst_48 = arith.constant dense<0.000000e+00> : vector<256x128xf32>
    %55 = tpu.matmul %52, %54, %cst_48 {dimension_numbers = #tpu.dot_dimension_numbers<[1], [0], [0], [1], [0, 0, 1, 1], [], []>} : vector<256x128xbf16>, vector<128x128xbf16>, vector<256x128xf32> -> vector<256x128xf32>
    %56 = arith.addf %48, %55 : vector<256x128xf32>
    %c0_49 = arith.constant 0 : index
    %c2_50 = arith.constant 2 : index
    %c1_51 = arith.constant 1 : index
    %c0_52 = arith.constant 0 : index
    %57 = vector.load %arg1[%c0_49, %c2_50, %c1_51, %c0_52] : memref<1x18x18x128xf32, #tpu.memory_space<vmem>>, vector<1x16x16x128xf32>
    %58 = vector.shape_cast %57 : vector<1x16x16x128xf32> to vector<16x16x128xf32>
    %59 = vector.shape_cast %58 : vector<16x16x128xf32> to vector<256x128xf32>
    %60 = arith.truncf %59 : vector<256x128xf32> to vector<256x128xbf16>
    %c7 = arith.constant 7 : index
    %c0_53 = arith.constant 0 : index
    %c0_54 = arith.constant 0 : index
    %61 = vector.load %arg2[%c7, %c0_53, %c0_54] : memref<9x128x128xbf16, #tpu.memory_space<vmem>>, vector<1x128x128xbf16>
    %62 = vector.shape_cast %61 : vector<1x128x128xbf16> to vector<128x128xbf16>
    %cst_55 = arith.constant dense<0.000000e+00> : vector<256x128xf32>
    %63 = tpu.matmul %60, %62, %cst_55 {dimension_numbers = #tpu.dot_dimension_numbers<[1], [0], [0], [1], [0, 0, 1, 1], [], []>} : vector<256x128xbf16>, vector<128x128xbf16>, vector<256x128xf32> -> vector<256x128xf32>
    %64 = arith.addf %56, %63 : vector<256x128xf32>
    %c0_56 = arith.constant 0 : index
    %c2_57 = arith.constant 2 : index
    %c2_58 = arith.constant 2 : index
    %c0_59 = arith.constant 0 : index
    %65 = vector.load %arg1[%c0_56, %c2_57, %c2_58, %c0_59] : memref<1x18x18x128xf32, #tpu.memory_space<vmem>>, vector<1x16x16x128xf32>
    %66 = vector.shape_cast %65 : vector<1x16x16x128xf32> to vector<16x16x128xf32>
    %67 = vector.shape_cast %66 : vector<16x16x128xf32> to vector<256x128xf32>
    %68 = arith.truncf %67 : vector<256x128xf32> to vector<256x128xbf16>
    %c8 = arith.constant 8 : index
    %c0_60 = arith.constant 0 : index
    %c0_61 = arith.constant 0 : index
    %69 = vector.load %arg2[%c8, %c0_60, %c0_61] : memref<9x128x128xbf16, #tpu.memory_space<vmem>>, vector<1x128x128xbf16>
    %70 = vector.shape_cast %69 : vector<1x128x128xbf16> to vector<128x128xbf16>
    %cst_62 = arith.constant dense<0.000000e+00> : vector<256x128xf32>
    %71 = tpu.matmul %68, %70, %cst_62 {dimension_numbers = #tpu.dot_dimension_numbers<[1], [0], [0], [1], [0, 0, 1, 1], [], []>} : vector<256x128xbf16>, vector<128x128xbf16>, vector<256x128xf32> -> vector<256x128xf32>
    %72 = arith.addf %64, %71 : vector<256x128xf32>
    %c0_63 = arith.constant 0 : index
    %c0_64 = arith.constant 0 : index
    %73 = vector.load %arg3[%c0_63, %c0_64] : memref<1x128xf32, #tpu.memory_space<vmem>>, vector<1x128xf32>
    %74 = vector.broadcast %73 : vector<1x128xf32> to vector<256x128xf32>
    %75 = arith.addf %72, %74 : vector<256x128xf32>
    %cst_65 = arith.constant 0.000000e+00 : f32
    %76 = vector.broadcast %cst_65 : f32 to vector<256x128xf32>
    %77 = arith.maximumf %75, %76 : vector<256x128xf32>
    %78 = vector.shape_cast %77 : vector<256x128xf32> to vector<1x16x16x128xf32>
    %c0_66 = arith.constant 0 : index
    %c0_67 = arith.constant 0 : index
    %c0_68 = arith.constant 0 : index
    %c0_69 = arith.constant 0 : index
    %79 = vector.load %arg4[%c0_66, %c0_67, %c0_68, %c0_69] : memref<1x16x16x128xf32, #tpu.memory_space<vmem>>, vector<1x16x16x128xf32>
    tpu.vector_store %arg4[%c0_66, %c0_67, %c0_68, %c0_69], %78 {strides = array<i32>} : memref<1x16x16x128xf32, #tpu.memory_space<vmem>>, vector<1x16x16x128xf32>,
    return
  }
  func.func @transform_0(%arg0: i32) -> (i32, i32, i32, i32) {
    %c0_i32 = arith.constant 0 : i32
    %c0_i32_0 = arith.constant 0 : i32
    %c0_i32_1 = arith.constant 0 : i32
    %c0_i32_2 = arith.constant 0 : i32
    return %arg0, %c0_i32, %c0_i32_0, %c0_i32_1 : i32, i32, i32, i32
  }
  func.func @transform_1(%arg0: i32) -> (i32, i32, i32) {
    %c0_i32 = arith.constant 0 : i32
    %c0_i32_0 = arith.constant 0 : i32
    %c0_i32_1 = arith.constant 0 : i32
    %c0_i32_2 = arith.constant 0 : i32
    return %c0_i32, %c0_i32_0, %c0_i32_1 : i32, i32, i32
  }
  func.func @transform_2(%arg0: i32) -> (i32, i32) {
    %c0_i32 = arith.constant 0 : i32
    %c0_i32_0 = arith.constant 0 : i32
    %c0_i32_1 = arith.constant 0 : i32
    return %c0_i32, %c0_i32_0 : i32, i32
  }
  func.func @transform_3(%arg0: i32) -> (i32, i32, i32, i32) {
    %c0_i32 = arith.constant 0 : i32
    %c0_i32_0 = arith.constant 0 : i32
    %c0_i32_1 = arith.constant 0 : i32
    %c0_i32_2 = arith.constant 0 : i32
    return %arg0, %c0_i32, %c0_i32_0, %c0_i32_1 : i32, i32, i32, i32
  }
}

module attributes {stable_mosaic.version = 11 : i64} {
  func.func @_conv3x3_bn_add_relu_kernel(%arg0: i32, %arg1: memref<1x18x18x128xf32, #tpu.memory_space<vmem>>, %arg2: memref<9x128x128xbf16, #tpu.memory_space<vmem>>, %arg3: memref<1x128xf32, #tpu.memory_space<vmem>>, %arg4: memref<1x16x16x128xf32, #tpu.memory_space<vmem>>, %arg5: memref<128x128xbf16, #tpu.memory_space<vmem>>, %arg6: memref<1x128xf32, #tpu.memory_space<vmem>>, %arg7: memref<1x16x16x128xf32, #tpu.memory_space<vmem>>) attributes {dimension_semantics = [#tpu.dimension_semantics<parallel>], iteration_bounds = array<i64: 2>, scalar_prefetch = 0 : i64, scratch_operands = 0 : i64, tpu.core_type = #tpu.core_type<tc>, window_params = [{transform_indices = @transform_0, window_bounds = array<i64: 1, 18, 18, 128>}, {pipeline_mode = #tpu.pipeline_mode<synchronous>, transform_indices = @transform_1, window_bounds = array<i64: 9, 128, 128>}, {pipeline_mode = #tpu.pipeline_mode<synchronous>, transform_indices = @transform_2, window_bounds = array<i64: 1, 128>}, {transform_indices = @transform_3, window_bounds = array<i64: 1, 16, 16, 128>}, {pipeline_mode = #tpu.pipeline_mode<synchronous>, transform_indices = @transform_4, window_bounds = array<i64: 128, 128>}, {pipeline_mode = #tpu.pipeline_mode<synchronous>, transform_indices = @transform_5, window_bounds = array<i64: 1, 128>}, {transform_indices = @transform_6, window_bounds = array<i64: 1, 16, 16, 128>}]} {
    %cst = arith.constant 0.000000e+00 : f32
    %0 = vector.broadcast %cst : f32 to vector<256x128xf32>
    %c0 = arith.constant 0 : index
    %c0_0 = arith.constant 0 : index
    %c0_1 = arith.constant 0 : index
    %c0_2 = arith.constant 0 : index
    %1 = vector.load %arg1[%c0, %c0_0, %c0_1, %c0_2] : memref<1x18x18x128xf32, #tpu.memory_space<vmem>>, vector<1x16x16x128xf32>
    %2 = vector.shape_cast %1 : vector<1x16x16x128xf32> to vector<16x16x128xf32>
    %3 = vector.shape_cast %2 : vector<16x16x128xf32> to vector<256x128xf32>
    %4 = arith.truncf %3 : vector<256x128xf32> to vector<256x128xbf16>
    %c0_3 = arith.constant 0 : index
    %c0_4 = arith.constant 0 : index
    %c0_5 = arith.constant 0 : index
    %5 = vector.load %arg2[%c0_3, %c0_4, %c0_5] : memref<9x128x128xbf16, #tpu.memory_space<vmem>>, vector<1x128x128xbf16>
    %6 = vector.shape_cast %5 : vector<1x128x128xbf16> to vector<128x128xbf16>
    %cst_6 = arith.constant dense<0.000000e+00> : vector<256x128xf32>
    %7 = tpu.matmul %4, %6, %cst_6 {dimension_numbers = #tpu.dot_dimension_numbers<[1], [0], [0], [1], [0, 0, 1, 1], [], []>} : vector<256x128xbf16>, vector<128x128xbf16>, vector<256x128xf32> -> vector<256x128xf32>
    %8 = arith.addf %0, %7 : vector<256x128xf32>
    %c0_7 = arith.constant 0 : index
    %c0_8 = arith.constant 0 : index
    %c1 = arith.constant 1 : index
    %c0_9 = arith.constant 0 : index
    %9 = vector.load %arg1[%c0_7, %c0_8, %c1, %c0_9] : memref<1x18x18x128xf32, #tpu.memory_space<vmem>>, vector<1x16x16x128xf32>
    %10 = vector.shape_cast %9 : vector<1x16x16x128xf32> to vector<16x16x128xf32>
    %11 = vector.shape_cast %10 : vector<16x16x128xf32> to vector<256x128xf32>
    %12 = arith.truncf %11 : vector<256x128xf32> to vector<256x128xbf16>
    %c1_10 = arith.constant 1 : index
    %c0_11 = arith.constant 0 : index
    %c0_12 = arith.constant 0 : index
    %13 = vector.load %arg2[%c1_10, %c0_11, %c0_12] : memref<9x128x128xbf16, #tpu.memory_space<vmem>>, vector<1x128x128xbf16>
    %14 = vector.shape_cast %13 : vector<1x128x128xbf16> to vector<128x128xbf16>
    %cst_13 = arith.constant dense<0.000000e+00> : vector<256x128xf32>
    %15 = tpu.matmul %12, %14, %cst_13 {dimension_numbers = #tpu.dot_dimension_numbers<[1], [0], [0], [1], [0, 0, 1, 1], [], []>} : vector<256x128xbf16>, vector<128x128xbf16>, vector<256x128xf32> -> vector<256x128xf32>
    %16 = arith.addf %8, %15 : vector<256x128xf32>
    %c0_14 = arith.constant 0 : index
    %c0_15 = arith.constant 0 : index
    %c2 = arith.constant 2 : index
    %c0_16 = arith.constant 0 : index
    %17 = vector.load %arg1[%c0_14, %c0_15, %c2, %c0_16] : memref<1x18x18x128xf32, #tpu.memory_space<vmem>>, vector<1x16x16x128xf32>
    %18 = vector.shape_cast %17 : vector<1x16x16x128xf32> to vector<16x16x128xf32>
    %19 = vector.shape_cast %18 : vector<16x16x128xf32> to vector<256x128xf32>
    %20 = arith.truncf %19 : vector<256x128xf32> to vector<256x128xbf16>
    %c2_17 = arith.constant 2 : index
    %c0_18 = arith.constant 0 : index
    %c0_19 = arith.constant 0 : index
    %21 = vector.load %arg2[%c2_17, %c0_18, %c0_19] : memref<9x128x128xbf16, #tpu.memory_space<vmem>>, vector<1x128x128xbf16>
    %22 = vector.shape_cast %21 : vector<1x128x128xbf16> to vector<128x128xbf16>
    %cst_20 = arith.constant dense<0.000000e+00> : vector<256x128xf32>
    %23 = tpu.matmul %20, %22, %cst_20 {dimension_numbers = #tpu.dot_dimension_numbers<[1], [0], [0], [1], [0, 0, 1, 1], [], []>} : vector<256x128xbf16>, vector<128x128xbf16>, vector<256x128xf32> -> vector<256x128xf32>
    %24 = arith.addf %16, %23 : vector<256x128xf32>
    %c0_21 = arith.constant 0 : index
    %c1_22 = arith.constant 1 : index
    %c0_23 = arith.constant 0 : index
    %c0_24 = arith.constant 0 : index
    %25 = vector.load %arg1[%c0_21, %c1_22, %c0_23, %c0_24] : memref<1x18x18x128xf32, #tpu.memory_space<vmem>>, vector<1x16x16x128xf32>
    %26 = vector.shape_cast %25 : vector<1x16x16x128xf32> to vector<16x16x128xf32>
    %27 = vector.shape_cast %26 : vector<16x16x128xf32> to vector<256x128xf32>
    %28 = arith.truncf %27 : vector<256x128xf32> to vector<256x128xbf16>
    %c3 = arith.constant 3 : index
    %c0_25 = arith.constant 0 : index
    %c0_26 = arith.constant 0 : index
    %29 = vector.load %arg2[%c3, %c0_25, %c0_26] : memref<9x128x128xbf16, #tpu.memory_space<vmem>>, vector<1x128x128xbf16>
    %30 = vector.shape_cast %29 : vector<1x128x128xbf16> to vector<128x128xbf16>
    %cst_27 = arith.constant dense<0.000000e+00> : vector<256x128xf32>
    %31 = tpu.matmul %28, %30, %cst_27 {dimension_numbers = #tpu.dot_dimension_numbers<[1], [0], [0], [1], [0, 0, 1, 1], [], []>} : vector<256x128xbf16>, vector<128x128xbf16>, vector<256x128xf32> -> vector<256x128xf32>
    %32 = arith.addf %24, %31 : vector<256x128xf32>
    %c0_28 = arith.constant 0 : index
    %c1_29 = arith.constant 1 : index
    %c1_30 = arith.constant 1 : index
    %c0_31 = arith.constant 0 : index
    %33 = vector.load %arg1[%c0_28, %c1_29, %c1_30, %c0_31] : memref<1x18x18x128xf32, #tpu.memory_space<vmem>>, vector<1x16x16x128xf32>
    %34 = vector.shape_cast %33 : vector<1x16x16x128xf32> to vector<16x16x128xf32>
    %35 = vector.shape_cast %34 : vector<16x16x128xf32> to vector<256x128xf32>
    %36 = arith.truncf %35 : vector<256x128xf32> to vector<256x128xbf16>
    %c4 = arith.constant 4 : index
    %c0_32 = arith.constant 0 : index
    %c0_33 = arith.constant 0 : index
    %37 = vector.load %arg2[%c4, %c0_32, %c0_33] : memref<9x128x128xbf16, #tpu.memory_space<vmem>>, vector<1x128x128xbf16>
    %38 = vector.shape_cast %37 : vector<1x128x128xbf16> to vector<128x128xbf16>
    %cst_34 = arith.constant dense<0.000000e+00> : vector<256x128xf32>
    %39 = tpu.matmul %36, %38, %cst_34 {dimension_numbers = #tpu.dot_dimension_numbers<[1], [0], [0], [1], [0, 0, 1, 1], [], []>} : vector<256x128xbf16>, vector<128x128xbf16>, vector<256x128xf32> -> vector<256x128xf32>
    %40 = arith.addf %32, %39 : vector<256x128xf32>
    %c0_35 = arith.constant 0 : index
    %c1_36 = arith.constant 1 : index
    %c2_37 = arith.constant 2 : index
    %c0_38 = arith.constant 0 : index
    %41 = vector.load %arg1[%c0_35, %c1_36, %c2_37, %c0_38] : memref<1x18x18x128xf32, #tpu.memory_space<vmem>>, vector<1x16x16x128xf32>
    %42 = vector.shape_cast %41 : vector<1x16x16x128xf32> to vector<16x16x128xf32>
    %43 = vector.shape_cast %42 : vector<16x16x128xf32> to vector<256x128xf32>
    %44 = arith.truncf %43 : vector<256x128xf32> to vector<256x128xbf16>
    %c5 = arith.constant 5 : index
    %c0_39 = arith.constant 0 : index
    %c0_40 = arith.constant 0 : index
    %45 = vector.load %arg2[%c5, %c0_39, %c0_40] : memref<9x128x128xbf16, #tpu.memory_space<vmem>>, vector<1x128x128xbf16>
    %46 = vector.shape_cast %45 : vector<1x128x128xbf16> to vector<128x128xbf16>
    %cst_41 = arith.constant dense<0.000000e+00> : vector<256x128xf32>
    %47 = tpu.matmul %44, %46, %cst_41 {dimension_numbers = #tpu.dot_dimension_numbers<[1], [0], [0], [1], [0, 0, 1, 1], [], []>} : vector<256x128xbf16>, vector<128x128xbf16>, vector<256x128xf32> -> vector<256x128xf32>
    %48 = arith.addf %40, %47 : vector<256x128xf32>
    %c0_42 = arith.constant 0 : index
    %c2_43 = arith.constant 2 : index
    %c0_44 = arith.constant 0 : index
    %c0_45 = arith.constant 0 : index
    %49 = vector.load %arg1[%c0_42, %c2_43, %c0_44, %c0_45] : memref<1x18x18x128xf32, #tpu.memory_space<vmem>>, vector<1x16x16x128xf32>
    %50 = vector.shape_cast %49 : vector<1x16x16x128xf32> to vector<16x16x128xf32>
    %51 = vector.shape_cast %50 : vector<16x16x128xf32> to vector<256x128xf32>
    %52 = arith.truncf %51 : vector<256x128xf32> to vector<256x128xbf16>
    %c6 = arith.constant 6 : index
    %c0_46 = arith.constant 0 : index
    %c0_47 = arith.constant 0 : index
    %53 = vector.load %arg2[%c6, %c0_46, %c0_47] : memref<9x128x128xbf16, #tpu.memory_space<vmem>>, vector<1x128x128xbf16>
    %54 = vector.shape_cast %53 : vector<1x128x128xbf16> to vector<128x128xbf16>
    %cst_48 = arith.constant dense<0.000000e+00> : vector<256x128xf32>
    %55 = tpu.matmul %52, %54, %cst_48 {dimension_numbers = #tpu.dot_dimension_numbers<[1], [0], [0], [1], [0, 0, 1, 1], [], []>} : vector<256x128xbf16>, vector<128x128xbf16>, vector<256x128xf32> -> vector<256x128xf32>
    %56 = arith.addf %48, %55 : vector<256x128xf32>
    %c0_49 = arith.constant 0 : index
    %c2_50 = arith.constant 2 : index
    %c1_51 = arith.constant 1 : index
    %c0_52 = arith.constant 0 : index
    %57 = vector.load %arg1[%c0_49, %c2_50, %c1_51, %c0_52] : memref<1x18x18x128xf32, #tpu.memory_space<vmem>>, vector<1x16x16x128xf32>
    %58 = vector.shape_cast %57 : vector<1x16x16x128xf32> to vector<16x16x128xf32>
    %59 = vector.shape_cast %58 : vector<16x16x128xf32> to vector<256x128xf32>
    %60 = arith.truncf %59 : vector<256x128xf32> to vector<256x128xbf16>
    %c7 = arith.constant 7 : index
    %c0_53 = arith.constant 0 : index
    %c0_54 = arith.constant 0 : index
    %61 = vector.load %arg2[%c7, %c0_53, %c0_54] : memref<9x128x128xbf16, #tpu.memory_space<vmem>>, vector<1x128x128xbf16>
    %62 = vector.shape_cast %61 : vector<1x128x128xbf16> to vector<128x128xbf16>
    %cst_55 = arith.constant dense<0.000000e+00> : vector<256x128xf32>
    %63 = tpu.matmul %60, %62, %cst_55 {dimension_numbers = #tpu.dot_dimension_numbers<[1], [0], [0], [1], [0, 0, 1, 1], [], []>} : vector<256x128xbf16>, vector<128x128xbf16>, vector<256x128xf32> -> vector<256x128xf32>
    %64 = arith.addf %56, %63 : vector<256x128xf32>
    %c0_56 = arith.constant 0 : index
    %c2_57 = arith.constant 2 : index
    %c2_58 = arith.constant 2 : index
    %c0_59 = arith.constant 0 : index
    %65 = vector.load %arg1[%c0_56, %c2_57, %c2_58, %c0_59] : memref<1x18x18x128xf32, #tpu.memory_space<vmem>>, vector<1x16x16x128xf32>
    %66 = vector.shape_cast %65 : vector<1x16x16x128xf32> to vector<16x16x128xf32>
    %67 = vector.shape_cast %66 : vector<16x16x128xf32> to vector<256x128xf32>
    %68 = arith.truncf %67 : vector<256x128xf32> to vector<256x128xbf16>
    %c8 = arith.constant 8 : index
    %c0_60 = arith.constant 0 : index
    %c0_61 = arith.constant 0 : index
    %69 = vector.load %arg2[%c8, %c0_60, %c0_61] : memref<9x128x128xbf16, #tpu.memory_space<vmem>>, vector<1x128x128xbf16>
    %70 = vector.shape_cast %69 : vector<1x128x128xbf16> to vector<128x128xbf16>
    %cst_62 = arith.constant dense<0.000000e+00> : vector<256x128xf32>
    %71 = tpu.matmul %68, %70, %cst_62 {dimension_numbers = #tpu.dot_dimension_numbers<[1], [0], [0], [1], [0, 0, 1, 1], [], []>} : vector<256x128xbf16>, vector<128x128xbf16>, vector<256x128xf32> -> vector<256x128xf32>
    %72 = arith.addf %64, %71 : vector<256x128xf32>
    %c0_63 = arith.constant 0 : index
    %c0_64 = arith.constant 0 : index
    %73 = vector.load %arg3[%c0_63, %c0_64] : memref<1x128xf32, #tpu.memory_space<vmem>>, vector<1x128xf32>
    %74 = vector.broadcast %73 : vector<1x128xf32> to vector<256x128xf32>
    %75 = arith.addf %72, %74 : vector<256x128xf32>
    %c0_65 = arith.constant 0 : index
    %c0_66 = arith.constant 0 : index
    %c0_67 = arith.constant 0 : index
    %c0_68 = arith.constant 0 : index
    %76 = vector.load %arg4[%c0_65, %c0_66, %c0_67, %c0_68] : memref<1x16x16x128xf32, #tpu.memory_space<vmem>>, vector<1x16x16x128xf32>
    %77 = vector.shape_cast %76 : vector<1x16x16x128xf32> to vector<16x16x128xf32>
    %78 = vector.shape_cast %77 : vector<16x16x128xf32> to vector<256x128xf32>
    %79 = arith.truncf %78 : vector<256x128xf32> to vector<256x128xbf16>
    %c0_69 = arith.constant 0 : index
    %c0_70 = arith.constant 0 : index
    %80 = vector.load %arg5[%c0_69, %c0_70] : memref<128x128xbf16, #tpu.memory_space<vmem>>, vector<128x128xbf16>
    %cst_71 = arith.constant dense<0.000000e+00> : vector<256x128xf32>
    %81 = tpu.matmul %79, %80, %cst_71 {dimension_numbers = #tpu.dot_dimension_numbers<[1], [0], [0], [1], [0, 0, 1, 1], [], []>} : vector<256x128xbf16>, vector<128x128xbf16>, vector<256x128xf32> -> vector<256x128xf32>
    %c0_72 = arith.constant 0 : index
    %c0_73 = arith.constant 0 : index
    %82 = vector.load %arg6[%c0_72, %c0_73] : memref<1x128xf32, #tpu.memory_space<vmem>>, vector<1x128xf32>
    %83 = vector.broadcast %82 : vector<1x128xf32> to vector<256x128xf32>
    %84 = arith.addf %81, %83 : vector<256x128xf32>
    %85 = arith.addf %75, %84 : vector<256x128xf32>
    %cst_74 = arith.constant 0.000000e+00 : f32
    %86 = vector.broadcast %cst_74 : f32 to vector<256x128xf32>
    %87 = arith.maximumf %85, %86 : vector<256x128xf32>
    %88 = vector.shape_cast %87 : vector<256x128xf32> to vector<1x16x16x128xf32>
    %c0_75 = arith.constant 0 : index
    %c0_76 = arith.constant 0 : index
    %c0_77 = arith.constant 0 : index
    %c0_78 = arith.constant 0 : index
    %89 = vector.load %arg7[%c0_75, %c0_76, %c0_77, %c0_78] : memref<1x16x16x128xf32, #tpu.memory_space<vmem>>, vector<1x16x16x128xf32>
    tpu.vector_store %arg7[%c0_75, %c0_76, %c0_77, %c0_78], %88 {strides = array<i32>} : memref<1x16x16x128xf32, #tpu.memory_space<vmem>>, vector<1x16x16x128xf32>,
    return
  }
  func.func @transform_0(%arg0: i32) -> (i32, i32, i32, i32) {
    %c0_i32 = arith.constant 0 : i32
    %c0_i32_0 = arith.constant 0 : i32
    %c0_i32_1 = arith.constant 0 : i32
    %c0_i32_2 = arith.constant 0 : i32
    return %arg0, %c0_i32, %c0_i32_0, %c0_i32_1 : i32, i32, i32, i32
  }
  func.func @transform_1(%arg0: i32) -> (i32, i32, i32) {
    %c0_i32 = arith.constant 0 : i32
    %c0_i32_0 = arith.constant 0 : i32
    %c0_i32_1 = arith.constant 0 : i32
    %c0_i32_2 = arith.constant 0 : i32
    return %c0_i32, %c0_i32_0, %c0_i32_1 : i32, i32, i32
  }
  func.func @transform_2(%arg0: i32) -> (i32, i32) {
    %c0_i32 = arith.constant 0 : i32
    %c0_i32_0 = arith.constant 0 : i32
    %c0_i32_1 = arith.constant 0 : i32
    return %c0_i32, %c0_i32_0 : i32, i32
  }
  func.func @transform_3(%arg0: i32) -> (i32, i32, i32, i32) {
    %c0_i32 = arith.constant 0 : i32
    %c0_i32_0 = arith.constant 0 : i32
    %c0_i32_1 = arith.constant 0 : i32
    %c0_i32_2 = arith.constant 0 : i32
    return %arg0, %c0_i32, %c0_i32_0, %c0_i32_1 : i32, i32, i32, i32
  }
  func.func @transform_4(%arg0: i32) -> (i32, i32) {
    %c0_i32 = arith.constant 0 : i32
    %c0_i32_0 = arith.constant 0 : i32
    %c0_i32_1 = arith.constant 0 : i32
    return %c0_i32, %c0_i32_0 : i32, i32
  }
  func.func @transform_5(%arg0: i32) -> (i32, i32) {
    %c0_i32 = arith.constant 0 : i32
    %c0_i32_0 = arith.constant 0 : i32
    %c0_i32_1 = arith.constant 0 : i32
    return %c0_i32, %c0_i32_0 : i32, i32
  }
  func.func @transform_6(%arg0: i32) -> (i32, i32, i32, i32) {
    %c0_i32 = arith.constant 0 : i32
    %c0_i32_0 = arith.constant 0 : i32
    %c0_i32_1 = arith.constant 0 : i32
    %c0_i32_2 = arith.constant 0 : i32
    return %arg0, %c0_i32, %c0_i32_0, %c0_i32_1 : i32, i32, i32, i32
  }
}

</mosaic_0001>

<bundles_post_ra>
// kernel: residual_block_forward.2
= control target key start
LH: loop header
LB: loop body
LE: loop exit
PB: predicated region body
PF: predicated region fallthrough
CT: control target
= control target key end

     0   :  { %s3122_s12 = smov 0   ;;  %s3954_s0 = inlined_call_operand.vmem [shape: f32[2,18,18,128], index: 0, kind: input, shape index: {}]   ;;  %s3955_s1 = inlined_call_operand.vmem [shape: bf16[9,128,128], index: 1, kind: input, shape index: {}]   ;;  %s3956_s2 = inlined_call_operand.vmem [shape: f32[1,128], index: 2, kind: input, shape index: {}]   ;;  %s3957_s3 = inlined_call_operand.vmem [shape: f32[2,16,16,128], index: 3, kind: output, shape index: {}]  }
   0x1 LB: > { %s2369_s13 = sadd.s32 4294967295, %s3100_s12   ;;  %p2373_p0 = scmp.ge.s32.totalorder %s3100_s12, 1  ;;  %s3100_s12 = sphi %s3122_s12, %s13_s12  }
   0x2   : > { %p137_p1 = scmp.lt.s32.totalorder %s3100_s12, 3 }
   0x4   : > { %p138_p2 = pnand %p2373_p0, %p137_p1 }
   0x6   : > { %141 = sbr.rel (%p138_p2) target bundleno = 754 (0x2f2), region = 32 }
   0xb   : > { %v3003_v0 = vld [vmem:[%s3955_s1 + $0x78] sm:$0xff]  ;;  %v3002_v1 = vld [vmem:[%s3955_s1 + $0x70] sm:$0xff]  ;;  %v3001_v2 = vld [vmem:[%s3955_s1 + $0x68] sm:$0xff]  ;;  %p161_p3 = scmp.lt.s32.totalorder %s2369_s13, 1 }
   0xc   : > { %3060 = vmatpush.bf16.msra.mxu1 %v3003_v0  ;;  %3061 = vmatpush.bf16.msra.mxu2 %v3003_v0  ;;  %v3000_v3 = vld [vmem:[%s3955_s1 + $0x60] sm:$0xff]  ;;  %v2999_v4 = vld [vmem:[%s3955_s1 + $0x58] sm:$0xff]  ;;  %v2998_v5 = vld [vmem:[%s3955_s1 + $0x50] sm:$0xff] }
   0xd   : > { %3062 = vmatpush.bf16.msra.mxu3 %v3003_v0  ;;  %348 = vmatpush.bf16.msra.mxu0 %v3003_v0  ;;  %s3995_s13 = smov (!%p161_p3, %s2369_s13), 1  ;;  %v2997_v6 = vld [vmem:[%s3955_s1 + $0x48] sm:$0xff]  ;;  %v2996_v7 = vld [vmem:[%s3955_s1 + $0x40] sm:$0xff]  ;;  %v3011_v16 = vld [vmem:[%s3955_s1 + $0xb8] sm:$0xff] }
   0xe   : > { %s3084_s26 = smul.u32 432, %s3995_s13  ;;  %v3019_v17 = vld [vmem:[%s3955_s1 + $0xf8] sm:$0xff]  ;;  %v3010_v24 = vld [vmem:[%s3955_s1 + $0xb0] sm:$0xff]  ;;  %v3009_v28 = vld [vmem:[%s3955_s1 + $0xa8] sm:$0xff]  ;;  %s2987_s19 = sshll.u32 %s3995_s13, 8 }
   0xf   : > { %v2995_v22 = vld [vmem:[%s3955_s1 + $0x38] sm:$0xff]  ;;  %v3018_v25 = vld [vmem:[%s3955_s1 + $0xf0] sm:$0xff]  ;;  %v3017_v29 = vld [vmem:[%s3955_s1 + $0xe8] sm:$0xff]  ;;  %s3821_s22 = scalar_lea.vmem %s3957_s3, %s2987_s19 }
  0x10   : > { %3063 = vmatpush.bf16.msra.mxu1 %v3002_v1  ;;  %3064 = vmatpush.bf16.msra.mxu2 %v3002_v1  ;;  %s3157_s4 = scalar_lea.vmem %s3954_s0, %s3084_s26  ;;  %v3027_v23 = vld [vmem:[%s3955_s1 + $0x138] sm:$0xff]  ;;  %v2994_v26 = vld [vmem:[%s3955_s1 + $0x30] sm:$0xff]  ;;  %v2993_v30 = vld [vmem:[%s3955_s1 + $0x28] sm:$0xff] }
  0x11   : > { %3065 = vmatpush.bf16.msra.mxu3 %v3002_v1  ;;  %349 = vmatpush.bf16.msra.mxu0 %v3002_v1  ;;  %v243_v8 = vld [vmem:[%s3157_s4 + $0x61] sm:$0xff]  ;;  %v244_v9 = vld [vmem:[%s3157_s4 + $0x69] sm:$0xff]  ;;  %v245_v32 = vld [vmem:[%s3157_s4 + $0x79] sm:$0xff] }
  0x12   : > { %v251_v10 = vld [vmem:[%s3157_s4 + $0xc1] sm:$0xff]  ;;  %v252_v11 = vld [vmem:[%s3157_s4 + $0xc9] sm:$0xff]  ;;  %v3176_v18 = vpack.c.bf16 %v244_v9, %v243_v8  ;;  %v253_v36 = vld [vmem:[%s3157_s4 + $0xd9] sm:$0xff] }
  0x13   : > { %v259_v12 = vld [vmem:[%s3157_s4 + $0x121] sm:$0xff]  ;;  %v260_v13 = vld [vmem:[%s3157_s4 + $0x129] sm:$0xff]  ;;  %v3178_v19 = vpack.c.bf16 %v252_v11, %v251_v10  ;;  %v261_v38 = vld [vmem:[%s3157_s4 + $0x139] sm:$0xff] }
  0x14   : > { %3066 = vmatpush.bf16.msra.mxu1 %v3001_v2  ;;  %3067 = vmatpush.bf16.msra.mxu2 %v3001_v2  ;;  %v235_v14 = vld [vmem:[%s3157_s4 + $0x1] sm:$0xff]  ;;  %v236_v15 = vld [vmem:[%s3157_s4 + $0x9] sm:$0xff]  ;;  %v279_v20 = vpack.c.bf16 %v260_v13, %v259_v12  ;;  %v237_v40 = vld [vmem:[%s3157_s4 + $0x19] sm:$0xff] }
  0x15   : > { %3068 = vmatpush.bf16.msra.mxu3 %v3001_v2  ;;  %350 = vmatpush.bf16.msra.mxu0 %v3001_v2  ;;  %v267_v21 = vpack.c.bf16 %v236_v15, %v235_v14  ;;  %v3026_v27 = vld [vmem:[%s3955_s1 + $0x130] sm:$0xff]  ;;  %v3025_v31 = vld [vmem:[%s3955_s1 + $0x128] sm:$0xff]  ;;  %v3008_v33 = vld [vmem:[%s3955_s1 + $0xa0] sm:$0xff] }
  0x16   : > { %v3016_v34 = vld [vmem:[%s3955_s1 + $0xe0] sm:$0xff]  ;;  %v3007_v44 = vld [vmem:[%s3955_s1 + $0x98] sm:$0xff]  ;;  %v3006_v52 = vld [vmem:[%s3955_s1 + $0x90] sm:$0xff] }
  0x17   : > { %v246_v35 = vld [vmem:[%s3157_s4 + $0x81] sm:$0xff]  ;;  %v3015_v45 = vld [vmem:[%s3955_s1 + $0xd8] sm:$0xff]  ;;  %v3014_v53 = vld [vmem:[%s3955_s1 + $0xd0] sm:$0xff] }
  0x18   : > { %3069 = vmatpush.bf16.msra.mxu1 %v3000_v3  ;;  %3070 = vmatpush.bf16.msra.mxu2 %v3000_v3  ;;  %v254_v37 = vld [vmem:[%s3157_s4 + $0xe1] sm:$0xff]  ;;  %v3238_v46 = vpack.c.bf16 %v246_v35, %v245_v32  ;;  %v2991_v50 = vld [vmem:[%s3955_s1 + $0x18] sm:$0xff]  ;;  %v2990_v54 = vld [vmem:[%s3955_s1 + $0x10] sm:$0xff] }
  0x19   : > { %3071 = vmatpush.bf16.msra.mxu3 %v3000_v3  ;;  %351 = vmatpush.bf16.msra.mxu0 %v3000_v3  ;;  %v262_v39 = vld [vmem:[%s3157_s4 + $0x141] sm:$0xff]  ;;  %v3240_v47 = vpack.c.bf16 %v254_v37, %v253_v36  ;;  %v3023_v51 = vld [vmem:[%s3955_s1 + $0x118] sm:$0xff]  ;;  %v3022_v55 = vld [vmem:[%s3955_s1 + $0x110] sm:$0xff] }
  0x1a   : > { %v238_v41 = vld [vmem:[%s3157_s4 + $0x21] sm:$0xff]  ;;  %v280_v48 = vpack.c.bf16 %v262_v39, %v261_v38  ;;  %v247_v60 = vld [vmem:[%s3157_s4 + $0x91] sm:$0xff]  ;;  %v248_v63 = vld [vmem:[%s3157_s4 + $0x99] sm:$0xff] }
  0x1b   : > { %v2992_v42 = vld [vmem:[%s3955_s1 + $0x20] sm:$0xff]  ;;  %v3242_v49 = vpack.c.bf16 %v238_v41, %v237_v40  ;;  %v3005_v56 = vld [vmem:[%s3955_s1 + $0x88] sm:$0xff]  ;;  %v255_v0 = vld [vmem:[%s3157_s4 + $0xf1] sm:$0xff]  ;;  %v3297_v8 = vpack.c.bf16 %v248_v63, %v247_v60 }
  0x1c   : > { %3072 = vmatpush.bf16.msra.mxu1 %v2999_v4  ;;  %3073 = vmatpush.bf16.msra.mxu2 %v2999_v4  ;;  %v3024_v43 = vld [vmem:[%s3955_s1 + $0x120] sm:$0xff]  ;;  %v3013_v57 = vld [vmem:[%s3955_s1 + $0xc8] sm:$0xff]  ;;  %v263_v2 = vld [vmem:[%s3157_s4 + $0x151] sm:$0xff] }
  0x1d   : > { %3074 = vmatpush.bf16.msra.mxu3 %v2999_v4  ;;  %352 = vmatpush.bf16.msra.mxu0 %v2999_v4  ;;  %v2989_v58 = vld [vmem:[%s3955_s1 + $0x8] sm:$0xff]  ;;  %v3004_v61 = vld [vmem:[%s3955_s1 + $0x80] sm:$0xff]  ;;  %v239_v4 = vld [vmem:[%s3157_s4 + $0x31] sm:$0xff] }
  0x1e   : > { %v3021_v59 = vld [vmem:[%s3955_s1 + $0x108] sm:$0xff]  ;;  %v3012_v62 = vld [vmem:[%s3955_s1 + $0xc0] sm:$0xff]  ;;  %v3043_v12 = vld [vmem:[%s3955_s1 + $0x1b8] sm:$0xff] }
  0x1f   : > { %v256_v1 = vld [vmem:[%s3157_s4 + $0xf9] sm:$0xff]  ;;  %v574_v32 = vld [vmem:[%s3157_s4 + $0x2] sm:$0xff]  ;;  %v3042_v39 = vld [vmem:[%s3955_s1 + $0x1b0] sm:$0xff] }
  0x20   : > { %3075 = vmatpush.bf16.msra.mxu1 %v2998_v5  ;;  %3076 = vmatpush.bf16.msra.mxu2 %v2998_v5  ;;  %v264_v3 = vld [vmem:[%s3157_s4 + $0x159] sm:$0xff]  ;;  %v3299_v9 = vpack.c.bf16 %v256_v1, %v255_v0  ;;  %v3050_v40 = vld [vmem:[%s3955_s1 + $0x1f0] sm:$0xff]  ;;  %v3057_v60 = vld [vmem:[%s3955_s1 + $0x228] sm:$0xff] }
  0x21   : > { %3077 = vmatpush.bf16.msra.mxu3 %v2998_v5  ;;  %353 = vmatpush.bf16.msra.mxu0 %v2998_v5  ;;  %v240_v5 = vld [vmem:[%s3157_s4 + $0x39] sm:$0xff]  ;;  %v281_v10 = vpack.c.bf16 %v264_v3, %v263_v2  ;;  %v3034_v41 = vld [vmem:[%s3955_s1 + $0x170] sm:$0xff]  ;;  %v2512_v0 = vld [vmem:[%s3157_s4 + $0x68] sm:$0xff] }
  0x22   : > { %v269_v11 = vpack.c.bf16 %v240_v5, %v239_v4  ;;  %v3051_v13 = vld [vmem:[%s3955_s1 + $0x1f8] sm:$0xff]  ;;  %v2506_v35 = vld [vmem:[%s3157_s4 + $0x20] sm:$0xff]  ;;  %v583_v4 = vld [vmem:[%s3157_s4 + $0x6a] sm:$0xff] }
  0x23   : > { %v3035_v14 = vld [vmem:[%s3955_s1 + $0x178] sm:$0xff]  ;;  %v2511_v63 = vld [vmem:[%s3157_s4 + $0x60] sm:$0xff] }
  0x24   : > { %3078 = vmatpush.bf16.msra.mxu1 %v2997_v6  ;;  %3079 = vmatpush.bf16.msra.mxu2 %v2997_v6  ;;  %v3059_v15 = vld [vmem:[%s3955_s1 + $0x238] sm:$0xff]  ;;  %v3387_v2 = vpack.c.bf16 %v2512_v0, %v2511_v63  ;;  %v582_v3 = vld [vmem:[%s3157_s4 + $0x62] sm:$0xff] }
  0x25   : > { %3080 = vmatpush.bf16.msra.mxu3 %v2997_v6  ;;  %354 = vmatpush.bf16.msra.mxu0 %v2997_v6  ;;  %v2988_v6 = vld [vmem:[%s3955_s1] sm:$0xff]  ;;  %v2513_v5 = vld [vmem:[%s3157_s4 + $0x78] sm:$0xff] }
  0x28   : > { %3081 = vmatpush.bf16.msra.mxu1 %v2996_v7  ;;  %3082 = vmatpush.bf16.msra.mxu2 %v2996_v7 }
  0x29   : > { %3083 = vmatpush.bf16.msra.mxu3 %v2996_v7  ;;  %355 = vmatpush.bf16.msra.mxu0 %v2996_v7  ;;  %v3020_v7 = vld [vmem:[%s3955_s1 + $0x100] sm:$0xff] }
  0x2b   : > { %376 = vmatmul.bf16.vlgmr.msra.gmra.mxu1 %v3176_v18  ;;  %396 = vmatmul.bf16.vlgmr.msra.gmra.mxu2 %v3178_v19 }
  0x2c   : > { %687 = vmatpush.bf16.msrb.mxu2 %v3011_v16  ;;  %416 = vmatmul.bf16.vlgmr.msra.gmra.mxu3 %v279_v20  ;;  %v249_v16 = vld [vmem:[%s3157_s4 + $0xa9] sm:$0xff] }
  0x2d   : > { %922 = vmatpush.bf16.msrb.mxu3 %v3019_v17  ;;  %356 = vmatmul.bf16.vlgmr.msra.gmra.mxu0 %v267_v21  ;;  %v250_v17 = vld [vmem:[%s3157_s4 + $0xb1] sm:$0xff]  ;;  %v257_v20 = vld [vmem:[%s3157_s4 + $0x109] sm:$0xff] }
  0x2e   : > { %485 = vmatpush.bf16.msrb.mxu1 %v2995_v22  ;;  %1156 = vmatpush.bf16.msrb.mxu0 %v3027_v23  ;;  %v258_v21 = vld [vmem:[%s3157_s4 + $0x111] sm:$0xff]  ;;  %v265_v22 = vld [vmem:[%s3157_s4 + $0x169] sm:$0xff] }
  0x2f   : > { %v266_v23 = vld [vmem:[%s3157_s4 + $0x171] sm:$0xff] }
  0x30   : > { %688 = vmatpush.bf16.msrb.mxu2 %v3010_v24  ;;  %v241_v24 = vld [vmem:[%s3157_s4 + $0x49] sm:$0xff] }
  0x31   : > { %923 = vmatpush.bf16.msrb.mxu3 %v3018_v25  ;;  %v242_v25 = vld [vmem:[%s3157_s4 + $0x51] sm:$0xff] }
  0x32   : > { %486 = vmatpush.bf16.msrb.mxu1 %v2994_v26  ;;  %1157 = vmatpush.bf16.msrb.mxu0 %v3026_v27  ;;  %v3323_v26 = vpack.c.bf16 %v250_v17, %v249_v16  ;;  %v3325_v27 = vpack.c.bf16 %v258_v21, %v257_v20  ;;  %v3032_v16 = vld [vmem:[%s3955_s1 + $0x160] sm:$0xff] }
  0x33   : > { %v3056_v20 = vld [vmem:[%s3955_s1 + $0x220] sm:$0xff] }
  0x34   : > { %689 = vmatpush.bf16.msrb.mxu2 %v3009_v28  ;;  %v282_v28 = vpack.c.bf16 %v266_v23, %v265_v22  ;;  %v584_v21 = vld [vmem:[%s3157_s4 + $0x7a] sm:$0xff]  ;;  %v585_v22 = vld [vmem:[%s3157_s4 + $0x82] sm:$0xff]  ;;  %v2515_v23 = vld [vmem:[%s3157_s4 + $0x90] sm:$0xff] }
  0x35   : > { %924 = vmatpush.bf16.msrb.mxu3 %v3017_v29  ;;  %v270_v29 = vpack.c.bf16 %v242_v25, %v241_v24  ;;  %v2516_v24 = vld [vmem:[%s3157_s4 + $0x98] sm:$0xff] }
  0x36   : > { %487 = vmatpush.bf16.msrb.mxu1 %v2993_v30  ;;  %1158 = vmatpush.bf16.msrb.mxu0 %v3025_v31  ;;  %v171_v30 = vld [vmem:[%s3157_s4] sm:$0xff]  ;;  %v172_v31 = vld [vmem:[%s3157_s4 + $0x8] sm:$0xff] }
  0x37   : > { %v203_v36 = vpack.c.bf16 %v172_v31, %v171_v30  ;;  %v3438_v31 = vpack.c.bf16 %v2516_v24, %v2515_v23  ;;  %v2522_v23 = vld [vmem:[%s3157_s4 + $0xe0] sm:$0xff] }
  0x38   : > { %690 = vmatpush.bf16.msrb.mxu2 %v3008_v33  ;;  %v575_v33 = vld [vmem:[%s3157_s4 + $0xa] sm:$0xff] }
  0x39   : > { %925 = vmatpush.bf16.msrb.mxu3 %v3016_v34  ;;  %v2505_v34 = vld [vmem:[%s3157_s4 + $0x18] sm:$0xff]  ;;  %v606_v37 = vpack.c.bf16 %v575_v33, %v574_v32 }
  0x3a   : > { %488 = vmatpush.bf16.msrb.mxu1 %v2992_v42  ;;  %1159 = vmatpush.bf16.msrb.mxu0 %v3024_v43  ;;  %v841_v38 = vpack.c.bf16 %v2506_v35, %v2505_v34  ;;  %v3058_v42 = vld [vmem:[%s3955_s1 + $0x230] sm:$0xff]  ;;  %v576_v43 = vld [vmem:[%s3157_s4 + $0x1a] sm:$0xff] }
  0x3b   : > { %381 = vmatmul.bf16.gmra.mxu1 %v3238_v46  ;;  %401 = vmatmul.bf16.gmra.mxu2 %v3240_v47 }
  0x3c   : > { %691 = vmatpush.bf16.msrb.mxu2 %v3007_v44  ;;  %421 = vmatmul.bf16.gmra.mxu3 %v280_v48  ;;  %v577_v44 = vld [vmem:[%s3157_s4 + $0x22] sm:$0xff]  ;;  %v2508_v48 = vld [vmem:[%s3157_s4 + $0x38] sm:$0xff] }
  0x3d   : > { %926 = vmatpush.bf16.msrb.mxu3 %v3015_v45  ;;  %361 = vmatmul.bf16.gmra.mxu0 %v3242_v49  ;;  %v2507_v45 = vld [vmem:[%s3157_s4 + $0x30] sm:$0xff] }
  0x3e   : > { %489 = vmatpush.bf16.msrb.mxu1 %v2991_v50  ;;  %1160 = vmatpush.bf16.msrb.mxu0 %v3023_v51  ;;  %v3354_v50 = vpack.c.bf16 %v2508_v48, %v2507_v45  ;;  %v578_v51 = vld [vmem:[%s3157_s4 + $0x32] sm:$0xff] }
  0x3f   : > { %v3039_v48 = vld [vmem:[%s3955_s1 + $0x198] sm:$0xff] }
  0x40   : > { %692 = vmatpush.bf16.msrb.mxu2 %v3006_v52  ;;  %v579_v52 = vld [vmem:[%s3157_s4 + $0x3a] sm:$0xff] }
  0x41   : > { %927 = vmatpush.bf16.msrb.mxu3 %v3014_v53  ;;  %v2509_v53 = vld [vmem:[%s3157_s4 + $0x48] sm:$0xff] }
  0x42   : > { %490 = vmatpush.bf16.msrb.mxu1 %v2990_v54  ;;  %1161 = vmatpush.bf16.msrb.mxu0 %v3022_v55  ;;  %v2510_v54 = vld [vmem:[%s3157_s4 + $0x50] sm:$0xff]  ;;  %v3362_v55 = vpack.c.bf16 %v579_v52, %v578_v51  ;;  %v3047_v51 = vld [vmem:[%s3955_s1 + $0x1d8] sm:$0xff] }
  0x44   : > { %693 = vmatpush.bf16.msrb.mxu2 %v3005_v56  ;;  %v3364_v56 = vpack.c.bf16 %v2510_v54, %v2509_v53 }
  0x45   : > { %928 = vmatpush.bf16.msrb.mxu3 %v3013_v57  ;;  %v3041_v57 = vld [vmem:[%s3955_s1 + $0x1a8] sm:$0xff] }
  0x46   : > { %491 = vmatpush.bf16.msrb.mxu1 %v2989_v58  ;;  %1162 = vmatpush.bf16.msrb.mxu0 %v3021_v59  ;;  %v3049_v58 = vld [vmem:[%s3955_s1 + $0x1e8] sm:$0xff] }
  0x47   : > { %v3033_v59 = vld [vmem:[%s3955_s1 + $0x168] sm:$0xff] }
  0x48   : > { %694 = vmatpush.bf16.msrb.mxu2 %v3004_v61  ;;  %v580_v61 = vld [vmem:[%s3157_s4 + $0x4a] sm:$0xff] }
  0x49   : > { %929 = vmatpush.bf16.msrb.mxu3 %v3012_v62  ;;  %v581_v62 = vld [vmem:[%s3157_s4 + $0x52] sm:$0xff] }
  0x4a   : > { %492 = vmatpush.bf16.msrb.mxu1 %v2988_v6  ;;  %1163 = vmatpush.bf16.msrb.mxu0 %v3020_v7  ;;  %v3385_v1 = vpack.c.bf16 %v581_v62, %v580_v61  ;;  %v2514_v6 = vld [vmem:[%s3157_s4 + $0x80] sm:$0xff]  ;;  %v3397_v7 = vpack.c.bf16 %v583_v4, %v582_v3  ;;  %v2520_v62 = vld [vmem:[%s3157_s4 + $0xc8] sm:$0xff] }
  0x4b   : > { %386 = vmatmul.bf16.gmra.mxu1 %v3297_v8  ;;  %406 = vmatmul.bf16.gmra.mxu2 %v3299_v9  ;;  %v2519_v61 = vld [vmem:[%s3157_s4 + $0xc0] sm:$0xff] }
  0x4c   : > { %426 = vmatmul.bf16.gmra.mxu3 %v281_v10  ;;  %1625 = vmatpush.bf16.msra.mxu2 %v3043_v12 }
  0x4d   : > { %366 = vmatmul.bf16.gmra.mxu0 %v269_v11  ;;  %1859 = vmatpush.bf16.msra.mxu3 %v3051_v13  ;;  %v3048_v13 = vld [vmem:[%s3955_s1 + $0x1e0] sm:$0xff] }
  0x4e   : > { %1390 = vmatpush.bf16.msra.mxu1 %v3035_v14  ;;  %2093 = vmatpush.bf16.msra.mxu0 %v3059_v15 }
  0x50   : > { %1626 = vmatpush.bf16.msra.mxu2 %v3042_v39  ;;  %v2517_v39 = vld [vmem:[%s3157_s4 + $0xa8] sm:$0xff] }
  0x51   : > { %1860 = vmatpush.bf16.msra.mxu3 %v3050_v40  ;;  %v2518_v40 = vld [vmem:[%s3157_s4 + $0xb0] sm:$0xff] }
  0x52   : > { %1391 = vmatpush.bf16.msra.mxu1 %v3034_v41  ;;  %2094 = vmatpush.bf16.msra.mxu0 %v3058_v42 }
  0x54   : > { %1627 = vmatpush.bf16.msra.mxu2 %v3041_v57 }
  0x55   : > { %1861 = vmatpush.bf16.msra.mxu3 %v3049_v58  ;;  %v3055_v58 = vld [vmem:[%s3955_s1 + $0x218] sm:$0xff] }
  0x56   : > { %1392 = vmatpush.bf16.msra.mxu1 %v3033_v59  ;;  %2095 = vmatpush.bf16.msra.mxu0 %v3057_v60  ;;  %v588_v59 = vld [vmem:[%s3157_s4 + $0xaa] sm:$0xff]  ;;  %v589_v60 = vld [vmem:[%s3157_s4 + $0xb2] sm:$0xff] }
  0x57   : > { %v3498_v3 = vpack.c.bf16 %v589_v60, %v588_v59 }
  0x59   : > { %1862 = vmatpush.bf16.msra.mxu3 %v3048_v13 }
  0x5a   : > { %1393 = vmatpush.bf16.msra.mxu1 %v3032_v16  ;;  %2096 = vmatpush.bf16.msra.mxu0 %v3056_v20  ;;  %v590_v20 = vld [vmem:[%s3157_s4 + $0xc2] sm:$0xff] }
  0x5b   : > { %391 = vmatmul.bf16.gmra.mxu1 %v3323_v26  ;;  %411 = vmatmul.bf16.gmra.mxu2 %v3325_v27 }
  0x5c   : > { %431 = vmatmul.bf16.gmra.mxu3 %v282_v28 }
  0x5d   : > { %371 = vmatmul.bf16.gmra.mxu0 %v270_v29  ;;  %1863 = vmatpush.bf16.msra.mxu3 %v3047_v51  ;;  %v3046_v51 = vld [vmem:[%s3955_s1 + $0x1d0] sm:$0xff] }
  0x5e   : > { %2097 = vmatpush.bf16.msra.mxu0 %v3055_v58 }
  0x61   : > { %1864 = vmatpush.bf16.msra.mxu3 %v3046_v51 }
  0x6b   : > { %493 = vmatmul.bf16.vlgmr.msrb.gmra.mxu1 %v203_v36  ;;  %695 = vmatmul.bf16.vlgmr.msrb.gmra.mxu2 %v606_v37  ;;  %v586_v37 = vld [vmem:[%s3157_s4 + $0x92] sm:$0xff] }
  0x6c   : > { %930 = vmatmul.bf16.vlgmr.msrb.gmra.mxu3 %v841_v38 }
  0x6d   : > { %1164 = vmatmul.bf16.vlgmr.msrb.gmra.mxu0 %v3242_v49  ;;  %v3352_v49 = vpack.c.bf16 %v577_v44, %v576_v43 }
  0x7b   : > { %498 = vmatmul.bf16.gmra.mxu1 %v841_v38  ;;  %700 = vmatmul.bf16.gmra.mxu2 %v3352_v49  ;;  %v587_v38 = vld [vmem:[%s3157_s4 + $0x9a] sm:$0xff] }
  0x7c   : > { %935 = vmatmul.bf16.gmra.mxu3 %v3354_v50  ;;  %v3461_v43 = vpack.c.bf16 %v587_v38, %v586_v37 }
  0x7d   : > { %1169 = vmatmul.bf16.gmra.mxu0 %v269_v11  ;;  %v845_v11 = vpack.c.bf16 %v2514_v6, %v2513_v5  ;;  %v3502_v5 = vpack.c.bf16 %v2520_v62, %v2519_v61  ;;  %v3030_v62 = vld [vmem:[%s3955_s1 + $0x150] sm:$0xff] }
  0x8b   : > { %503 = vmatmul.bf16.gmra.mxu1 %v3354_v50  ;;  %705 = vmatmul.bf16.gmra.mxu2 %v3362_v55 }
  0x8c   : > { %940 = vmatmul.bf16.gmra.mxu3 %v3364_v56 }
  0x8d   : > { %1174 = vmatmul.bf16.gmra.mxu0 %v270_v29  ;;  %v3434_v29 = vpack.c.bf16 %v585_v22, %v584_v21  ;;  %v591_v21 = vld [vmem:[%s3157_s4 + $0xca] sm:$0xff]  ;;  %v2521_v22 = vld [vmem:[%s3157_s4 + $0xd8] sm:$0xff] }
  0x8e   : > { %v3525_v38 = vpack.c.bf16 %v591_v21, %v590_v20  ;;  %v3054_v20 = vld [vmem:[%s3955_s1 + $0x210] sm:$0xff] }
  0x8f   : > { %2098 = vmatpush.bf16.msra.mxu0 %v3054_v20 }
  0x9b   : > { %508 = vmatmul.bf16.gmra.mxu1 %v3364_v56  ;;  %710 = vmatmul.bf16.gmra.mxu2 %v3385_v1 }
  0x9c   : > { %945 = vmatmul.bf16.gmra.mxu3 %v3387_v2 }
  0x9d   : > { %1179 = vmatmul.bf16.gmra.mxu0 %v3176_v18  ;;  %v3040_v18 = vld [vmem:[%s3955_s1 + $0x1a0] sm:$0xff] }
  0x9e   : > { %1628 = vmatpush.bf16.msra.mxu2 %v3040_v18 }
  0xa2   : > { %1629 = vmatpush.bf16.msra.mxu2 %v3039_v48  ;;  %v3038_v48 = vld [vmem:[%s3955_s1 + $0x190] sm:$0xff] }
  0xa6   : > { %1630 = vmatpush.bf16.msra.mxu2 %v3038_v48 }
  0xa8   : > { %v3399_v10 = vpop.f32.mrf.mxu1 }
  0xaa   : > { %v3401_v12 = vpop.f32.mrf.mxu0 }
  0xab   : > { %513 = vmatmul.bf16.gmra.mxu1 %v3387_v2  ;;  %715 = vmatmul.bf16.gmra.mxu2 %v3397_v7 }
  0xac   : > { %950 = vmatmul.bf16.gmra.mxu3 %v845_v11 }
  0xad   : > { %1184 = vmatmul.bf16.gmra.mxu0 %v3238_v46 }
  0xae   : > { %v3412_v14 = vpop.f32.mrf.mxu2 }
  0xaf   : > { %v3414_v15 = vpop.f32.mrf.mxu3 }
  0xb0   : > { %v3419_v46 = vpop.f32.mrf.mxu1 }
  0xb2   : > { %v3421_v17 = vpop.f32.mrf.mxu0 }
  0xb6   : > { %v3430_v25 = vpop.f32.mrf.mxu2 }
  0xb7   : > { %v3432_v28 = vpop.f32.mrf.mxu3 }
  0xb8   : > { %v3436_v30 = vpop.f32.mrf.mxu1 }
  0xba   : > { %v3440_v32 = vpop.f32.mrf.mxu0 }
  0xbb   : > { %518 = vmatmul.bf16.gmra.mxu1 %v845_v11  ;;  %720 = vmatmul.bf16.gmra.mxu2 %v3434_v29 }
  0xbc   : > { %955 = vmatmul.bf16.gmra.mxu3 %v3438_v31 }
  0xbd   : > { %1189 = vmatmul.bf16.gmra.mxu0 %v3297_v8  ;;  %v847_v8 = vpack.c.bf16 %v2518_v40, %v2517_v39 }
  0xbe   : > { %v3445_v33 = vpop.f32.mrf.mxu2 }
  0xbf   : > { %v3447_v34 = vpop.f32.mrf.mxu3 }
  0xc0   : > { %v3449_v35 = vpop.f32.mrf.mxu1 }
  0xc2   : > { %v3451_v36 = vpop.f32.mrf.mxu0 }
  0xc6   : > { %v3457_v41 = vpop.f32.mrf.mxu2 }
  0xc7   : > { %v3459_v42 = vpop.f32.mrf.mxu3 }
  0xc8   : > { %v3463_v44 = vpop.f32.mrf.mxu1 }
  0xca   : > { %v3465_v45 = vpop.f32.mrf.mxu0 }
  0xcb   : > { %523 = vmatmul.bf16.gmra.mxu1 %v3438_v31  ;;  %725 = vmatmul.bf16.gmra.mxu2 %v3461_v43 }
  0xcc   : > { %960 = vmatmul.bf16.gmra.mxu3 %v847_v8 }
  0xcd   : > { %1194 = vmatmul.bf16.gmra.mxu0 %v3323_v26  ;;  %v3031_v26 = vld [vmem:[%s3955_s1 + $0x158] sm:$0xff] }
  0xce   : > { %v3476_v52 = vpop.f32.mrf.mxu2  ;;  %1394 = vmatpush.bf16.msra.mxu1 %v3031_v26 }
  0xcf   : > { %v3478_v53 = vpop.f32.mrf.mxu3 }
  0xd0   : > { %v3480_v54 = vpop.f32.mrf.mxu1 }
  0xd2   : > { %v3482_v57 = vpop.f32.mrf.mxu0  ;;  %1395 = vmatpush.bf16.msra.mxu1 %v3030_v62 }
  0xd6   : > { %v3494_v63 = vpop.f32.mrf.mxu2 }
  0xd7   : > { %v3496_v0 = vpop.f32.mrf.mxu3 }
  0xd8   : > { %v3500_v4 = vpop.f32.mrf.mxu1 }
  0xda   : > { %v3504_v6 = vpop.f32.mrf.mxu0 }
  0xdb   : > { %528 = vmatmul.bf16.gmra.mxu1 %v847_v8  ;;  %730 = vmatmul.bf16.gmra.mxu2 %v3498_v3 }
  0xdc   : > { %965 = vmatmul.bf16.gmra.mxu3 %v3502_v5 }
  0xdd   : > { %1199 = vmatmul.bf16.gmra.mxu0 %v3178_v19  ;;  %v3527_v19 = vpack.c.bf16 %v2522_v23, %v2521_v22  ;;  %v592_v22 = vld [vmem:[%s3157_s4 + $0xda] sm:$0xff]  ;;  %v593_v23 = vld [vmem:[%s3157_s4 + $0xe2] sm:$0xff] }
  0xde   : > { %v3509_v11 = vpop.f32.mrf.mxu2 }
  0xdf   : > { %v3511_v18 = vpop.f32.mrf.mxu3 }
  0xe0   : > { %3960 = vst [vmem:[#allocation2_spill] sm:$0xff] %v3511_v18  ;;  %v3513_v13 = vpop.f32.mrf.mxu1 }
  0xe2   : > { %v3515_v16 = vpop.f32.mrf.mxu0 }
  0xe6   : > { %v3521_v24 = vpop.f32.mrf.mxu2 }
  0xe7   : > { %v3523_v37 = vpop.f32.mrf.mxu3 }
  0xe8   : > { %3961 = vst [vmem:[#allocation3_spill] sm:$0xff] %v3523_v37  ;;  %v494_v39 = vpop.f32.mrf.mxu1 }
  0xe9   : > { %v495_v40 = vadd.f32 %v494_v39, %v3401_v12  ;;  %v2523_v39 = vld [vmem:[%s3157_s4 + $0xf0] sm:$0xff] }
  0xea   : > { %v1165_v8 = vpop.f32.mrf.mxu0 }
  0xeb   : > { %533 = vmatmul.bf16.gmra.mxu1 %v3502_v5  ;;  %735 = vmatmul.bf16.gmra.mxu2 %v3525_v38 }
  0xec   : > { %970 = vmatmul.bf16.gmra.mxu3 %v3527_v19 }
  0xed   : > { %1204 = vmatmul.bf16.gmra.mxu0 %v3240_v47 }
  0xee   : > { %v696_v12 = vpop.f32.mrf.mxu2 }
  0xef   : > { %v776_v26 = vadd.f32 %v696_v12, %v495_v40  ;;  %v931_v58 = vpop.f32.mrf.mxu3  ;;  %v2524_v40 = vld [vmem:[%s3157_s4 + $0xf8] sm:$0xff]  ;;  %v3553_v12 = vpack.c.bf16 %v593_v23, %v592_v22 }
  0xf0   : > { %v496_v59 = vpop.f32.mrf.mxu1 }
  0xf1   : > { %v1011_v60 = vadd.f32 %v931_v58, %v776_v26  ;;  %v497_v47 = vadd.f32 %v496_v59, %v3421_v17  ;;  %v3555_v58 = vpack.c.bf16 %v2524_v40, %v2523_v39 }
  0xf2   : > { %v1167_v61 = vpop.f32.mrf.mxu0 }
  0xf3   : > { %v3547_v21 = vadd.f32 %v1165_v8, %v1011_v60 }
  0xf5   : > { %3962 = vst [vmem:[#allocation4_spill] sm:$0xff] %v3547_v21 }
  0xf6   : > { %v698_v48 = vpop.f32.mrf.mxu2 }
  0xf7   : > { %v777_v51 = vadd.f32 %v698_v48, %v497_v47  ;;  %v933_v17 = vpop.f32.mrf.mxu3  ;;  %v594_v48 = vld [vmem:[%s3157_s4 + $0xf2] sm:$0xff] }
  0xf8   : > { %v499_v26 = vpop.f32.mrf.mxu1 }
  0xf9   : > { %v1012_v59 = vadd.f32 %v933_v17, %v777_v51  ;;  %v500_v37 = vadd.f32 %v499_v26, %v3440_v32  ;;  %v595_v51 = vld [vmem:[%s3157_s4 + $0xfa] sm:$0xff]  ;;  %v2525_v17 = vld [vmem:[%s3157_s4 + $0x108] sm:$0xff]  ;;  %v2526_v26 = vld [vmem:[%s3157_s4 + $0x110] sm:$0xff] }
  0xfa   : > { %v1170_v62 = vpop.f32.mrf.mxu0  ;;  %v3571_v21 = vpack.c.bf16 %v595_v51, %v594_v48  ;;  %v3573_v18 = vpack.c.bf16 %v2526_v26, %v2525_v17  ;;  %v3029_v48 = vld [vmem:[%s3955_s1 + $0x148] sm:$0xff] }
  0xfb   : > { %538 = vmatmul.bf16.gmra.mxu1 %v3527_v19  ;;  %740 = vmatmul.bf16.gmra.mxu2 %v3553_v12  ;;  %v3560_v8 = vadd.f32 %v1167_v61, %v1012_v59  ;;  %v3053_v51 = vld [vmem:[%s3955_s1 + $0x208] sm:$0xff] }
  0xfc   : > { %975 = vmatmul.bf16.gmra.mxu3 %v3555_v58  ;;  %1396 = vmatpush.bf16.msra.mxu1 %v3029_v48  ;;  %v596_v26 = vld [vmem:[%s3157_s4 + $0x10a] sm:$0xff] }
  0xfd   : > { %3963 = vst [vmem:[#allocation5_spill] sm:$0xff] %v3560_v8  ;;  %1209 = vmatmul.bf16.gmra.mxu0 %v3299_v9 }
  0xfe   : > { %v701_v60 = vpop.f32.mrf.mxu2  ;;  %2099 = vmatpush.bf16.msra.mxu0 %v3053_v51 }
  0xff   : > { %v778_v47 = vadd.f32 %v701_v60, %v500_v37  ;;  %v936_v20 = vpop.f32.mrf.mxu3 }
 0x100   : > { %v501_v22 = vpop.f32.mrf.mxu1 }
 0x101   : > { %v1013_v23 = vadd.f32 %v936_v20, %v778_v47  ;;  %v502_v32 = vadd.f32 %v501_v22, %v3451_v36 }
 0x102   : > { %v1172_v39 = vpop.f32.mrf.mxu0 }
 0x103   : > { %v3565_v40 = vadd.f32 %v1170_v62, %v1013_v23  ;;  %v3037_v62 = vld [vmem:[%s3955_s1 + $0x188] sm:$0xff] }
 0x104   : > { %1631 = vmatpush.bf16.msra.mxu2 %v3037_v62 }
 0x105   : > { %3964 = vst [vmem:[#allocation6_spill] sm:$0xff] %v3565_v40 }
 0x106   : > { %v703_v61 = vpop.f32.mrf.mxu2 }
 0x107   : > { %v779_v59 = vadd.f32 %v703_v61, %v502_v32  ;;  %v938_v8 = vpop.f32.mrf.mxu3  ;;  %v597_v61 = vld [vmem:[%s3157_s4 + $0x112] sm:$0xff] }
 0x108   : > { %v504_v9 = vpop.f32.mrf.mxu1 }
 0x109   : > { %v1014_v37 = vadd.f32 %v938_v8, %v779_v59  ;;  %v505_v60 = vadd.f32 %v504_v9, %v3465_v45  ;;  %v3045_v45 = vld [vmem:[%s3955_s1 + $0x1c8] sm:$0xff]  ;;  %v2527_v59 = vld [vmem:[%s3157_s4 + $0x120] sm:$0xff] }
 0x10a   : > { %v1175_v47 = vpop.f32.mrf.mxu0  ;;  %1865 = vmatpush.bf16.msra.mxu3 %v3045_v45  ;;  %v2528_v9 = vld [vmem:[%s3157_s4 + $0x128] sm:$0xff] }
 0x10b   : > { %543 = vmatmul.bf16.gmra.mxu1 %v3555_v58  ;;  %745 = vmatmul.bf16.gmra.mxu2 %v3571_v21  ;;  %v3578_v36 = vadd.f32 %v1172_v39, %v1014_v37  ;;  %v2607_v37 = vld [vmem:[%s3157_s4 + $0x121] sm:$0xff] }
 0x10c   : > { %980 = vmatmul.bf16.gmra.mxu3 %v3573_v18 }
 0x10d   : > { %3965 = vst [vmem:[#allocation7_spill] sm:$0xff] %v3578_v36  ;;  %1214 = vmatmul.bf16.gmra.mxu0 %v3325_v27 }
 0x10e   : > { %v706_v8 = vpop.f32.mrf.mxu2 }
 0x10f   : > { %v780_v20 = vadd.f32 %v706_v8, %v505_v60  ;;  %v941_v22 = vpop.f32.mrf.mxu3  ;;  %v2608_v60 = vld [vmem:[%s3157_s4 + $0x129] sm:$0xff]  ;;  %v3603_v8 = vpack.c.bf16 %v597_v61, %v596_v26 }
 0x110   : > { %v506_v27 = vpop.f32.mrf.mxu1 }
 0x111   : > { %v1015_v23 = vadd.f32 %v941_v22, %v780_v20  ;;  %v507_v32 = vadd.f32 %v506_v27, %v3482_v57  ;;  %v3605_v22 = vpack.c.bf16 %v2528_v9, %v2527_v59  ;;  %v3607_v27 = vpack.c.bf16 %v2608_v60, %v2607_v37 }
 0x112   : > { %v1177_v39 = vpop.f32.mrf.mxu0 }
 0x113   : > { %v3595_v17 = vadd.f32 %v1175_v47, %v1015_v23  ;;  %3967 = vst [vmem:[#allocation9_spill] sm:$0xff] %v3607_v27 }
 0x115   : > { %3966 = vst [vmem:[#allocation8_spill] sm:$0xff] %v3595_v17 }
 0x116   : > { %v708_v57 = vpop.f32.mrf.mxu2 }
 0x117   : > { %v781_v62 = vadd.f32 %v708_v57, %v507_v32  ;;  %v943_v45 = vpop.f32.mrf.mxu3  ;;  %v598_v57 = vld [vmem:[%s3157_s4 + $0x122] sm:$0xff] }
 0x118   : > { %v509_v20 = vpop.f32.mrf.mxu1 }
 0x119   : > { %v1016_v48 = vadd.f32 %v943_v45, %v781_v62  ;;  %v510_v47 = vadd.f32 %v509_v20, %v3504_v6  ;;  %v599_v62 = vld [vmem:[%s3157_s4 + $0x12a] sm:$0xff]  ;;  %v2529_v45 = vld [vmem:[%s3157_s4 + $0x138] sm:$0xff] }
 0x11a   : > { %v1180_v23 = vpop.f32.mrf.mxu0  ;;  %v2609_v20 = vld [vmem:[%s3157_s4 + $0x139] sm:$0xff] }
 0x11b   : > { %548 = vmatmul.bf16.gmra.mxu1 %v3573_v18  ;;  %750 = vmatmul.bf16.gmra.mxu2 %v3603_v8  ;;  %v3612_v32 = vadd.f32 %v1177_v39, %v1016_v48  ;;  %v2530_v39 = vld [vmem:[%s3157_s4 + $0x140] sm:$0xff] }
 0x11c   : > { %985 = vmatmul.bf16.gmra.mxu3 %v3605_v22  ;;  %v2610_v48 = vld [vmem:[%s3157_s4 + $0x141] sm:$0xff] }
 0x11d   : > { %3968 = vst [vmem:[#allocation10_spill] sm:$0xff] %v3612_v32  ;;  %1219 = vmatmul.bf16.gmra.mxu0 %v3607_v27  ;;  %v3625_v27 = vpack.c.bf16 %v599_v62, %v598_v57  ;;  %v3627_v40 = vpack.c.bf16 %v2610_v48, %v2609_v20  ;;  %v3028_v62 = vld [vmem:[%s3955_s1 + $0x140] sm:$0xff]  ;;  %v2531_v48 = vld [vmem:[%s3157_s4 + $0x150] sm:$0xff] }
 0x11e   : > { %v711_v51 = vpop.f32.mrf.mxu2  ;;  %1397 = vmatpush.bf16.msra.mxu1 %v3028_v62  ;;  %v601_v20 = vld [vmem:[%s3157_s4 + $0x142] sm:$0xff] }
 0x11f   : > { %v782_v26 = vadd.f32 %v711_v51, %v510_v47  ;;  %v946_v61 = vpop.f32.mrf.mxu3  ;;  %v853_v51 = vpack.c.bf16 %v2530_v39, %v2529_v45  ;;  %v600_v39 = vld [vmem:[%s3157_s4 + $0x13a] sm:$0xff] }
 0x120   : > { %v511_v6 = vpop.f32.mrf.mxu1 }
 0x121   : > { %v1017_v59 = vadd.f32 %v946_v61, %v782_v26  ;;  %v512_v9 = vadd.f32 %v511_v6, %v3515_v16  ;;  %v3044_v61 = vld [vmem:[%s3955_s1 + $0x1c0] sm:$0xff] }
 0x122   : > { %v1182_v37 = vpop.f32.mrf.mxu0  ;;  %1866 = vmatpush.bf16.msra.mxu3 %v3044_v61  ;;  %v2612_v61 = vld [vmem:[%s3157_s4 + $0x159] sm:$0xff] }
 0x123   : > { %v3617_v60 = vadd.f32 %v1180_v23, %v1017_v59 }
 0x125   : > { %3969 = vst [vmem:[#allocation11_spill] sm:$0xff] %v3617_v60 }
 0x126   : > { %v713_v32 = vpop.f32.mrf.mxu2 }
 0x127   : > { %v783_v17 = vadd.f32 %v713_v32, %v512_v9  ;;  %v948_v36 = vpop.f32.mrf.mxu3  ;;  %v3036_v32 = vld [vmem:[%s3955_s1 + $0x180] sm:$0xff] }
 0x128   : > { %v514_v47 = vpop.f32.mrf.mxu1  ;;  %1632 = vmatpush.bf16.msra.mxu2 %v3036_v32  ;;  %v2611_v32 = vld [vmem:[%s3157_s4 + $0x151] sm:$0xff] }
 0x129   : > { %v1018_v26 = vadd.f32 %v948_v36, %v783_v17  ;;  %v515_v36 = vadd.f32 %v514_v47, %v3399_v10  ;;  %v3052_v10 = vld [vmem:[%s3955_s1 + $0x200] sm:$0xff]  ;;  %v3660_v62 = vpack.c.bf16 %v2612_v61, %v2611_v32  ;;  %v602_v32 = vld [vmem:[%s3157_s4 + $0x152] sm:$0xff] }
 0x12a   : > { %v1185_v16 = vpop.f32.mrf.mxu0  ;;  %2100 = vmatpush.bf16.msra.mxu0 %v3052_v10  ;;  %v603_v61 = vld [vmem:[%s3157_s4 + $0x15a] sm:$0xff] }
 0x12b   : > { %553 = vmatmul.bf16.gmra.mxu1 %v3605_v22  ;;  %755 = vmatmul.bf16.gmra.mxu2 %v3625_v27  ;;  %v3631_v23 = vadd.f32 %v1182_v37, %v1018_v26  ;;  %v2532_v26 = vld [vmem:[%s3157_s4 + $0x158] sm:$0xff]  ;;  %3972 = vst [vmem:[#allocation14_spill] sm:$0xff] %v3660_v62 }
 0x12c   : > { %990 = vmatmul.bf16.gmra.mxu3 %v853_v51  ;;  %v3658_v60 = vpack.c.bf16 %v2532_v26, %v2531_v48 }
 0x12d   : > { %3970 = vst [vmem:[#allocation12_spill] sm:$0xff] %v3631_v23  ;;  %1224 = vmatmul.bf16.gmra.mxu0 %v3627_v40 }
 0x12e   : > { %v716_v17 = vpop.f32.mrf.mxu2 }
 0x12f   : > { %v784_v6 = vadd.f32 %v716_v17, %v515_v36  ;;  %v951_v59 = vpop.f32.mrf.mxu3 }
 0x130   : > { %v516_v9 = vpop.f32.mrf.mxu1 }
 0x131   : > { %v1019_v37 = vadd.f32 %v951_v59, %v784_v6  ;;  %v517_v47 = vadd.f32 %v516_v9, %v3419_v46  ;;  %v3656_v59 = vpack.c.bf16 %v601_v20, %v600_v39 }
 0x132   : > { %v1187_v57 = vpop.f32.mrf.mxu0 }
 0x133   : > { %v3647_v45 = vadd.f32 %v1185_v16, %v1019_v37 }
 0x135   : > { %3971 = vst [vmem:[#allocation13_spill] sm:$0xff] %v3647_v45 }
 0x136   : > { %v718_v36 = vpop.f32.mrf.mxu2 }
 0x137   : > { %v785_v17 = vadd.f32 %v718_v36, %v517_v47  ;;  %v953_v6 = vpop.f32.mrf.mxu3 }
 0x138   : > { %v519_v23 = vpop.f32.mrf.mxu1 }
 0x139   : > { %v1020_v16 = vadd.f32 %v953_v6, %v785_v17  ;;  %v520_v9 = vadd.f32 %v519_v23, %v3436_v30  ;;  %v2534_v17 = vld [vmem:[%s3157_s4 + $0x170] sm:$0xff]  ;;  %v3677_v30 = vpack.c.bf16 %v603_v61, %v602_v32 }
 0x13a   : > { %v1190_v37 = vpop.f32.mrf.mxu0  ;;  %v2613_v6 = vld [vmem:[%s3157_s4 + $0x169] sm:$0xff] }
 0x13b   : > { %558 = vmatmul.bf16.gmra.mxu1 %v853_v51  ;;  %760 = vmatmul.bf16.gmra.mxu2 %v3656_v59  ;;  %v3663_v46 = vadd.f32 %v1187_v57, %v1020_v16  ;;  %v2533_v57 = vld [vmem:[%s3157_s4 + $0x168] sm:$0xff]  ;;  %v2614_v16 = vld [vmem:[%s3157_s4 + $0x171] sm:$0xff] }
 0x13c   : > { %995 = vmatmul.bf16.gmra.mxu3 %v3658_v60 }
 0x13d   : > { %3973 = vst [vmem:[#allocation15_spill] sm:$0xff] %v3663_v46  ;;  %1229 = vmatmul.bf16.gmra.mxu0 %v3660_v62 }
 0x13e   : > { %v721_v10 = vpop.f32.mrf.mxu2 }
 0x13f   : > { %v786_v39 = vadd.f32 %v721_v10, %v520_v9  ;;  %v956_v20 = vpop.f32.mrf.mxu3  ;;  %v855_v9 = vpack.c.bf16 %v2534_v17, %v2533_v57  ;;  %v1089_v10 = vpack.c.bf16 %v2614_v16, %v2613_v6  ;;  %v604_v57 = vld [vmem:[%s3157_s4 + $0x16a] sm:$0xff]  ;;  %v2535_v17 = vld [vmem:[%s3157_s4 + $0x180] sm:$0xff] }
 0x140   : > { %v521_v48 = vpop.f32.mrf.mxu1  ;;  %v2536_v6 = vld [vmem:[%s3157_s4 + $0x188] sm:$0xff] }
 0x141   : > { %v1021_v47 = vadd.f32 %v956_v20, %v786_v39  ;;  %v522_v36 = vadd.f32 %v521_v48, %v3449_v35  ;;  %v2615_v16 = vld [vmem:[%s3157_s4 + $0x181] sm:$0xff] }
 0x142   : > { %v1192_v26 = vpop.f32.mrf.mxu0 }
 0x143   : > { %v3668_v51 = vadd.f32 %v1190_v37, %v1021_v47 }
 0x145   : > { %3974 = vst [vmem:[#allocation16_spill] sm:$0xff] %v3668_v51 }
 0x146   : > { %v723_v46 = vpop.f32.mrf.mxu2 }
 0x147   : > { %v787_v45 = vadd.f32 %v723_v46, %v522_v36  ;;  %v958_v62 = vpop.f32.mrf.mxu3  ;;  %v605_v36 = vld [vmem:[%s3157_s4 + $0x172] sm:$0xff] }
 0x148   : > { %v524_v23 = vpop.f32.mrf.mxu1 }
 0x149   : > { %v1022_v39 = vadd.f32 %v958_v62, %v787_v45  ;;  %v525_v46 = vadd.f32 %v524_v23, %v3463_v44  ;;  %v3693_v44 = vpack.c.bf16 %v605_v36, %v604_v57 }
 0x14a   : > { %v1195_v37 = vpop.f32.mrf.mxu0 }
 0x14b   : > { %563 = vmatmul.bf16.gmra.mxu1 %v3658_v60  ;;  %765 = vmatmul.bf16.gmra.mxu2 %v3677_v30  ;;  %v3681_v35 = vadd.f32 %v1192_v26, %v1022_v39  ;;  %v2616_v39 = vld [vmem:[%s3157_s4 + $0x189] sm:$0xff] }
 0x14c   : > { %1000 = vmatmul.bf16.gmra.mxu3 %v855_v9 }
 0x14d   : > { %3975 = vst [vmem:[#allocation17_spill] sm:$0xff] %v3681_v35  ;;  %1234 = vmatmul.bf16.gmra.mxu0 %v1089_v10 }
 0x14e   : > { %v726_v20 = vpop.f32.mrf.mxu2 }
 0x14f   : > { %v788_v48 = vadd.f32 %v726_v20, %v525_v46  ;;  %v961_v47 = vpop.f32.mrf.mxu3  ;;  %v3695_v46 = vpack.c.bf16 %v2536_v6, %v2535_v17  ;;  %v3697_v20 = vpack.c.bf16 %v2616_v39, %v2615_v16  ;;  %v2826_v6 = vld [vmem:[%s3157_s4 + $0x39] sm:$0xff] }
 0x150   : > { %v526_v45 = vpop.f32.mrf.mxu1 }
 0x151   : > { %v1023_v62 = vadd.f32 %v961_v47, %v788_v48  ;;  %v527_v26 = vadd.f32 %v526_v45, %v3480_v54 }
 0x152   : > { %v1197_v32 = vpop.f32.mrf.mxu0 }
 0x153   : > { %v3684_v61 = vadd.f32 %v1195_v37, %v1023_v62 }
 0x156   : > { %v728_v35 = vpop.f32.mrf.mxu2 }
 0x157   : > { %v789_v10 = vadd.f32 %v728_v35, %v527_v26  ;;  %v963_v51 = vpop.f32.mrf.mxu3  ;;  %v2825_v26 = vld [vmem:[%s3157_s4 + $0x31] sm:$0xff] }
 0x158   : > { %v529_v23 = vpop.f32.mrf.mxu1 }
 0x159   : > { %v1024_v37 = vadd.f32 %v963_v51, %v789_v10  ;;  %v530_v35 = vadd.f32 %v529_v23, %v3500_v4 }
 0x15a   : > { %v1200_v48 = vpop.f32.mrf.mxu0 }
 0x15b   : > { %568 = vmatmul.bf16.gmra.mxu1 %v855_v9  ;;  %770 = vmatmul.bf16.gmra.mxu2 %v3693_v44  ;;  %v3700_v54 = vadd.f32 %v1197_v32, %v1024_v37  ;;  %v1778_v37 = vpack.c.bf16 %v2826_v6, %v2825_v26  ;;  %v2828_v26 = vld [vmem:[%s3157_s4 + $0x51] sm:$0xff] }
 0x15c   : > { %1005 = vmatmul.bf16.gmra.mxu3 %v3695_v46 }
 0x15d   : > { %3976 = vst [vmem:[#allocation18_spill] sm:$0xff] %v3700_v54  ;;  %1239 = vmatmul.bf16.gmra.mxu0 %v3697_v20 }
 0x15e   : > { %v731_v47 = vpop.f32.mrf.mxu2 }
 0x15f   : > { %v790_v45 = vadd.f32 %v731_v47, %v530_v35  ;;  %v966_v62 = vpop.f32.mrf.mxu3 }
 0x160   : > { %v531_v57 = vpop.f32.mrf.mxu1 }
 0x161   : > { %v1025_v36 = vadd.f32 %v966_v62, %v790_v45  ;;  %v532_v9 = vadd.f32 %v531_v57, %v3513_v13 }
 0x162   : > { %v1202_v51 = vpop.f32.mrf.mxu0 }
 0x163   : > { %v3705_v17 = vadd.f32 %v1200_v48, %v1025_v36 }
 0x166   : > { %v733_v32 = vpop.f32.mrf.mxu2 }
 0x167   : > { %v791_v16 = vadd.f32 %v733_v32, %v532_v9  ;;  %v968_v39 = vpop.f32.mrf.mxu3 }
 0x168   : > { %v534_v10 = vpop.f32.mrf.mxu1 }
 0x169   : > { %v1026_v54 = vadd.f32 %v968_v39, %v791_v16  ;;  %v535_v13 = vadd.f32 %v534_v10, %v3412_v14 }
 0x16a   : > { %v1205_v4 = vpop.f32.mrf.mxu0 }
 0x16b   : > { %1398 = vmatmul.bf16.vlgmr.msra.gmra.mxu1 %v3352_v49  ;;  %1633 = vmatmul.bf16.vlgmr.msra.gmra.mxu2 %v3354_v50  ;;  %v3712_v23 = vadd.f32 %v1202_v51, %v1026_v54  ;;  %v2827_v49 = vld [vmem:[%s3157_s4 + $0x49] sm:$0xff] }
 0x16c   : > { %1867 = vmatmul.bf16.vlgmr.msra.gmra.mxu3 %v1778_v37  ;;  %v1779_v32 = vpack.c.bf16 %v2828_v26, %v2827_v49 }
 0x16d   : > { %2101 = vmatmul.bf16.vlgmr.msra.gmra.mxu0 %v3362_v55 }
 0x16e   : > { %v736_v48 = vpop.f32.mrf.mxu2 }
 0x16f   : > { %v792_v35 = vadd.f32 %v736_v48, %v535_v13  ;;  %v971_v47 = vpop.f32.mrf.mxu3 }
 0x170   : > { %v536_v45 = vpop.f32.mrf.mxu1 }
 0x171   : > { %v1027_v62 = vadd.f32 %v971_v47, %v792_v35  ;;  %v537_v9 = vadd.f32 %v536_v45, %v3430_v25 }
 0x172   : > { %v1207_v57 = vpop.f32.mrf.mxu0 }
 0x173   : > { %v3716_v36 = vadd.f32 %v1205_v4, %v1027_v62  ;;  %v2830_v62 = vld [vmem:[%s3157_s4 + $0x69] sm:$0xff] }
 0x176   : > { %v738_v50 = vpop.f32.mrf.mxu2 }
 0x177   : > { %v793_v54 = vadd.f32 %v738_v50, %v537_v9  ;;  %v973_v51 = vpop.f32.mrf.mxu3 }
 0x178   : > { %v539_v6 = vpop.f32.mrf.mxu1 }
 0x179   : > { %v1028_v16 = vadd.f32 %v973_v51, %v793_v54  ;;  %v540_v25 = vadd.f32 %v539_v6, %v3445_v33 }
 0x17a   : > { %v1210_v14 = vpop.f32.mrf.mxu0 }
 0x17b   : > { %1403 = vmatmul.bf16.gmra.mxu1 %v3362_v55  ;;  %1638 = vmatmul.bf16.gmra.mxu2 %v3364_v56  ;;  %v3723_v39 = vadd.f32 %v1207_v57, %v1028_v16  ;;  %v2829_v55 = vld [vmem:[%s3157_s4 + $0x61] sm:$0xff] }
 0x17c   : > { %1872 = vmatmul.bf16.gmra.mxu3 %v1779_v32  ;;  %v1780_v26 = vpack.c.bf16 %v2830_v62, %v2829_v55 }
 0x17d   : > { %2106 = vmatmul.bf16.gmra.mxu0 %v3385_v1 }
 0x17e   : > { %v741_v10 = vpop.f32.mrf.mxu2 }
 0x17f   : > { %v794_v37 = vadd.f32 %v741_v10, %v540_v25  ;;  %v976_v4 = vpop.f32.mrf.mxu3  ;;  %v2671_v10 = vld [vmem:[%s3157_s4 + $0x62] sm:$0xff] }
 0x180   : > { %v541_v13 = vpop.f32.mrf.mxu1 }
 0x181   : > { %v1029_v48 = vadd.f32 %v976_v4, %v794_v37  ;;  %v542_v45 = vadd.f32 %v541_v13, %v3457_v41  ;;  %v2672_v37 = vld [vmem:[%s3157_s4 + $0x6a] sm:$0xff]  ;;  %v2752_v4 = vld [vmem:[%s3157_s4 + $0x80] sm:$0xff] }
 0x182   : > { %v1212_v35 = vpop.f32.mrf.mxu0 }
 0x183   : > { %v3727_v47 = vadd.f32 %v1210_v14, %v1029_v48  ;;  %v2831_v48 = vld [vmem:[%s3157_s4 + $0x79] sm:$0xff] }
 0x186   : > { %v743_v56 = vpop.f32.mrf.mxu2 }
 0x187   : > { %v795_v57 = vadd.f32 %v743_v56, %v542_v45  ;;  %v978_v9 = vpop.f32.mrf.mxu3 }
 0x188   : > { %v544_v49 = vpop.f32.mrf.mxu1 }
 0x189   : > { %v1030_v50 = vadd.f32 %v978_v9, %v795_v57  ;;  %v545_v41 = vadd.f32 %v544_v49, %v3476_v52  ;;  %v1312_v52 = vpack.c.bf16 %v2672_v37, %v2671_v10  ;;  %v2833_v10 = vld [vmem:[%s3157_s4 + $0x91] sm:$0xff]  ;;  %v2834_v37 = vld [vmem:[%s3157_s4 + $0x99] sm:$0xff] }
 0x18a   : > { %v1215_v33 = vpop.f32.mrf.mxu0 }
 0x18b   : > { %1408 = vmatmul.bf16.gmra.mxu1 %v3385_v1  ;;  %1643 = vmatmul.bf16.gmra.mxu2 %v3387_v2  ;;  %v3734_v54 = vadd.f32 %v1212_v35, %v1030_v50  ;;  %v2751_v2 = vld [vmem:[%s3157_s4 + $0x78] sm:$0xff]  ;;  %v2832_v35 = vld [vmem:[%s3157_s4 + $0x81] sm:$0xff] }
 0x18c   : > { %1877 = vmatmul.bf16.gmra.mxu3 %v1780_v26  ;;  %v1547_v62 = vpack.c.bf16 %v2752_v4, %v2751_v2  ;;  %v1781_v57 = vpack.c.bf16 %v2832_v35, %v2831_v48  ;;  %v1782_v48 = vpack.c.bf16 %v2834_v37, %v2833_v10 }
 0x18d   : > { %2111 = vmatmul.bf16.gmra.mxu0 %v3397_v7 }
 0x18e   : > { %v746_v51 = vpop.f32.mrf.mxu2 }
 0x18f   : > { %v796_v6 = vadd.f32 %v746_v51, %v545_v41  ;;  %v981_v32 = vpop.f32.mrf.mxu3 }
 0x190   : > { %v546_v16 = vpop.f32.mrf.mxu1 }
 0x191   : > { %v1031_v14 = vadd.f32 %v981_v32, %v796_v6  ;;  %v547_v13 = vadd.f32 %v546_v16, %v3494_v63 }
 0x192   : > { %v1217_v25 = vpop.f32.mrf.mxu0 }
 0x193   : > { %v3739_v1 = vadd.f32 %v1215_v33, %v1031_v14 }
 0x196   : > { %v748_v45 = vpop.f32.mrf.mxu2 }
 0x197   : > { %v797_v7 = vadd.f32 %v748_v45, %v547_v13  ;;  %v983_v55 = vpop.f32.mrf.mxu3 }
 0x198   : > { %v549_v56 = vpop.f32.mrf.mxu1 }
 0x199   : > { %v1032_v9 = vadd.f32 %v983_v55, %v797_v7  ;;  %v550_v63 = vadd.f32 %v549_v56, %v3509_v11 }
 0x19a   : > { %v1220_v49 = vpop.f32.mrf.mxu0 }
 0x19b   : > { %1413 = vmatmul.bf16.gmra.mxu1 %v1312_v52  ;;  %1648 = vmatmul.bf16.gmra.mxu2 %v1547_v62  ;;  %v3747_v26 = vadd.f32 %v1217_v25, %v1032_v9  ;;  %v2675_v9 = vld [vmem:[%s3157_s4 + $0x92] sm:$0xff] }
 0x19c   : > { %1882 = vmatmul.bf16.gmra.mxu3 %v1781_v57 }
 0x19d   : > { %2116 = vmatmul.bf16.gmra.mxu0 %v3434_v29 }
 0x19e   : > { %v751_v50 = vpop.f32.mrf.mxu2 }
 0x19f   : > { %v798_v33 = vadd.f32 %v751_v50, %v550_v63  ;;  %v986_v41 = vpop.f32.mrf.mxu3  ;;  %v2756_v63 = vld [vmem:[%s3157_s4 + $0xb0] sm:$0xff] }
 0x1a0   : > { %v551_v51 = vpop.f32.mrf.mxu1 }
 0x1a1   : > { %v1033_v6 = vadd.f32 %v986_v41, %v798_v33  ;;  %v552_v14 = vadd.f32 %v551_v51, %v3521_v24  ;;  %v2835_v33 = vld [vmem:[%s3157_s4 + $0xa9] sm:$0xff]  ;;  %v2836_v41 = vld [vmem:[%s3157_s4 + $0xb1] sm:$0xff] }
 0x1a2   : > { %v1222_v32 = vpop.f32.mrf.mxu0  ;;  %v1783_v10 = vpack.c.bf16 %v2836_v41, %v2835_v33 }
 0x1a3   : > { %v3751_v16 = vadd.f32 %v1220_v49, %v1033_v6  ;;  %v2676_v49 = vld [vmem:[%s3157_s4 + $0x9a] sm:$0xff] }
 0x1a6   : > { %v753_v2 = vpop.f32.mrf.mxu2 }
 0x1a7   : > { %v799_v25 = vadd.f32 %v753_v2, %v552_v14  ;;  %v988_v4 = vpop.f32.mrf.mxu3 }
 0x1a8   : > { %v554_v13 = vpop.f32.mrf.mxu1 }
 0x1a9   : > { %v1034_v35 = vadd.f32 %v988_v4, %v799_v25  ;;  %v555_v24 = vadd.f32 %v554_v13, %v3414_v15  ;;  %v1314_v15 = vpack.c.bf16 %v2676_v49, %v2675_v9 }
 0x1aa   : > { %v1225_v11 = vpop.f32.mrf.mxu0 }
 0x1ab   : > { %1418 = vmatmul.bf16.gmra.mxu1 %v3434_v29  ;;  %1653 = vmatmul.bf16.gmra.mxu2 %v3438_v31  ;;  %v3758_v45 = vadd.f32 %v1222_v32, %v1034_v35  ;;  %v2755_v31 = vld [vmem:[%s3157_s4 + $0xa8] sm:$0xff] }
 0x1ac   : > { %1887 = vmatmul.bf16.gmra.mxu3 %v1782_v48  ;;  %v1549_v32 = vpack.c.bf16 %v2756_v63, %v2755_v31 }
 0x1ad   : > { %2121 = vmatmul.bf16.gmra.mxu0 %v3461_v43 }
 0x1ae   : > { %v756_v7 = vpop.f32.mrf.mxu2 }
 0x1af   : > { %v800_v55 = vadd.f32 %v756_v7, %v555_v24  ;;  %v991_v52 = vpop.f32.mrf.mxu3 }
 0x1b0   : > { %v556_v62 = vpop.f32.mrf.mxu1 }
 0x1b1   : > { %v1035_v56 = vadd.f32 %v991_v52, %v800_v55  ;;  %v557_v50 = vadd.f32 %v556_v62, %v3432_v28  ;;  %v2837_v52 = vld [vmem:[%s3157_s4 + $0xc1] sm:$0xff]  ;;  %v2838_v62 = vld [vmem:[%s3157_s4 + $0xc9] sm:$0xff] }
 0x1b2   : > { %v1227_v57 = vpop.f32.mrf.mxu0  ;;  %v1784_v31 = vpack.c.bf16 %v2838_v62, %v2837_v52 }
 0x1b3   : > { %v3763_v29 = vadd.f32 %v1225_v11, %v1035_v56 }
 0x1b6   : > { %v758_v51 = vpop.f32.mrf.mxu2 }
 0x1b7   : > { %v801_v43 = vadd.f32 %v758_v51, %v557_v50  ;;  %v993_v6 = vpop.f32.mrf.mxu3 }
 0x1b8   : > { %v559_v14 = vpop.f32.mrf.mxu1 }
 0x1b9   : > { %v1036_v37 = vadd.f32 %v993_v6, %v801_v43  ;;  %v560_v28 = vadd.f32 %v559_v14, %v3447_v34 }
 0x1ba   : > { %v1230_v2 = vpop.f32.mrf.mxu0 }
 0x1bb   : > { %1423 = vmatmul.bf16.gmra.mxu1 %v1314_v15  ;;  %1658 = vmatmul.bf16.gmra.mxu2 %v1549_v32  ;;  %v3771_v25 = vadd.f32 %v1227_v57, %v1036_v37 }
 0x1bc   : > { %1892 = vmatmul.bf16.gmra.mxu3 %v1783_v10  ;;  %v2840_v10 = vld [vmem:[%s3157_s4 + $0xe1] sm:$0xff] }
 0x1bd   : > { %2126 = vmatmul.bf16.gmra.mxu0 %v3498_v3 }
 0x1be   : > { %v761_v4 = vpop.f32.mrf.mxu2 }
 0x1bf   : > { %v802_v13 = vadd.f32 %v761_v4, %v560_v28  ;;  %v996_v48 = vpop.f32.mrf.mxu3 }
 0x1c0   : > { %v561_v35 = vpop.f32.mrf.mxu1 }
 0x1c1   : > { %v1037_v11 = vadd.f32 %v996_v48, %v802_v13  ;;  %v562_v55 = vadd.f32 %v561_v35, %v3459_v42 }
 0x1c2   : > { %v1232_v24 = vpop.f32.mrf.mxu0 }
 0x1c3   : > { %v3775_v7 = vadd.f32 %v1230_v2, %v1037_v11 }
 0x1c6   : > { %v763_v56 = vpop.f32.mrf.mxu2 }
 0x1c7   : > { %v803_v57 = vadd.f32 %v763_v56, %v562_v55  ;;  %v998_v9 = vpop.f32.mrf.mxu3 }
 0x1c8   : > { %v564_v49 = vpop.f32.mrf.mxu1 }
 0x1c9   : > { %v1038_v63 = vadd.f32 %v998_v9, %v803_v57  ;;  %v565_v42 = vadd.f32 %v564_v49, %v3478_v53  ;;  %v3978_v9 = vld [vmem:[#allocation3_spill] sm:$0xff] }
 0x1ca   : > { %v1235_v34 = vpop.f32.mrf.mxu0 }
 0x1cb   : > { %1428 = vmatmul.bf16.gmra.mxu1 %v3498_v3  ;;  %1663 = vmatmul.bf16.gmra.mxu2 %v3502_v5  ;;  %v3782_v50 = vadd.f32 %v1232_v24, %v1038_v63  ;;  %v2839_v3 = vld [vmem:[%s3157_s4 + $0xd9] sm:$0xff] }
 0x1cc   : > { %1897 = vmatmul.bf16.gmra.mxu3 %v1784_v31  ;;  %v1785_v4 = vpack.c.bf16 %v2840_v10, %v2839_v3  ;;  %v2842_v31 = vld [vmem:[%s3157_s4 + $0xf9] sm:$0xff] }
 0x1cd   : > { %2131 = vmatmul.bf16.gmra.mxu0 %v3525_v38 }
 0x1ce   : > { %v766_v33 = vpop.f32.mrf.mxu2 }
 0x1cf   : > { %v804_v41 = vadd.f32 %v766_v33, %v565_v42  ;;  %v1001_v51 = vpop.f32.mrf.mxu3 }
 0x1d0   : > { %v566_v43 = vpop.f32.mrf.mxu1 }
 0x1d1   : > { %v1039_v6 = vadd.f32 %v1001_v51, %v804_v41  ;;  %v567_v14 = vadd.f32 %v566_v43, %v3496_v0  ;;  %v3977_v0 = vld [vmem:[#allocation2_spill] sm:$0xff] }
 0x1d2   : > { %v1237_v15 = vpop.f32.mrf.mxu0 }
 0x1d3   : > { %v3786_v32 = vadd.f32 %v1235_v34, %v1039_v6  ;;  %v3979_v6 = vld [vmem:[#allocation4_spill] sm:$0xff] }
 0x1d6   : > { %v768_v5 = vpop.f32.mrf.mxu2 }
 0x1d7   : > { %v805_v37 = vadd.f32 %v768_v5, %v567_v14  ;;  %v1003_v2 = vpop.f32.mrf.mxu3 }
 0x1d8   : > { %v569_v28 = vpop.f32.mrf.mxu1 }
 0x1d9   : > { %v1040_v13 = vadd.f32 %v1003_v2, %v805_v37  ;;  %v570_v35 = vadd.f32 %v569_v28, %v3977_v0  ;;  %v2844_v0 = vld [vmem:[%s3157_s4 + $0x111] sm:$0xff] }
 0x1da   : > { %v1240_v53 = vpop.f32.mrf.mxu0 }
 0x1db   : > { %1433 = vmatmul.bf16.gmra.mxu1 %v3525_v38  ;;  %1668 = vmatmul.bf16.gmra.mxu2 %v3527_v19  ;;  %v3793_v48 = vadd.f32 %v1237_v15, %v1040_v13  ;;  %v2841_v38 = vld [vmem:[%s3157_s4 + $0xf1] sm:$0xff] }
 0x1dc   : > { %1902 = vmatmul.bf16.gmra.mxu3 %v1785_v4  ;;  %v1786_v33 = vpack.c.bf16 %v2842_v31, %v2841_v38  ;;  %v3980_v4 = vld [vmem:[#allocation5_spill] sm:$0xff]  ;;  %v3981_v31 = vld [vmem:[#allocation6_spill] sm:$0xff] }
 0x1dd   : > { %2136 = vmatmul.bf16.gmra.mxu0 %v3553_v12 }
 0x1de   : > { %v771_v11 = vpop.f32.mrf.mxu2 }
 0x1df   : > { %v806_v24 = vadd.f32 %v771_v11, %v570_v35  ;;  %v1006_v55 = vpop.f32.mrf.mxu3 }
 0x1e0   : > { %v571_v52 = vpop.f32.mrf.mxu1 }
 0x1e1   : > { %v1041_v62 = vadd.f32 %v1006_v55, %v806_v24  ;;  %v572_v49 = vadd.f32 %v571_v52, %v3978_v9 }
 0x1e2   : > { %v1242_v56 = vpop.f32.mrf.mxu0 }
 0x1e3   : > { %v3797_v57 = vadd.f32 %v1240_v53, %v1041_v62  ;;  %v2843_v53 = vld [vmem:[%s3157_s4 + $0x109] sm:$0xff] }
 0x1e4   : > { %v1787_v62 = vpack.c.bf16 %v2844_v0, %v2843_v53  ;;  %v3984_v0 = vld [vmem:[#allocation8_spill] sm:$0xff] }
 0x1e6   : > { %v773_v19 = vpop.f32.mrf.mxu2 }
 0x1e7   : > { %v807_v63 = vadd.f32 %v773_v19, %v572_v49  ;;  %v1008_v34 = vpop.f32.mrf.mxu3 }
 0x1e8   : > { %v1399_v42 = vpop.f32.mrf.mxu1 }
 0x1e9   : > { %v1042_v41 = vadd.f32 %v1008_v34, %v807_v63  ;;  %v1479_v15 = vadd.f32 %v1399_v42, %v3979_v6 }
 0x1ea   : > { %v2102_v51 = vpop.f32.mrf.mxu0 }
 0x1eb   : > { %1438 = vmatmul.bf16.gmra.mxu1 %v3553_v12  ;;  %1673 = vmatmul.bf16.gmra.mxu2 %v3555_v58  ;;  %v3804_v43 = vadd.f32 %v1242_v56, %v1042_v41  ;;  %v3811_v12 = vld [vmem:[%s3956_s2] ss:$0 sm:$0xff] }
 0x1ec   : > { %1907 = vmatmul.bf16.gmra.mxu3 %v1786_v33 }
 0x1ed   : > { %2141 = vmatmul.bf16.gmra.mxu0 %v3571_v21 }
 0x1ee   : > { %v1634_v14 = vpop.f32.mrf.mxu2 }
 0x1ef   : > { %v1714_v3 = vadd.f32 %v1634_v14, %v1479_v15  ;;  %v1868_v10 = vpop.f32.mrf.mxu3 }
 0x1f0   : > { %v1401_v5 = vpop.f32.mrf.mxu1 }
 0x1f1   : > { %v1948_v37 = vadd.f32 %v1868_v10, %v1714_v3  ;;  %v1480_v13 = vadd.f32 %v1401_v5, %v3980_v4 }
 0x1f2   : > { %v2104_v58 = vpop.f32.mrf.mxu0 }
 0x1f3   : > { %v2182_v2 = vadd.f32 %v2102_v51, %v1948_v37 }
 0x1f5   : > { %v2218_v28 = vadd.f32 %v3811_v12, %v2182_v2 }
 0x1f6   : > { %v1636_v35 = vpop.f32.mrf.mxu2 }
 0x1f7   : > { %v2250_v11 = vmax.f32 %v2218_v28, 0.0  ;;  %v1715_v24 = vadd.f32 %v1636_v35, %v1480_v13  ;;  %v1870_v55 = vpop.f32.mrf.mxu3  ;;  %v3983_v13 = vld [vmem:[#allocation9_spill] sm:$0xff] }
 0x1f8   : > { %v1404_v52 = vpop.f32.mrf.mxu1 }
 0x1f9   : > { %2282 = vst [vmem:[%s3821_s22] sm:$0xff] %v2250_v11  ;;  %v1949_v56 = vadd.f32 %v1870_v55, %v1715_v24  ;;  %v1481_v19 = vadd.f32 %v1404_v52, %v3981_v31  ;;  %v2768_v31 = vld [vmem:[%s3157_s4 + $0x140] sm:$0xff] }
 0x1fa   : > { %v2107_v9 = vpop.f32.mrf.mxu0 }
 0x1fb   : > { %v2183_v49 = vadd.f32 %v2104_v58, %v1949_v56  ;;  %1443 = vmatmul.bf16.gmra.mxu1 %v3571_v21  ;;  %1678 = vmatmul.bf16.gmra.mxu2 %v3573_v18  ;;  %v3982_v18 = vld [vmem:[#allocation7_spill] sm:$0xff] }
 0x1fc   : > { %1912 = vmatmul.bf16.gmra.mxu3 %v1787_v62 }
 0x1fd   : > { %2146 = vmatmul.bf16.gmra.mxu0 %v3603_v8  ;;  %v2219_v38 = vadd.f32 %v3811_v12, %v2183_v49  ;;  %v2688_v49 = vld [vmem:[%s3157_s4 + $0x12a] sm:$0xff] }
 0x1fe   : > { %v1639_v63 = vpop.f32.mrf.mxu2 }
 0x1ff   : > { %v2251_v34 = vmax.f32 %v2219_v38, 0.0  ;;  %v1716_v42 = vadd.f32 %v1639_v63, %v1481_v19  ;;  %v1873_v33 = vpop.f32.mrf.mxu3  ;;  %v2767_v38 = vld [vmem:[%s3157_s4 + $0x138] sm:$0xff]  ;;  %v3985_v19 = vld [vmem:[#allocation10_spill] sm:$0xff] }
 0x200   : > { %v1406_v41 = vpop.f32.mrf.mxu1 }
 0x201   : > { %2283 = vst [vmem:[%s3821_s22 + $0x8] sm:$0xff] %v2251_v34  ;;  %v1950_v51 = vadd.f32 %v1873_v33, %v1716_v42  ;;  %v1482_v14 = vadd.f32 %v1406_v41, %v3982_v18 }
 0x202   : > { %v2109_v6 = vpop.f32.mrf.mxu0 }
 0x203   : > { %v2184_v15 = vadd.f32 %v2107_v9, %v1950_v51  ;;  %v2687_v9 = vld [vmem:[%s3157_s4 + $0x122] sm:$0xff] }
 0x204   : > { %v1320_v51 = vpack.c.bf16 %v2688_v49, %v2687_v9  ;;  %v3988_v49 = vld [vmem:[#allocation14_spill] sm:$0xff] }
 0x205   : > { %v2220_v21 = vadd.f32 %v3811_v12, %v2184_v15 }
 0x206   : > { %v1641_v3 = vpop.f32.mrf.mxu2 }
 0x207   : > { %v2252_v10 = vmax.f32 %v2220_v21, 0.0  ;;  %v1717_v5 = vadd.f32 %v1641_v3, %v1482_v14  ;;  %v1875_v37 = vpop.f32.mrf.mxu3 }
 0x208   : > { %v1409_v58 = vpop.f32.mrf.mxu1 }
 0x209   : > { %2284 = vst [vmem:[%s3821_s22 + $0x10] sm:$0xff] %v2252_v10  ;;  %v1951_v2 = vadd.f32 %v1875_v37, %v1717_v5  ;;  %v1483_v35 = vadd.f32 %v1409_v58, %v3984_v0  ;;  %v3986_v10 = vld [vmem:[#allocation11_spill] sm:$0xff] }
 0x20a   : > { %v2112_v28 = vpop.f32.mrf.mxu0 }
 0x20b   : > { %v2185_v4 = vadd.f32 %v2109_v6, %v1951_v2  ;;  %1448 = vmatmul.bf16.gmra.mxu1 %v3603_v8  ;;  %1683 = vmatmul.bf16.gmra.mxu2 %v3605_v22  ;;  %v1555_v6 = vpack.c.bf16 %v2768_v31, %v2767_v38  ;;  %v3989_v31 = vld [vmem:[#allocation13_spill] sm:$0xff] }
 0x20c   : > { %1917 = vmatmul.bf16.gmra.mxu3 %v3983_v13 }
 0x20d   : > { %2151 = vmatmul.bf16.gmra.mxu0 %v3625_v27  ;;  %v2221_v53 = vadd.f32 %v3811_v12, %v2185_v4 }
 0x20e   : > { %v1644_v11 = vpop.f32.mrf.mxu2 }
 0x20f   : > { %v2253_v24 = vmax.f32 %v2221_v53, 0.0  ;;  %v1718_v55 = vadd.f32 %v1644_v11, %v1483_v35  ;;  %v1878_v52 = vpop.f32.mrf.mxu3  ;;  %v3987_v11 = vld [vmem:[#allocation12_spill] sm:$0xff] }
 0x210   : > { %v1411_v62 = vpop.f32.mrf.mxu1 }
 0x211   : > { %2285 = vst [vmem:[%s3821_s22 + $0x18] sm:$0xff] %v2253_v24  ;;  %v1952_v8 = vadd.f32 %v1878_v52, %v1718_v55  ;;  %v1484_v63 = vadd.f32 %v1411_v62, %v3985_v19 }
 0x212   : > { %v2114_v56 = vpop.f32.mrf.mxu0 }
 0x213   : > { %v2186_v22 = vadd.f32 %v2112_v28, %v1952_v8 }
 0x215   : > { %v2222_v27 = vadd.f32 %v3811_v12, %v2186_v22 }
 0x216   : > { %v1646_v34 = vpop.f32.mrf.mxu2 }
 0x217   : > { %v2254_v42 = vmax.f32 %v2222_v27, 0.0  ;;  %v1719_v33 = vadd.f32 %v1646_v34, %v1484_v63  ;;  %v1880_v41 = vpop.f32.mrf.mxu3 }
 0x218   : > { %v1414_v15 = vpop.f32.mrf.mxu1 }
 0x219   : > { %2286 = vst [vmem:[%s3821_s22 + $0x20] sm:$0xff] %v2254_v42  ;;  %v1953_v21 = vadd.f32 %v1880_v41, %v1719_v33  ;;  %v1485_v5 = vadd.f32 %v1414_v15, %v3986_v10  ;;  %v2771_v15 = vld [vmem:[%s3157_s4 + $0x168] sm:$0xff]  ;;  %v2852_v10 = vld [vmem:[%s3157_s4 + $0x171] sm:$0xff] }
 0x21a   : > { %v2117_v18 = vpop.f32.mrf.mxu0 }
 0x21b   : > { %v2187_v14 = vadd.f32 %v2114_v56, %v1953_v21  ;;  %1453 = vmatmul.bf16.gmra.mxu1 %v1320_v51  ;;  %1688 = vmatmul.bf16.gmra.mxu2 %v1555_v6  ;;  %v2691_v51 = vld [vmem:[%s3157_s4 + $0x152] sm:$0xff]  ;;  %v2692_v6 = vld [vmem:[%s3157_s4 + $0x15a] sm:$0xff] }
 0x21c   : > { %1922 = vmatmul.bf16.gmra.mxu3 %v3627_v40 }
 0x21d   : > { %2156 = vmatmul.bf16.gmra.mxu0 %v3656_v59  ;;  %v2223_v3 = vadd.f32 %v3811_v12, %v2187_v14 }
 0x21e   : > { %v1649_v37 = vpop.f32.mrf.mxu2 }
 0x21f   : > { %v2255_v58 = vmax.f32 %v2223_v3, 0.0  ;;  %v1720_v2 = vadd.f32 %v1649_v37, %v1485_v5  ;;  %v1883_v28 = vpop.f32.mrf.mxu3  ;;  %v2851_v3 = vld [vmem:[%s3157_s4 + $0x169] sm:$0xff] }
 0x220   : > { %v1416_v4 = vpop.f32.mrf.mxu1 }
 0x221   : > { %2287 = vst [vmem:[%s3821_s22 + $0x28] sm:$0xff] %v2255_v58  ;;  %v1954_v13 = vadd.f32 %v1883_v28, %v1720_v2  ;;  %v1486_v40 = vadd.f32 %v1416_v4, %v3987_v11  ;;  %v1322_v28 = vpack.c.bf16 %v2692_v6, %v2691_v51 }
 0x222   : > { %v2119_v53 = vpop.f32.mrf.mxu0 }
 0x223   : > { %v2188_v0 = vadd.f32 %v2117_v18, %v1954_v13  ;;  %v3990_v18 = vld [vmem:[#allocation15_spill] sm:$0xff] }
 0x225   : > { %v2224_v35 = vadd.f32 %v3811_v12, %v2188_v0 }
 0x226   : > { %v1651_v24 = vpop.f32.mrf.mxu2 }
 0x227   : > { %v2256_v55 = vmax.f32 %v2224_v35, 0.0  ;;  %v1721_v52 = vadd.f32 %v1651_v24, %v1486_v40  ;;  %v1885_v62 = vpop.f32.mrf.mxu3  ;;  %v3991_v24 = vld [vmem:[#allocation16_spill] sm:$0xff] }
 0x228   : > { %v1419_v8 = vpop.f32.mrf.mxu1 }
 0x229   : > { %2288 = vst [vmem:[%s3821_s22 + $0x30] sm:$0xff] %v2256_v55  ;;  %v1955_v56 = vadd.f32 %v1885_v62, %v1721_v52  ;;  %v1487_v27 = vadd.f32 %v1419_v8, %v3989_v31 }
 0x22a   : > { %v2122_v22 = vpop.f32.mrf.mxu0 }
 0x22b   : > { %v2189_v9 = vadd.f32 %v2119_v53, %v1955_v56  ;;  %1458 = vmatmul.bf16.gmra.mxu1 %v3656_v59  ;;  %1693 = vmatmul.bf16.gmra.mxu2 %v3658_v60  ;;  %v1791_v53 = vpack.c.bf16 %v2852_v10, %v2851_v3 }
 0x22c   : > { %1927 = vmatmul.bf16.gmra.mxu3 %v3988_v49 }
 0x22d   : > { %2161 = vmatmul.bf16.gmra.mxu0 %v3677_v30  ;;  %v2225_v38 = vadd.f32 %v3811_v12, %v2189_v9  ;;  %v2772_v30 = vld [vmem:[%s3157_s4 + $0x170] sm:$0xff] }
 0x22e   : > { %v1654_v19 = vpop.f32.mrf.mxu2  ;;  %v1557_v4 = vpack.c.bf16 %v2772_v30, %v2771_v15 }
 0x22f   : > { %v2257_v63 = vmax.f32 %v2225_v38, 0.0  ;;  %v1722_v34 = vadd.f32 %v1654_v19, %v1487_v27  ;;  %v1888_v42 = vpop.f32.mrf.mxu3  ;;  %v3992_v27 = vld [vmem:[#allocation17_spill] sm:$0xff] }
 0x230   : > { %v1421_v59 = vpop.f32.mrf.mxu1 }
 0x231   : > { %2289 = vst [vmem:[%s3821_s22 + $0x38] sm:$0xff] %v2257_v63  ;;  %v1956_v33 = vadd.f32 %v1888_v42, %v1722_v34  ;;  %v1488_v14 = vadd.f32 %v1421_v59, %v3990_v18  ;;  %v2933_v63 = vld [vmem:[%s3157_s4 + $0x182] sm:$0xff]  ;;  %v2934_v34 = vld [vmem:[%s3157_s4 + $0x18a] sm:$0xff] }
 0x232   : > { %v2124_v60 = vpop.f32.mrf.mxu0  ;;  %v2026_v51 = vpack.c.bf16 %v2934_v34, %v2933_v63 }
 0x233   : > { %v2190_v41 = vadd.f32 %v2122_v22, %v1956_v33 }
 0x235   : > { %v2226_v21 = vadd.f32 %v3811_v12, %v2190_v41 }
 0x236   : > { %v1656_v5 = vpop.f32.mrf.mxu2 }
 0x237   : > { %v2258_v37 = vmax.f32 %v2226_v21, 0.0  ;;  %v1723_v58 = vadd.f32 %v1656_v5, %v1488_v14  ;;  %v1890_v2 = vpop.f32.mrf.mxu3 }
 0x238   : > { %v1424_v13 = vpop.f32.mrf.mxu1 }
 0x239   : > { %2290 = vst [vmem:[%s3821_s22 + $0x40] sm:$0xff] %v2258_v37  ;;  %v1957_v0 = vadd.f32 %v1890_v2, %v1723_v58  ;;  %v1489_v55 = vadd.f32 %v1424_v13, %v3991_v24  ;;  %v2775_v2 = vld [vmem:[%s3157_s4 + $0x198] sm:$0xff]  ;;  %v3993_v13 = vld [vmem:[#allocation18_spill] sm:$0xff] }
 0x23a   : > { %v2127_v35 = vpop.f32.mrf.mxu0 }
 0x23b   : > { %v2191_v11 = vadd.f32 %v2124_v60, %v1957_v0  ;;  %1463 = vmatmul.bf16.gmra.mxu1 %v1322_v28  ;;  %1698 = vmatmul.bf16.gmra.mxu2 %v1557_v4  ;;  %v2855_v28 = vld [vmem:[%s3157_s4 + $0x199] sm:$0xff] }
 0x23c   : > { %1932 = vmatmul.bf16.gmra.mxu3 %v1791_v53  ;;  %v2935_v0 = vld [vmem:[%s3157_s4 + $0x19a] sm:$0xff] }
 0x23d   : > { %2166 = vmatmul.bf16.gmra.mxu0 %v3693_v44  ;;  %v2227_v40 = vadd.f32 %v3811_v12, %v2191_v11 }
 0x23e   : > { %v1659_v52 = vpop.f32.mrf.mxu2 }
 0x23f   : > { %v2259_v62 = vmax.f32 %v2227_v40, 0.0  ;;  %v1724_v8 = vadd.f32 %v1659_v52, %v1489_v55  ;;  %v1893_v56 = vpop.f32.mrf.mxu3 }
 0x240   : > { %v1426_v22 = vpop.f32.mrf.mxu1 }
 0x241   : > { %2291 = vst [vmem:[%s3821_s22 + $0x48] sm:$0xff] %v2259_v62  ;;  %v1958_v9 = vadd.f32 %v1893_v56, %v1724_v8  ;;  %v1490_v19 = vadd.f32 %v1426_v22, %v3992_v27 }
 0x242   : > { %v2129_v49 = vpop.f32.mrf.mxu0 }
 0x243   : > { %v2192_v38 = vadd.f32 %v2127_v35, %v1958_v9  ;;  %v2936_v35 = vld [vmem:[%s3157_s4 + $0x1a2] sm:$0xff] }
 0x244   : > { %v2027_v56 = vpack.c.bf16 %v2936_v35, %v2935_v0 }
 0x245   : > { %v2228_v31 = vadd.f32 %v3811_v12, %v2192_v38 }
 0x246   : > { %v1661_v42 = vpop.f32.mrf.mxu2 }
 0x247   : > { %v2260_v59 = vmax.f32 %v2228_v31, 0.0  ;;  %v1725_v33 = vadd.f32 %v1661_v42, %v1490_v19  ;;  %v1895_v60 = vpop.f32.mrf.mxu3 }
 0x248   : > { %v1429_v41 = vpop.f32.mrf.mxu1 }
 0x249   : > { %2292 = vst [vmem:[%s3821_s22 + $0x50] sm:$0xff] %v2260_v59  ;;  %v1959_v6 = vadd.f32 %v1895_v60, %v1725_v33  ;;  %v1491_v18 = vadd.f32 %v1429_v41, %v3684_v61  ;;  %v2856_v61 = vld [vmem:[%s3157_s4 + $0x1a1] sm:$0xff] }
 0x24a   : > { %v2132_v15 = vpop.f32.mrf.mxu0  ;;  %v1793_v8 = vpack.c.bf16 %v2856_v61, %v2855_v28 }
 0x24b   : > { %v2193_v30 = vadd.f32 %v2129_v49, %v1959_v6  ;;  %1468 = vmatmul.bf16.gmra.mxu1 %v3693_v44  ;;  %1703 = vmatmul.bf16.gmra.mxu2 %v3695_v46 }
 0x24c   : > { %1937 = vmatmul.bf16.gmra.mxu3 %v3697_v20  ;;  %v2776_v20 = vld [vmem:[%s3157_s4 + $0x1a0] sm:$0xff] }
 0x24d   : > { %2171 = vmatmul.bf16.gmra.mxu0 %v2026_v51  ;;  %v2229_v21 = vadd.f32 %v3811_v12, %v2193_v30  ;;  %v1559_v52 = vpack.c.bf16 %v2776_v20, %v2775_v2 }
 0x24e   : > { %v1664_v14 = vpop.f32.mrf.mxu2 }
 0x24f   : > { %v2261_v3 = vmax.f32 %v2229_v21, 0.0  ;;  %v1726_v10 = vadd.f32 %v1664_v14, %v1491_v18  ;;  %v1898_v5 = vpop.f32.mrf.mxu3 }
 0x250   : > { %v1431_v37 = vpop.f32.mrf.mxu1 }
 0x251   : > { %2293 = vst [vmem:[%s3821_s22 + $0x58] sm:$0xff] %v2261_v3  ;;  %v1960_v44 = vadd.f32 %v1898_v5, %v1726_v10  ;;  %v1492_v53 = vadd.f32 %v1431_v37, %v3993_v13 }
 0x252   : > { %v2134_v58 = vpop.f32.mrf.mxu0 }
 0x253   : > { %v2194_v46 = vadd.f32 %v2132_v15, %v1960_v44 }
 0x255   : > { %v2230_v4 = vadd.f32 %v3811_v12, %v2194_v46 }
 0x256   : > { %v1666_v11 = vpop.f32.mrf.mxu2 }
 0x257   : > { %v2262_v40 = vmax.f32 %v2230_v4, 0.0  ;;  %v1727_v24 = vadd.f32 %v1666_v11, %v1492_v53  ;;  %v1900_v55 = vpop.f32.mrf.mxu3 }
 0x258   : > { %v1434_v62 = vpop.f32.mrf.mxu1 }
 0x259   : > { %2294 = vst [vmem:[%s3821_s22 + $0x60] sm:$0xff] %v2262_v40  ;;  %v1961_v22 = vadd.f32 %v1900_v55, %v1727_v24  ;;  %v1493_v31 = vadd.f32 %v1434_v62, %v3705_v17 }
 0x25a   : > { %v2137_v9 = vpop.f32.mrf.mxu0 }
 0x25b   : > { %v2195_v49 = vadd.f32 %v2134_v58, %v1961_v22  ;;  %1473 = vmatmul.bf16.gmra.mxu1 %v2026_v51  ;;  %1708 = vmatmul.bf16.gmra.mxu2 %v1559_v52 }
 0x25c   : > { %1942 = vmatmul.bf16.gmra.mxu3 %v1793_v8 }
 0x25d   : > { %2176 = vmatmul.bf16.gmra.mxu0 %v2027_v56  ;;  %v2231_v38 = vadd.f32 %v3811_v12, %v2195_v49 }
 0x25e   : > { %v1669_v27 = vpop.f32.mrf.mxu2 }
 0x25f   : > { %v2263_v19 = vmax.f32 %v2231_v38, 0.0  ;;  %v1728_v63 = vadd.f32 %v1669_v27, %v1493_v31  ;;  %v1903_v34 = vpop.f32.mrf.mxu3 }
 0x260   : > { %v1436_v42 = vpop.f32.mrf.mxu1 }
 0x261   : > { %2295 = vst [vmem:[%s3821_s22 + $0x68] sm:$0xff] %v2263_v19  ;;  %v1962_v59 = vadd.f32 %v1903_v34, %v1728_v63  ;;  %v1494_v51 = vadd.f32 %v1436_v42, %v3712_v23 }
 0x262   : > { %v2139_v33 = vpop.f32.mrf.mxu0 }
 0x263   : > { %v2196_v60 = vadd.f32 %v2137_v9, %v1962_v59 }
 0x265   : > { %v2232_v41 = vadd.f32 %v3811_v12, %v2196_v60 }
 0x266   : > { %v1671_v6 = vpop.f32.mrf.mxu2 }
 0x267   : > { %v2264_v15 = vmax.f32 %v2232_v41, 0.0  ;;  %v1729_v30 = vadd.f32 %v1671_v6, %v1494_v51  ;;  %v1905_v21 = vpop.f32.mrf.mxu3 }
 0x268   : > { %v1439_v17 = vpop.f32.mrf.mxu1 }
 0x269   : > { %2296 = vst [vmem:[%s3821_s22 + $0x70] sm:$0xff] %v2264_v15  ;;  %v1963_v18 = vadd.f32 %v1905_v21, %v1729_v30  ;;  %v1495_v5 = vadd.f32 %v1439_v17, %v3716_v36 }
 0x26a   : > { %v2142_v14 = vpop.f32.mrf.mxu0 }
 0x26b   : > { %v2197_v3 = vadd.f32 %v2139_v33, %v1963_v18 }
 0x26d   : > { %v2233_v10 = vadd.f32 %v3811_v12, %v2197_v3 }
 0x26e   : > { %v1674_v37 = vpop.f32.mrf.mxu2 }
 0x26f   : > { %v2265_v44 = vmax.f32 %v2233_v10, 0.0  ;;  %v1730_v58 = vadd.f32 %v1674_v37, %v1495_v5  ;;  %v1908_v46 = vpop.f32.mrf.mxu3 }
 0x270   : > { %v1441_v23 = vpop.f32.mrf.mxu1 }
 0x271   : > { %2297 = vst [vmem:[%s3821_s22 + $0x78] sm:$0xff] %v2265_v44  ;;  %v1964_v2 = vadd.f32 %v1908_v46, %v1730_v58  ;;  %v1496_v13 = vadd.f32 %v1441_v23, %v3723_v39 }
 0x272   : > { %v2144_v20 = vpop.f32.mrf.mxu0 }
 0x273   : > { %v2198_v28 = vadd.f32 %v2142_v14, %v1964_v2 }
 0x275   : > { %v2234_v4 = vadd.f32 %v3811_v12, %v2198_v28 }
 0x276   : > { %v1676_v53 = vpop.f32.mrf.mxu2 }
 0x277   : > { %v2266_v61 = vmax.f32 %v2234_v4, 0.0  ;;  %v1731_v0 = vadd.f32 %v1676_v53, %v1496_v13  ;;  %v1910_v35 = vpop.f32.mrf.mxu3 }
 0x278   : > { %v1444_v36 = vpop.f32.mrf.mxu1 }
 0x279   : > { %2298 = vst [vmem:[%s3821_s22 + $0x80] sm:$0xff] %v2266_v61  ;;  %v1965_v11 = vadd.f32 %v1910_v35, %v1731_v0  ;;  %v1497_v52 = vadd.f32 %v1444_v36, %v3727_v47 }
 0x27a   : > { %v2147_v40 = vpop.f32.mrf.mxu0 }
 0x27b   : > { %v2199_v24 = vadd.f32 %v2144_v20, %v1965_v11 }
 0x27d   : > { %v2235_v55 = vadd.f32 %v3811_v12, %v2199_v24 }
 0x27e   : > { %v1679_v62 = vpop.f32.mrf.mxu2 }
 0x27f   : > { %v2267_v8 = vmax.f32 %v2235_v55, 0.0  ;;  %v1732_v56 = vadd.f32 %v1679_v62, %v1497_v52  ;;  %v1913_v22 = vpop.f32.mrf.mxu3 }
 0x280   : > { %v1446_v39 = vpop.f32.mrf.mxu1 }
 0x281   : > { %2299 = vst [vmem:[%s3821_s22 + $0x88] sm:$0xff] %v2267_v8  ;;  %v1966_v9 = vadd.f32 %v1913_v22, %v1732_v56  ;;  %v1498_v27 = vadd.f32 %v1446_v39, %v3734_v54 }
 0x282   : > { %v2149_v49 = vpop.f32.mrf.mxu0 }
 0x283   : > { %v2200_v38 = vadd.f32 %v2147_v40, %v1966_v9 }
 0x285   : > { %v2236_v31 = vadd.f32 %v3811_v12, %v2200_v38 }
 0x286   : > { %v1681_v19 = vpop.f32.mrf.mxu2 }
 0x287   : > { %v2268_v63 = vmax.f32 %v2236_v31, 0.0  ;;  %v1733_v34 = vadd.f32 %v1681_v19, %v1498_v27  ;;  %v1915_v42 = vpop.f32.mrf.mxu3 }
 0x288   : > { %v1449_v47 = vpop.f32.mrf.mxu1 }
 0x289   : > { %2300 = vst [vmem:[%s3821_s22 + $0x90] sm:$0xff] %v2268_v63  ;;  %v1967_v59 = vadd.f32 %v1915_v42, %v1733_v34  ;;  %v1499_v51 = vadd.f32 %v1449_v47, %v3739_v1 }
 0x28a   : > { %v2152_v33 = vpop.f32.mrf.mxu0 }
 0x28b   : > { %v2201_v60 = vadd.f32 %v2149_v49, %v1967_v59 }
 0x28d   : > { %v2237_v41 = vadd.f32 %v3811_v12, %v2201_v60 }
 0x28e   : > { %v1684_v6 = vpop.f32.mrf.mxu2 }
 0x28f   : > { %v2269_v15 = vmax.f32 %v2237_v41, 0.0  ;;  %v1734_v30 = vadd.f32 %v1684_v6, %v1499_v51  ;;  %v1918_v21 = vpop.f32.mrf.mxu3 }
 0x290   : > { %v1451_v54 = vpop.f32.mrf.mxu1 }
 0x291   : > { %2301 = vst [vmem:[%s3821_s22 + $0x98] sm:$0xff] %v2269_v15  ;;  %v1968_v17 = vadd.f32 %v1918_v21, %v1734_v30  ;;  %v1500_v10 = vadd.f32 %v1451_v54, %v3747_v26 }
 0x292   : > { %v2154_v18 = vpop.f32.mrf.mxu0 }
 0x293   : > { %v2202_v14 = vadd.f32 %v2152_v33, %v1968_v17 }
 0x295   : > { %v2238_v3 = vadd.f32 %v3811_v12, %v2202_v14 }
 0x296   : > { %v1686_v5 = vpop.f32.mrf.mxu2 }
 0x297   : > { %v2270_v37 = vmax.f32 %v2238_v3, 0.0  ;;  %v1735_v44 = vadd.f32 %v1686_v5, %v1500_v10  ;;  %v1920_v58 = vpop.f32.mrf.mxu3 }
 0x298   : > { %v1454_v1 = vpop.f32.mrf.mxu1 }
 0x299   : > { %2302 = vst [vmem:[%s3821_s22 + $0xa0] sm:$0xff] %v2270_v37  ;;  %v1969_v46 = vadd.f32 %v1920_v58, %v1735_v44  ;;  %v1501_v28 = vadd.f32 %v1454_v1, %v3751_v16 }
 0x29a   : > { %v2157_v23 = vpop.f32.mrf.mxu0 }
 0x29b   : > { %v2203_v2 = vadd.f32 %v2154_v18, %v1969_v46 }
 0x29d   : > { %v2239_v20 = vadd.f32 %v3811_v12, %v2203_v2 }
 0x29e   : > { %v1689_v4 = vpop.f32.mrf.mxu2 }
 0x29f   : > { %v2271_v13 = vmax.f32 %v2239_v20, 0.0  ;;  %v1736_v53 = vadd.f32 %v1689_v4, %v1501_v28  ;;  %v1923_v61 = vpop.f32.mrf.mxu3 }
 0x2a0   : > { %v1456_v26 = vpop.f32.mrf.mxu1 }
 0x2a1   : > { %2303 = vst [vmem:[%s3821_s22 + $0xa8] sm:$0xff] %v2271_v13  ;;  %v1970_v0 = vadd.f32 %v1923_v61, %v1736_v53  ;;  %v1502_v40 = vadd.f32 %v1456_v26, %v3758_v45 }
 0x2a2   : > { %v2159_v35 = vpop.f32.mrf.mxu0 }
 0x2a3   : > { %v2204_v36 = vadd.f32 %v2157_v23, %v1970_v0 }
 0x2a5   : > { %v2240_v11 = vadd.f32 %v3811_v12, %v2204_v36 }
 0x2a6   : > { %v1691_v24 = vpop.f32.mrf.mxu2 }
 0x2a7   : > { %v2272_v55 = vmax.f32 %v2240_v11, 0.0  ;;  %v1737_v52 = vadd.f32 %v1691_v24, %v1502_v40  ;;  %v1925_v62 = vpop.f32.mrf.mxu3 }
 0x2a8   : > { %v1459_v16 = vpop.f32.mrf.mxu1 }
 0x2a9   : > { %2304 = vst [vmem:[%s3821_s22 + $0xb0] sm:$0xff] %v2272_v55  ;;  %v1971_v8 = vadd.f32 %v1925_v62, %v1737_v52  ;;  %v1503_v9 = vadd.f32 %v1459_v16, %v3763_v29 }
 0x2aa   : > { %v2162_v56 = vpop.f32.mrf.mxu0 }
 0x2ab   : > { %v2205_v22 = vadd.f32 %v2159_v35, %v1971_v8 }
 0x2ad   : > { %v2241_v39 = vadd.f32 %v3811_v12, %v2205_v22 }
 0x2ae   : > { %v1694_v49 = vpop.f32.mrf.mxu2 }
 0x2af   : > { %v2273_v38 = vmax.f32 %v2241_v39, 0.0  ;;  %v1738_v31 = vadd.f32 %v1694_v49, %v1503_v9  ;;  %v1928_v27 = vpop.f32.mrf.mxu3 }
 0x2b0   : > { %v1461_v45 = vpop.f32.mrf.mxu1 }
 0x2b1   : > { %2305 = vst [vmem:[%s3821_s22 + $0xb8] sm:$0xff] %v2273_v38  ;;  %v1972_v19 = vadd.f32 %v1928_v27, %v1738_v31  ;;  %v1504_v47 = vadd.f32 %v1461_v45, %v3771_v25 }
 0x2b2   : > { %v2164_v63 = vpop.f32.mrf.mxu0 }
 0x2b3   : > { %v2206_v34 = vadd.f32 %v2162_v56, %v1972_v19 }
 0x2b5   : > { %v2242_v42 = vadd.f32 %v3811_v12, %v2206_v34 }
 0x2b6   : > { %v1696_v59 = vpop.f32.mrf.mxu2 }
 0x2b7   : > { %v2274_v33 = vmax.f32 %v2242_v42, 0.0  ;;  %v1739_v60 = vadd.f32 %v1696_v59, %v1504_v47  ;;  %v1930_v41 = vpop.f32.mrf.mxu3 }
 0x2b8   : > { %v1464_v29 = vpop.f32.mrf.mxu1 }
 0x2b9   : > { %2306 = vst [vmem:[%s3821_s22 + $0xc0] sm:$0xff] %v2274_v33  ;;  %v1973_v51 = vadd.f32 %v1930_v41, %v1739_v60  ;;  %v1505_v21 = vadd.f32 %v1464_v29, %v3775_v7 }
 0x2ba   : > { %v2167_v6 = vpop.f32.mrf.mxu0 }
 0x2bb   : > { %v2207_v15 = vadd.f32 %v2164_v63, %v1973_v51 }
 0x2bd   : > { %v2243_v30 = vadd.f32 %v3811_v12, %v2207_v15 }
 0x2be   : > { %v1699_v54 = vpop.f32.mrf.mxu2 }
 0x2bf   : > { %v2275_v17 = vmax.f32 %v2243_v30, 0.0  ;;  %v1740_v18 = vadd.f32 %v1699_v54, %v1505_v21  ;;  %v1933_v14 = vpop.f32.mrf.mxu3 }
 0x2c0   : > { %v1466_v25 = vpop.f32.mrf.mxu1 }
 0x2c1   : > { %2307 = vst [vmem:[%s3821_s22 + $0xc8] sm:$0xff] %v2275_v17  ;;  %v1974_v3 = vadd.f32 %v1933_v14, %v1740_v18  ;;  %v1506_v44 = vadd.f32 %v1466_v25, %v3782_v50 }
 0x2c2   : > { %v2169_v10 = vpop.f32.mrf.mxu0 }
 0x2c3   : > { %v2208_v5 = vadd.f32 %v2167_v6, %v1974_v3 }
 0x2c5   : > { %v2244_v37 = vadd.f32 %v3811_v12, %v2208_v5 }
 0x2c6   : > { %v1701_v58 = vpop.f32.mrf.mxu2 }
 0x2c7   : > { %v2276_v1 = vmax.f32 %v2244_v37, 0.0  ;;  %v1741_v46 = vadd.f32 %v1701_v58, %v1506_v44  ;;  %v1935_v23 = vpop.f32.mrf.mxu3 }
 0x2c8   : > { %v1469_v7 = vpop.f32.mrf.mxu1 }
 0x2c9   : > { %2308 = vst [vmem:[%s3821_s22 + $0xd0] sm:$0xff] %v2276_v1  ;;  %v1975_v2 = vadd.f32 %v1935_v23, %v1741_v46  ;;  %v1507_v13 = vadd.f32 %v1469_v7, %v3786_v32 }
 0x2ca   : > { %v2172_v28 = vpop.f32.mrf.mxu0 }
 0x2cb   : > { %v2209_v20 = vadd.f32 %v2169_v10, %v1975_v2 }
 0x2cd   : > { %v2245_v4 = vadd.f32 %v3811_v12, %v2209_v20 }
 0x2ce   : > { %v1704_v53 = vpop.f32.mrf.mxu2 }
 0x2cf   : > { %v2277_v61 = vmax.f32 %v2245_v4, 0.0  ;;  %v1742_v26 = vadd.f32 %v1704_v53, %v1507_v13  ;;  %v1938_v0 = vpop.f32.mrf.mxu3 }
 0x2d0   : > { %v1471_v50 = vpop.f32.mrf.mxu1 }
 0x2d1   : > { %2309 = vst [vmem:[%s3821_s22 + $0xd8] sm:$0xff] %v2277_v61  ;;  %v1976_v35 = vadd.f32 %v1938_v0, %v1742_v26  ;;  %v1508_v40 = vadd.f32 %v1471_v50, %v3793_v48 }
 0x2d2   : > { %v2174_v24 = vpop.f32.mrf.mxu0 }
 0x2d3   : > { %v2210_v36 = vadd.f32 %v2172_v28, %v1976_v35 }
 0x2d5   : > { %v2246_v11 = vadd.f32 %v3811_v12, %v2210_v36 }
 0x2d6   : > { %v1706_v55 = vpop.f32.mrf.mxu2 }
 0x2d7   : > { %v2278_v52 = vmax.f32 %v2246_v11, 0.0  ;;  %v1743_v62 = vadd.f32 %v1706_v55, %v1508_v40  ;;  %v1940_v16 = vpop.f32.mrf.mxu3 }
 0x2d8   : > { %v1474_v32 = vpop.f32.mrf.mxu1 }
 0x2d9   : > { %2310 = vst [vmem:[%s3821_s22 + $0xe0] sm:$0xff] %v2278_v52  ;;  %v1977_v8 = vadd.f32 %v1940_v16, %v1743_v62  ;;  %v1509_v39 = vadd.f32 %v1474_v32, %v3797_v57 }
 0x2da   : > { %v2177_v48 = vpop.f32.mrf.mxu0 }
 0x2db   : > { %v2211_v56 = vadd.f32 %v2174_v24, %v1977_v8 }
 0x2dd   : > { %v2247_v22 = vadd.f32 %v3811_v12, %v2211_v56 }
 0x2de   : > { %v1709_v9 = vpop.f32.mrf.mxu2 }
 0x2df   : > { %v2279_v49 = vmax.f32 %v2247_v22, 0.0  ;;  %v1744_v38 = vadd.f32 %v1709_v9, %v1509_v39  ;;  %v1943_v31 = vpop.f32.mrf.mxu3 }
 0x2e0   : > { %v1476_v45 = vpop.f32.mrf.mxu1 }
 0x2e1   : > { %2311 = vst [vmem:[%s3821_s22 + $0xe8] sm:$0xff] %v2279_v49  ;;  %v1978_v27 = vadd.f32 %v1943_v31, %v1744_v38  ;;  %v1510_v34 = vadd.f32 %v1476_v45, %v3804_v43 }
 0x2e2   : > { %v2179_v60 = vpop.f32.mrf.mxu0 }
 0x2e3   : > { %v2212_v19 = vadd.f32 %v2177_v48, %v1978_v27 }
 0x2e5   : > { %v2248_v63 = vadd.f32 %v3811_v12, %v2212_v19 }
 0x2e6   : > { %v1711_v42 = vpop.f32.mrf.mxu2 }
 0x2e7   : > { %v2280_v47 = vmax.f32 %v2248_v63, 0.0  ;;  %v1745_v59 = vadd.f32 %v1711_v42, %v1510_v34  ;;  %v1945_v33 = vpop.f32.mrf.mxu3 }
 0x2e9   : > { %2312 = vst [vmem:[%s3821_s22 + $0xf0] sm:$0xff] %v2280_v47  ;;  %v1979_v57 = vadd.f32 %v1945_v33, %v1745_v59 }
 0x2eb   : > { %v2213_v41 = vadd.f32 %v2179_v60, %v1979_v57 }
 0x2ed   : > { %v2249_v29 = vadd.f32 %v3811_v12, %v2213_v41 }
 0x2ef   : > { %v2281_v51 = vmax.f32 %v2249_v29, 0.0 }
 0x2f1   : > { %2313 = vst [vmem:[%s3821_s22 + $0xf8] sm:$0xff] %v2281_v51 }
 0x2f2 PF: > { %s13_s12 = sadd.s32 1, %s3100_s12  }
 0x2f3   : > { %p10_p4 = scmp.ge.s32.totalorder %s13_s12, 4  }
 0x2f5   :  { %12 = sbr.rel (!%p10_p4) target bundleno = 1 (0x1), region = 72 }

// kernel: residual_block_forward.3
= control target key start
LH: loop header
LB: loop body
LE: loop exit
PB: predicated region body
PF: predicated region fallthrough
CT: control target
= control target key end

     0   :  { %s3523_s21 = smov 0   ;;  %s4456_s0 = inlined_call_operand.vmem [shape: f32[2,18,18,128], index: 0, kind: input, shape index: {}]   ;;  %s4457_s1 = inlined_call_operand.vmem [shape: bf16[9,128,128], index: 1, kind: input, shape index: {}]   ;;  %s4458_s2 = inlined_call_operand.vmem [shape: f32[1,128], index: 2, kind: input, shape index: {}]   ;;  %s4459_s3 = inlined_call_operand.vmem [shape: f32[2,16,16,128], index: 3, kind: input, shape index: {}]   ;;  %s4460_s4 = inlined_call_operand.vmem [shape: bf16[128,128], index: 4, kind: input, shape index: {}]   ;;  %s4461_s5 = inlined_call_operand.vmem [shape: f32[1,128], index: 5, kind: input, shape index: {}]   ;;  %s4462_s6 = inlined_call_operand.vmem [shape: f32[2,16,16,128], index: 6, kind: output, shape index: {}]  }
   0x1 LB: > { %s2719_s22 = sadd.s32 4294967295, %s3486_s21   ;;  %p2723_p0 = scmp.ge.s32.totalorder %s3486_s21, 1  ;;  %s3486_s21 = sphi %s3523_s21, %s16_s21  }
   0x2   : > { %p222_p1 = scmp.lt.s32.totalorder %s3486_s21, 3 }
   0x4   : > { %p223_p2 = pnand %p2723_p0, %p222_p1 }
   0x6   : > { %226 = sbr.rel (%p223_p2) target bundleno = 820 (0x334), region = 44 }
   0xb   : > { %v3388_v0 = vld [vmem:[%s4457_s1 + $0x78] sm:$0xff]  ;;  %v3387_v2 = vld [vmem:[%s4457_s1 + $0x70] sm:$0xff]  ;;  %v3386_v4 = vld [vmem:[%s4457_s1 + $0x68] sm:$0xff]  ;;  %p257_p3 = scmp.lt.s32.totalorder %s2719_s22, 1 }
   0xc   : > { %v3380_v1 = vld [vmem:[%s4457_s1 + $0x38] sm:$0xff]  ;;  %3453 = vmatpush.bf16.msra.mxu2 %v3388_v0  ;;  %v3379_v3 = vld [vmem:[%s4457_s1 + $0x30] sm:$0xff]  ;;  %449 = vmatpush.bf16.msra.mxu0 %v3388_v0  ;;  %v3378_v5 = vld [vmem:[%s4457_s1 + $0x28] sm:$0xff] }
   0xd   : > { %3461 = vmatpush.bf16.msra.mxu3 %v3380_v1  ;;  %586 = vmatpush.bf16.msra.mxu1 %v3380_v1  ;;  %v3385_v6 = vld [vmem:[%s4457_s1 + $0x60] sm:$0xff]  ;;  %v3384_v8 = vld [vmem:[%s4457_s1 + $0x58] sm:$0xff]  ;;  %s4480_s22 = smov (!%p257_p3, %s2719_s22), 1  ;;  %v3383_v10 = vld [vmem:[%s4457_s1 + $0x50] sm:$0xff] }
   0xe   : > { %v3377_v7 = vld [vmem:[%s4457_s1 + $0x20] sm:$0xff]  ;;  %v3376_v9 = vld [vmem:[%s4457_s1 + $0x18] sm:$0xff]  ;;  %v3375_v11 = vld [vmem:[%s4457_s1 + $0x10] sm:$0xff]  ;;  %s3469_s25 = smul.u32 432, %s4480_s22  ;;  %s3371_s15 = sshll.u32 %s4480_s22, 8 }
   0xf   : > { %v3382_v12 = vld [vmem:[%s4457_s1 + $0x48] sm:$0xff]  ;;  %v3381_v14 = vld [vmem:[%s4457_s1 + $0x40] sm:$0xff]  ;;  %v3396_v24 = vld [vmem:[%s4457_s1 + $0xb8] sm:$0xff]  ;;  %s4141_s18 = scalar_lea.vmem %s4459_s3, %s3371_s15  ;;  %s4281_s27 = scalar_lea.vmem %s4462_s6, %s3371_s15 }
  0x10   : > { %3454 = vmatpush.bf16.msra.mxu2 %v3387_v2  ;;  %450 = vmatpush.bf16.msra.mxu0 %v3387_v2  ;;  %v3374_v13 = vld [vmem:[%s4457_s1 + $0x8] sm:$0xff]  ;;  %s3583_s8 = scalar_lea.vmem %s4456_s0, %s3469_s25  ;;  %v3373_v15 = vld [vmem:[%s4457_s1] sm:$0xff]  ;;  %v3404_v25 = vld [vmem:[%s4457_s1 + $0xf8] sm:$0xff] }
  0x11   : > { %3462 = vmatpush.bf16.msra.mxu3 %v3379_v3  ;;  %587 = vmatpush.bf16.msra.mxu1 %v3379_v3  ;;  %v352_v16 = vld [vmem:[%s3583_s8 + $0xc1] sm:$0xff]  ;;  %v353_v17 = vld [vmem:[%s3583_s8 + $0xc9] sm:$0xff]  ;;  %v3412_v30 = vld [vmem:[%s4457_s1 + $0x138] sm:$0xff] }
  0x12   : > { %v288_v18 = vld [vmem:[%s3583_s8 + $0xc0] sm:$0xff]  ;;  %v289_v19 = vld [vmem:[%s3583_s8 + $0xc8] sm:$0xff]  ;;  %v376_v26 = vpack.c.bf16 %v353_v17, %v352_v16  ;;  %v3420_v31 = vld [vmem:[%s4457_s1 + $0x178] sm:$0xff] }
  0x13   : > { %v336_v20 = vld [vmem:[%s3583_s8 + $0x1] sm:$0xff]  ;;  %v337_v21 = vld [vmem:[%s3583_s8 + $0x9] sm:$0xff]  ;;  %v312_v27 = vpack.c.bf16 %v289_v19, %v288_v18  ;;  %v354_v40 = vld [vmem:[%s3583_s8 + $0xd9] sm:$0xff] }
  0x14   : > { %3455 = vmatpush.bf16.msra.mxu2 %v3386_v4  ;;  %451 = vmatpush.bf16.msra.mxu0 %v3386_v4  ;;  %v272_v22 = vld [vmem:[%s3583_s8] sm:$0xff]  ;;  %v273_v23 = vld [vmem:[%s3583_s8 + $0x8] sm:$0xff]  ;;  %v368_v28 = vpack.c.bf16 %v337_v21, %v336_v20  ;;  %v3395_v32 = vld [vmem:[%s4457_s1 + $0xb0] sm:$0xff] }
  0x15   : > { %3463 = vmatpush.bf16.msra.mxu3 %v3378_v5  ;;  %588 = vmatpush.bf16.msra.mxu1 %v3378_v5  ;;  %v304_v29 = vpack.c.bf16 %v273_v23, %v272_v22  ;;  %v3403_v33 = vld [vmem:[%s4457_s1 + $0xf0] sm:$0xff]  ;;  %v3394_v36 = vld [vmem:[%s4457_s1 + $0xa8] sm:$0xff]  ;;  %v290_v42 = vld [vmem:[%s3583_s8 + $0xd8] sm:$0xff] }
  0x16   : > { %v3411_v34 = vld [vmem:[%s4457_s1 + $0x130] sm:$0xff]  ;;  %v3402_v37 = vld [vmem:[%s4457_s1 + $0xe8] sm:$0xff]  ;;  %v291_v43 = vld [vmem:[%s3583_s8 + $0xe0] sm:$0xff] }
  0x17   : > { %v3419_v35 = vld [vmem:[%s4457_s1 + $0x170] sm:$0xff]  ;;  %v3410_v38 = vld [vmem:[%s4457_s1 + $0x128] sm:$0xff]  ;;  %v338_v44 = vld [vmem:[%s3583_s8 + $0x19] sm:$0xff]  ;;  %v313_v49 = vpack.c.bf16 %v291_v43, %v290_v42 }
  0x18   : > { %3456 = vmatpush.bf16.msra.mxu2 %v3385_v6  ;;  %452 = vmatpush.bf16.msra.mxu0 %v3385_v6  ;;  %v3418_v39 = vld [vmem:[%s4457_s1 + $0x168] sm:$0xff]  ;;  %v274_v46 = vld [vmem:[%s3583_s8 + $0x18] sm:$0xff]  ;;  %v275_v47 = vld [vmem:[%s3583_s8 + $0x20] sm:$0xff] }
  0x19   : > { %3464 = vmatpush.bf16.msra.mxu3 %v3377_v7  ;;  %589 = vmatpush.bf16.msra.mxu1 %v3377_v7  ;;  %v355_v41 = vld [vmem:[%s3583_s8 + $0xe1] sm:$0xff]  ;;  %v3645_v51 = vpack.c.bf16 %v275_v47, %v274_v46  ;;  %v356_v56 = vld [vmem:[%s3583_s8 + $0xf1] sm:$0xff]  ;;  %v357_v57 = vld [vmem:[%s3583_s8 + $0xf9] sm:$0xff] }
  0x1a   : > { %v339_v45 = vld [vmem:[%s3583_s8 + $0x21] sm:$0xff]  ;;  %v377_v48 = vpack.c.bf16 %v355_v41, %v354_v40  ;;  %v292_v58 = vld [vmem:[%s3583_s8 + $0xf0] sm:$0xff]  ;;  %v293_v59 = vld [vmem:[%s3583_s8 + $0xf8] sm:$0xff]  ;;  %v378_v0 = vpack.c.bf16 %v357_v57, %v356_v56 }
  0x1b   : > { %v3643_v50 = vpack.c.bf16 %v339_v45, %v338_v44  ;;  %v3393_v52 = vld [vmem:[%s4457_s1 + $0xa0] sm:$0xff]  ;;  %v340_v60 = vld [vmem:[%s3583_s8 + $0x31] sm:$0xff]  ;;  %v314_v1 = vpack.c.bf16 %v293_v59, %v292_v58 }
  0x1c   : > { %3457 = vmatpush.bf16.msra.mxu2 %v3384_v8  ;;  %453 = vmatpush.bf16.msra.mxu0 %v3384_v8  ;;  %v3401_v53 = vld [vmem:[%s4457_s1 + $0xe0] sm:$0xff]  ;;  %v276_v62 = vld [vmem:[%s3583_s8 + $0x30] sm:$0xff]  ;;  %v277_v63 = vld [vmem:[%s3583_s8 + $0x38] sm:$0xff] }
  0x1d   : > { %3465 = vmatpush.bf16.msra.mxu3 %v3376_v9  ;;  %590 = vmatpush.bf16.msra.mxu1 %v3376_v9  ;;  %v3409_v54 = vld [vmem:[%s4457_s1 + $0x120] sm:$0xff]  ;;  %v3671_v3 = vpack.c.bf16 %v277_v63, %v276_v62  ;;  %v3392_v4 = vld [vmem:[%s4457_s1 + $0x98] sm:$0xff]  ;;  %v358_v8 = vld [vmem:[%s3583_s8 + $0x109] sm:$0xff] }
  0x1e   : > { %v3417_v55 = vld [vmem:[%s4457_s1 + $0x160] sm:$0xff]  ;;  %v3400_v5 = vld [vmem:[%s4457_s1 + $0xd8] sm:$0xff]  ;;  %v3391_v20 = vld [vmem:[%s4457_s1 + $0x90] sm:$0xff] }
  0x1f   : > { %v341_v61 = vld [vmem:[%s3583_s8 + $0x39] sm:$0xff]  ;;  %v359_v9 = vld [vmem:[%s3583_s8 + $0x111] sm:$0xff]  ;;  %v363_v41 = vld [vmem:[%s3583_s8 + $0x141] sm:$0xff] }
  0x20   : > { %3458 = vmatpush.bf16.msra.mxu2 %v3383_v10  ;;  %454 = vmatpush.bf16.msra.mxu0 %v3383_v10  ;;  %v3669_v2 = vpack.c.bf16 %v341_v61, %v340_v60  ;;  %v3408_v6 = vld [vmem:[%s4457_s1 + $0x118] sm:$0xff]  ;;  %v294_v10 = vld [vmem:[%s3583_s8 + $0x108] sm:$0xff]  ;;  %v379_v16 = vpack.c.bf16 %v359_v9, %v358_v8  ;;  %v3399_v21 = vld [vmem:[%s4457_s1 + $0xd0] sm:$0xff] }
  0x21   : > { %3466 = vmatpush.bf16.msra.mxu3 %v3375_v11  ;;  %591 = vmatpush.bf16.msra.mxu1 %v3375_v11  ;;  %v3416_v7 = vld [vmem:[%s4457_s1 + $0x158] sm:$0xff]  ;;  %v295_v11 = vld [vmem:[%s3583_s8 + $0x110] sm:$0xff]  ;;  %v299_v43 = vld [vmem:[%s3583_s8 + $0x140] sm:$0xff] }
  0x22   : > { %v315_v17 = vpack.c.bf16 %v295_v11, %v294_v10  ;;  %v3407_v22 = vld [vmem:[%s4457_s1 + $0x110] sm:$0xff]  ;;  %v362_v40 = vld [vmem:[%s3583_s8 + $0x139] sm:$0xff]  ;;  %v347_v45 = vld [vmem:[%s3583_s8 + $0x81] sm:$0xff] }
  0x23   : > { %v3415_v23 = vld [vmem:[%s4457_s1 + $0x150] sm:$0xff]  ;;  %v298_v42 = vld [vmem:[%s3583_s8 + $0x138] sm:$0xff]  ;;  %v283_v47 = vld [vmem:[%s3583_s8 + $0x80] sm:$0xff] }
  0x24   : > { %3459 = vmatpush.bf16.msra.mxu2 %v3382_v12  ;;  %455 = vmatpush.bf16.msra.mxu0 %v3382_v12  ;;  %v342_v12 = vld [vmem:[%s3583_s8 + $0x49] sm:$0xff]  ;;  %v346_v44 = vld [vmem:[%s3583_s8 + $0x79] sm:$0xff]  ;;  %v364_v58 = vld [vmem:[%s3583_s8 + $0x151] sm:$0xff] }
  0x25   : > { %3467 = vmatpush.bf16.msra.mxu3 %v3374_v13  ;;  %592 = vmatpush.bf16.msra.mxu1 %v3374_v13  ;;  %v343_v13 = vld [vmem:[%s3583_s8 + $0x51] sm:$0xff]  ;;  %v3405_v56 = vld [vmem:[%s4457_s1 + $0x100] sm:$0xff]  ;;  %v366_v11 = vld [vmem:[%s3583_s8 + $0x169] sm:$0xff] }
  0x26   : > { %v3695_v18 = vpack.c.bf16 %v343_v13, %v342_v12  ;;  %v282_v46 = vld [vmem:[%s3583_s8 + $0x78] sm:$0xff]  ;;  %v3413_v57 = vld [vmem:[%s4457_s1 + $0x140] sm:$0xff]  ;;  %v300_v60 = vld [vmem:[%s3583_s8 + $0x150] sm:$0xff] }
  0x27   : > { %v365_v59 = vld [vmem:[%s3583_s8 + $0x159] sm:$0xff]  ;;  %v348_v62 = vld [vmem:[%s3583_s8 + $0x91] sm:$0xff]  ;;  %v302_v13 = vld [vmem:[%s3583_s8 + $0x168] sm:$0xff] }
  0x28   : > { %3460 = vmatpush.bf16.msra.mxu2 %v3381_v14  ;;  %456 = vmatpush.bf16.msra.mxu0 %v3381_v14  ;;  %v278_v14 = vld [vmem:[%s3583_s8 + $0x48] sm:$0xff]  ;;  %v301_v61 = vld [vmem:[%s3583_s8 + $0x158] sm:$0xff] }
  0x29   : > { %3468 = vmatpush.bf16.msra.mxu3 %v3373_v15  ;;  %593 = vmatpush.bf16.msra.mxu1 %v3373_v15  ;;  %v279_v15 = vld [vmem:[%s3583_s8 + $0x50] sm:$0xff]  ;;  %v349_v63 = vld [vmem:[%s3583_s8 + $0x99] sm:$0xff] }
  0x2a   : > { %v3697_v19 = vpack.c.bf16 %v279_v15, %v278_v14  ;;  %v3428_v8 = vld [vmem:[%s4457_s1 + $0x1b8] sm:$0xff]  ;;  %v303_v14 = vld [vmem:[%s3583_s8 + $0x170] sm:$0xff] }
  0x2b   : > { %497 = vmatmul.bf16.vlgmr.msra.gmra.mxu2 %v376_v26  ;;  %457 = vmatmul.bf16.vlgmr.msra.gmra.mxu0 %v368_v28  ;;  %v296_v26 = vld [vmem:[%s3583_s8 + $0x120] sm:$0xff]  ;;  %v3436_v9 = vld [vmem:[%s4457_s1 + $0x1f8] sm:$0xff]  ;;  %v350_v15 = vld [vmem:[%s3583_s8 + $0xa9] sm:$0xff] }
  0x2c   : > { %788 = vmatpush.bf16.msrb.mxu2 %v3396_v24  ;;  %634 = vmatmul.bf16.vlgmr.msra.gmra.mxu3 %v312_v27  ;;  %v360_v24 = vld [vmem:[%s3583_s8 + $0x121] sm:$0xff]  ;;  %v3444_v10 = vld [vmem:[%s4457_s1 + $0x238] sm:$0xff] }
  0x2d   : > { %1023 = vmatpush.bf16.msrb.mxu3 %v3404_v25  ;;  %594 = vmatmul.bf16.vlgmr.msra.gmra.mxu1 %v304_v29  ;;  %v361_v25 = vld [vmem:[%s3583_s8 + $0x129] sm:$0xff]  ;;  %v344_v28 = vld [vmem:[%s3583_s8 + $0x61] sm:$0xff]  ;;  %v367_v12 = vld [vmem:[%s3583_s8 + $0x171] sm:$0xff] }
  0x2e   : > { %1257 = vmatpush.bf16.msrb.mxu0 %v3412_v30  ;;  %1491 = vmatpush.bf16.msrb.mxu1 %v3420_v31  ;;  %v297_v27 = vld [vmem:[%s3583_s8 + $0x128] sm:$0xff]  ;;  %v280_v30 = vld [vmem:[%s3583_s8 + $0x60] sm:$0xff] }
  0x2f   : > { %v345_v29 = vld [vmem:[%s3583_s8 + $0x69] sm:$0xff] }
  0x30   : > { %789 = vmatpush.bf16.msrb.mxu2 %v3395_v32  ;;  %v281_v31 = vld [vmem:[%s3583_s8 + $0x68] sm:$0xff]  ;;  %v380_v32 = vpack.c.bf16 %v361_v25, %v360_v24 }
  0x31   : > { %1024 = vmatpush.bf16.msrb.mxu3 %v3403_v33  ;;  %v316_v33 = vpack.c.bf16 %v297_v27, %v296_v26  ;;  %v675_v26 = vld [vmem:[%s3583_s8 + $0x2] sm:$0xff]  ;;  %v676_v27 = vld [vmem:[%s3583_s8 + $0xa] sm:$0xff] }
  0x32   : > { %1258 = vmatpush.bf16.msrb.mxu0 %v3411_v34  ;;  %1492 = vmatpush.bf16.msrb.mxu1 %v3419_v35  ;;  %v3721_v34 = vpack.c.bf16 %v345_v29, %v344_v28  ;;  %v3723_v35 = vpack.c.bf16 %v281_v31, %v280_v30  ;;  %v3017_v28 = vld [vmem:[%s3583_s8 + $0x1a] sm:$0xff]  ;;  %v3018_v29 = vld [vmem:[%s3583_s8 + $0x22] sm:$0xff]  ;;  %v707_v30 = vpack.c.bf16 %v676_v27, %v675_v26 }
  0x33   : > { %v1410_v31 = vpack.c.bf16 %v3018_v29, %v3017_v28  ;;  %v3450_v27 = vld [vmem:[%s4460_s4 + $0x28] sm:$0xff] }
  0x34   : > { %790 = vmatpush.bf16.msrb.mxu2 %v3394_v36  ;;  %v3390_v36 = vld [vmem:[%s4457_s1 + $0x88] sm:$0xff] }
  0x35   : > { %1025 = vmatpush.bf16.msrb.mxu3 %v3402_v37  ;;  %v3398_v37 = vld [vmem:[%s4457_s1 + $0xc8] sm:$0xff] }
  0x36   : > { %1259 = vmatpush.bf16.msrb.mxu0 %v3410_v38  ;;  %1493 = vmatpush.bf16.msrb.mxu1 %v3418_v39  ;;  %v3406_v38 = vld [vmem:[%s4457_s1 + $0x108] sm:$0xff] }
  0x37   : > { %v3414_v39 = vld [vmem:[%s4457_s1 + $0x148] sm:$0xff] }
  0x38   : > { %791 = vmatpush.bf16.msrb.mxu2 %v3393_v52  ;;  %v3747_v52 = vpack.c.bf16 %v347_v45, %v346_v44  ;;  %v3443_v44 = vld [vmem:[%s4457_s1 + $0x230] sm:$0xff]  ;;  %v3020_v45 = vld [vmem:[%s3583_s8 + $0x3a] sm:$0xff] }
  0x39   : > { %1026 = vmatpush.bf16.msrb.mxu3 %v3401_v53  ;;  %v3749_v53 = vpack.c.bf16 %v283_v47, %v282_v46 }
  0x3a   : > { %1260 = vmatpush.bf16.msrb.mxu0 %v3409_v54  ;;  %1494 = vmatpush.bf16.msrb.mxu1 %v3417_v55  ;;  %v3389_v54 = vld [vmem:[%s4457_s1 + $0x80] sm:$0xff] }
  0x3b   : > { %502 = vmatmul.bf16.gmra.mxu2 %v377_v48  ;;  %462 = vmatmul.bf16.gmra.mxu0 %v3643_v50  ;;  %v381_v48 = vpack.c.bf16 %v363_v41, %v362_v40  ;;  %v3397_v55 = vld [vmem:[%s4457_s1 + $0xc0] sm:$0xff] }
  0x3c   : > { %639 = vmatmul.bf16.gmra.mxu3 %v313_v49  ;;  %792 = vmatpush.bf16.msrb.mxu2 %v3392_v4  ;;  %v317_v49 = vpack.c.bf16 %v299_v43, %v298_v42  ;;  %v382_v4 = vpack.c.bf16 %v365_v59, %v364_v58 }
  0x3d   : > { %599 = vmatmul.bf16.gmra.mxu1 %v3645_v51  ;;  %1027 = vmatpush.bf16.msrb.mxu3 %v3400_v5  ;;  %v318_v5 = vpack.c.bf16 %v301_v61, %v300_v60 }
  0x3e   : > { %1261 = vmatpush.bf16.msrb.mxu0 %v3408_v6  ;;  %1495 = vmatpush.bf16.msrb.mxu1 %v3416_v7  ;;  %v3773_v6 = vpack.c.bf16 %v349_v63, %v348_v62 }
  0x40   : > { %793 = vmatpush.bf16.msrb.mxu2 %v3391_v20  ;;  %v287_v20 = vld [vmem:[%s3583_s8 + $0xb0] sm:$0xff] }
  0x41   : > { %1028 = vmatpush.bf16.msrb.mxu3 %v3399_v21  ;;  %v383_v21 = vpack.c.bf16 %v367_v12, %v366_v11  ;;  %v3434_v12 = vld [vmem:[%s4457_s1 + $0x1e8] sm:$0xff] }
  0x42   : > { %1262 = vmatpush.bf16.msrb.mxu0 %v3407_v22  ;;  %1496 = vmatpush.bf16.msrb.mxu1 %v3415_v23  ;;  %v319_v22 = vpack.c.bf16 %v303_v14, %v302_v13  ;;  %v3452_v23 = vld [vmem:[%s4460_s4 + $0x38] sm:$0xff] }
  0x44   : > { %794 = vmatpush.bf16.msrb.mxu2 %v3390_v36 }
  0x45   : > { %1029 = vmatpush.bf16.msrb.mxu3 %v3398_v37  ;;  %v3427_v37 = vld [vmem:[%s4457_s1 + $0x1b0] sm:$0xff] }
  0x46   : > { %1263 = vmatpush.bf16.msrb.mxu0 %v3406_v38  ;;  %1497 = vmatpush.bf16.msrb.mxu1 %v3414_v39  ;;  %v3435_v38 = vld [vmem:[%s4457_s1 + $0x1f0] sm:$0xff] }
  0x48   : > { %795 = vmatpush.bf16.msrb.mxu2 %v3389_v54 }
  0x49   : > { %1030 = vmatpush.bf16.msrb.mxu3 %v3397_v55 }
  0x4a   : > { %1264 = vmatpush.bf16.msrb.mxu0 %v3405_v56  ;;  %1498 = vmatpush.bf16.msrb.mxu1 %v3413_v57 }
  0x4b   : > { %507 = vmatmul.bf16.gmra.mxu2 %v378_v0  ;;  %467 = vmatmul.bf16.gmra.mxu0 %v3669_v2  ;;  %v284_v0 = vld [vmem:[%s3583_s8 + $0x90] sm:$0xff] }
  0x4c   : > { %644 = vmatmul.bf16.gmra.mxu3 %v314_v1  ;;  %v285_v1 = vld [vmem:[%s3583_s8 + $0x98] sm:$0xff]  ;;  %1726 = vmatpush.bf16.msra.mxu2 %v3428_v8 }
  0x4d   : > { %604 = vmatmul.bf16.gmra.mxu1 %v3671_v3  ;;  %v3775_v7 = vpack.c.bf16 %v285_v1, %v284_v0  ;;  %1960 = vmatpush.bf16.msra.mxu3 %v3436_v9  ;;  %v3021_v0 = vld [vmem:[%s3583_s8 + $0x4a] sm:$0xff]  ;;  %v3022_v1 = vld [vmem:[%s3583_s8 + $0x52] sm:$0xff] }
  0x4e   : > { %2194 = vmatpush.bf16.msra.mxu0 %v3444_v10  ;;  %2467 = vmatpush.bf16.msra.mxu1 %v3452_v23  ;;  %v1412_v9 = vpack.c.bf16 %v3022_v1, %v3021_v0  ;;  %v3028_v0 = vld [vmem:[%s3583_s8 + $0x9a] sm:$0xff] }
  0x50   : > { %1727 = vmatpush.bf16.msra.mxu2 %v3427_v37 }
  0x51   : > { %1961 = vmatpush.bf16.msra.mxu3 %v3435_v38 }
  0x52   : > { %2195 = vmatpush.bf16.msra.mxu0 %v3443_v44 }
  0x55   : > { %1962 = vmatpush.bf16.msra.mxu3 %v3434_v12 }
  0x5b   : > { %512 = vmatmul.bf16.gmra.mxu2 %v379_v16  ;;  %472 = vmatmul.bf16.gmra.mxu0 %v3695_v18  ;;  %v351_v16 = vld [vmem:[%s3583_s8 + $0xb1] sm:$0xff] }
  0x5c   : > { %649 = vmatmul.bf16.gmra.mxu3 %v315_v17  ;;  %v286_v17 = vld [vmem:[%s3583_s8 + $0xa8] sm:$0xff]  ;;  %v3799_v24 = vpack.c.bf16 %v351_v16, %v350_v15 }
  0x5d   : > { %609 = vmatmul.bf16.gmra.mxu1 %v3697_v19  ;;  %v3801_v25 = vpack.c.bf16 %v287_v20, %v286_v17  ;;  %v3442_v20 = vld [vmem:[%s4457_s1 + $0x228] sm:$0xff] }
  0x5e   : > { %2196 = vmatpush.bf16.msra.mxu0 %v3442_v20 }
  0x6b   : > { %517 = vmatmul.bf16.gmra.mxu2 %v380_v32  ;;  %477 = vmatmul.bf16.gmra.mxu0 %v3721_v34 }
  0x6c   : > { %654 = vmatmul.bf16.gmra.mxu3 %v316_v33 }
  0x6d   : > { %614 = vmatmul.bf16.gmra.mxu1 %v3723_v35 }
  0x7b   : > { %522 = vmatmul.bf16.gmra.mxu2 %v381_v48  ;;  %482 = vmatmul.bf16.gmra.mxu0 %v3747_v52 }
  0x7c   : > { %659 = vmatmul.bf16.gmra.mxu3 %v317_v49  ;;  %v3451_v49 = vld [vmem:[%s4460_s4 + $0x30] sm:$0xff] }
  0x7d   : > { %619 = vmatmul.bf16.gmra.mxu1 %v3749_v53 }
  0x7e   : > { %2468 = vmatpush.bf16.msra.mxu1 %v3451_v49 }
  0x82   : > { %2469 = vmatpush.bf16.msra.mxu1 %v3450_v27 }
  0x8b   : > { %527 = vmatmul.bf16.gmra.mxu2 %v382_v4  ;;  %487 = vmatmul.bf16.gmra.mxu0 %v3773_v6 }
  0x8c   : > { %664 = vmatmul.bf16.gmra.mxu3 %v318_v5 }
  0x8d   : > { %624 = vmatmul.bf16.gmra.mxu1 %v3775_v7 }
  0x9b   : > { %532 = vmatmul.bf16.gmra.mxu2 %v383_v21  ;;  %492 = vmatmul.bf16.gmra.mxu0 %v3799_v24  ;;  %v3024_v21 = vld [vmem:[%s3583_s8 + $0x6a] sm:$0xff] }
  0x9c   : > { %669 = vmatmul.bf16.gmra.mxu3 %v319_v22 }
  0x9d   : > { %629 = vmatmul.bf16.gmra.mxu1 %v3801_v25 }
  0xa8   : > { %v458_v32 = vpop.f32.mrf.mxu0 }
  0xaa   : > { %v595_v33 = vpop.f32.mrf.mxu1 }
  0xab   : > { %v3809_v36 = vadd.f32 %v595_v33, %v458_v32  ;;  %796 = vmatmul.bf16.vlgmr.msrb.gmra.mxu2 %v707_v30  ;;  %1265 = vmatmul.bf16.vlgmr.msrb.gmra.mxu0 %v3643_v50  ;;  %v3019_v50 = vld [vmem:[%s3583_s8 + $0x32] sm:$0xff] }
  0xac   : > { %1031 = vmatmul.bf16.vlgmr.msrb.gmra.mxu3 %v3645_v51  ;;  %v1411_v54 = vpack.c.bf16 %v3020_v45, %v3019_v50 }
  0xad   : > { %1499 = vmatmul.bf16.vlgmr.msrb.gmra.mxu1 %v1410_v31 }
  0xae   : > { %v498_v39 = vpop.f32.mrf.mxu2 }
  0xaf   : > { %v635_v40 = vpop.f32.mrf.mxu3 }
  0xb0   : > { %v3819_v41 = vadd.f32 %v635_v40, %v498_v39  ;;  %v460_v42 = vpop.f32.mrf.mxu0 }
  0xb2   : > { %v597_v51 = vpop.f32.mrf.mxu1 }
  0xb3   : > { %v3821_v43 = vadd.f32 %v597_v51, %v460_v42  ;;  %v3025_v42 = vld [vmem:[%s3583_s8 + $0x7a] sm:$0xff]  ;;  %v3026_v51 = vld [vmem:[%s3583_s8 + $0x82] sm:$0xff] }
  0xb6   : > { %v500_v46 = vpop.f32.mrf.mxu2 }
  0xb7   : > { %v637_v47 = vpop.f32.mrf.mxu3 }
  0xb8   : > { %v3828_v48 = vadd.f32 %v637_v47, %v500_v46  ;;  %v463_v55 = vpop.f32.mrf.mxu0  ;;  %v1414_v46 = vpack.c.bf16 %v3026_v51, %v3025_v42 }
  0xba   : > { %v600_v56 = vpop.f32.mrf.mxu1 }
  0xbb   : > { %v3833_v57 = vadd.f32 %v600_v56, %v463_v55  ;;  %801 = vmatmul.bf16.gmra.mxu2 %v1410_v31  ;;  %1270 = vmatmul.bf16.gmra.mxu0 %v3669_v2  ;;  %v3426_v2 = vld [vmem:[%s4457_s1 + $0x1a8] sm:$0xff] }
  0xbc   : > { %1036 = vmatmul.bf16.gmra.mxu3 %v3671_v3  ;;  %1728 = vmatpush.bf16.msra.mxu2 %v3426_v2 }
  0xbd   : > { %1504 = vmatmul.bf16.gmra.mxu1 %v1411_v54 }
  0xbe   : > { %v503_v58 = vpop.f32.mrf.mxu2 }
  0xbf   : > { %v640_v59 = vpop.f32.mrf.mxu3 }
  0xc0   : > { %v3837_v60 = vadd.f32 %v640_v59, %v503_v58  ;;  %v465_v61 = vpop.f32.mrf.mxu0 }
  0xc2   : > { %v602_v62 = vpop.f32.mrf.mxu1 }
  0xc3   : > { %v3839_v63 = vadd.f32 %v602_v62, %v465_v61  ;;  %v3441_v62 = vld [vmem:[%s4457_s1 + $0x220] sm:$0xff] }
  0xc4   : > { %2197 = vmatpush.bf16.msra.mxu0 %v3441_v62 }
  0xc6   : > { %v505_v4 = vpop.f32.mrf.mxu2 }
  0xc7   : > { %v642_v5 = vpop.f32.mrf.mxu3 }
  0xc8   : > { %v3843_v8 = vadd.f32 %v642_v5, %v505_v4  ;;  %v468_v10 = vpop.f32.mrf.mxu0 }
  0xca   : > { %v605_v3 = vpop.f32.mrf.mxu1 }
  0xcb   : > { %v3845_v11 = vadd.f32 %v605_v3, %v468_v10  ;;  %806 = vmatmul.bf16.gmra.mxu2 %v1411_v54  ;;  %1275 = vmatmul.bf16.gmra.mxu0 %v3695_v18  ;;  %v3023_v18 = vld [vmem:[%s3583_s8 + $0x62] sm:$0xff] }
  0xcc   : > { %1041 = vmatmul.bf16.gmra.mxu3 %v3697_v19  ;;  %v1413_v28 = vpack.c.bf16 %v3024_v21, %v3023_v18  ;;  %v3433_v54 = vld [vmem:[%s4457_s1 + $0x1e0] sm:$0xff]  ;;  %v3029_v21 = vld [vmem:[%s3583_s8 + $0xaa] sm:$0xff] }
  0xcd   : > { %1509 = vmatmul.bf16.gmra.mxu1 %v1412_v9  ;;  %1963 = vmatpush.bf16.msra.mxu3 %v3433_v54  ;;  %v3032_v54 = vld [vmem:[%s3583_s8 + $0xca] sm:$0xff] }
  0xce   : > { %v508_v13 = vpop.f32.mrf.mxu2 }
  0xcf   : > { %v645_v14 = vpop.f32.mrf.mxu3 }
  0xd0   : > { %v3855_v15 = vadd.f32 %v645_v14, %v508_v13  ;;  %v470_v16 = vpop.f32.mrf.mxu0 }
  0xd2   : > { %v607_v19 = vpop.f32.mrf.mxu1 }
  0xd3   : > { %v3857_v17 = vadd.f32 %v607_v19, %v470_v16 }
  0xd6   : > { %v510_v22 = vpop.f32.mrf.mxu2 }
  0xd7   : > { %v647_v23 = vpop.f32.mrf.mxu3 }
  0xd8   : > { %v3864_v26 = vadd.f32 %v647_v23, %v510_v22  ;;  %v473_v29 = vpop.f32.mrf.mxu0  ;;  %v3030_v22 = vld [vmem:[%s3583_s8 + $0xb2] sm:$0xff] }
  0xda   : > { %v610_v30 = vpop.f32.mrf.mxu1 }
  0xdb   : > { %v3869_v31 = vadd.f32 %v610_v30, %v473_v29  ;;  %811 = vmatmul.bf16.gmra.mxu2 %v1412_v9  ;;  %1280 = vmatmul.bf16.gmra.mxu0 %v3721_v34  ;;  %v3425_v34 = vld [vmem:[%s4457_s1 + $0x1a0] sm:$0xff]  ;;  %v3917_v29 = vpack.c.bf16 %v3030_v22, %v3029_v21 }
  0xdc   : > { %1046 = vmatmul.bf16.gmra.mxu3 %v3723_v35  ;;  %1729 = vmatpush.bf16.msra.mxu2 %v3425_v34  ;;  %v3449_v9 = vld [vmem:[%s4460_s4 + $0x20] sm:$0xff] }
  0xdd   : > { %1514 = vmatmul.bf16.gmra.mxu1 %v1413_v28  ;;  %v3031_v34 = vld [vmem:[%s3583_s8 + $0xc2] sm:$0xff]  ;;  %v2953_v22 = vld [vmem:[%s3583_s8 + $0xd9] sm:$0xff] }
  0xde   : > { %v513_v32 = vpop.f32.mrf.mxu2  ;;  %2470 = vmatpush.bf16.msra.mxu1 %v3449_v9  ;;  %v3448_v9 = vld [vmem:[%s4460_s4 + $0x18] sm:$0xff]  ;;  %v2874_v21 = vld [vmem:[%s3583_s8 + $0xe0] sm:$0xff] }
  0xdf   : > { %v650_v33 = vpop.f32.mrf.mxu3 }
  0xe0   : > { %v3873_v37 = vadd.f32 %v650_v33, %v513_v32  ;;  %v475_v38 = vpop.f32.mrf.mxu0  ;;  %v3424_v32 = vld [vmem:[%s4457_s1 + $0x198] sm:$0xff] }
  0xe1   : > { %v3432_v33 = vld [vmem:[%s4457_s1 + $0x1d8] sm:$0xff]  ;;  %1730 = vmatpush.bf16.msra.mxu2 %v3424_v32 }
  0xe2   : > { %v612_v39 = vpop.f32.mrf.mxu1  ;;  %1964 = vmatpush.bf16.msra.mxu3 %v3432_v33  ;;  %2471 = vmatpush.bf16.msra.mxu1 %v3448_v9  ;;  %v2875_v9 = vld [vmem:[%s3583_s8 + $0xf0] sm:$0xff] }
  0xe3   : > { %v3875_v40 = vadd.f32 %v612_v39, %v475_v38 }
  0xe6   : > { %v515_v44 = vpop.f32.mrf.mxu2 }
  0xe7   : > { %v652_v50 = vpop.f32.mrf.mxu3 }
  0xe8   : > { %v3879_v45 = vadd.f32 %v652_v50, %v515_v44  ;;  %v478_v47 = vpop.f32.mrf.mxu0  ;;  %v2871_v50 = vld [vmem:[%s3583_s8 + $0xc0] sm:$0xff] }
  0xea   : > { %v615_v35 = vpop.f32.mrf.mxu1 }
  0xeb   : > { %v3881_v49 = vadd.f32 %v615_v35, %v478_v47  ;;  %816 = vmatmul.bf16.gmra.mxu2 %v1413_v28  ;;  %1285 = vmatmul.bf16.gmra.mxu0 %v3747_v52  ;;  %v3027_v52 = vld [vmem:[%s3583_s8 + $0x92] sm:$0xff]  ;;  %v2951_v47 = vld [vmem:[%s3583_s8 + $0xc1] sm:$0xff]  ;;  %v2952_v35 = vld [vmem:[%s3583_s8 + $0xc9] sm:$0xff] }
  0xec   : > { %1051 = vmatmul.bf16.gmra.mxu3 %v3749_v53  ;;  %v1415_v10 = vpack.c.bf16 %v3028_v0, %v3027_v52  ;;  %v3947_v62 = vpack.c.bf16 %v2952_v35, %v2951_v47  ;;  %v3949_v52 = vpack.c.bf16 %v3032_v54, %v3031_v34 }
  0xed   : > { %1519 = vmatmul.bf16.gmra.mxu1 %v1414_v46 }
  0xee   : > { %v518_v55 = vpop.f32.mrf.mxu2 }
  0xef   : > { %v655_v56 = vpop.f32.mrf.mxu3 }
  0xf0   : > { %v3891_v58 = vadd.f32 %v655_v56, %v518_v55  ;;  %v480_v59 = vpop.f32.mrf.mxu0 }
  0xf2   : > { %v617_v53 = vpop.f32.mrf.mxu1 }
  0xf3   : > { %v3893_v61 = vadd.f32 %v617_v53, %v480_v59 }
  0xf6   : > { %v520_v1 = vpop.f32.mrf.mxu2 }
  0xf7   : > { %v657_v4 = vpop.f32.mrf.mxu3 }
  0xf8   : > { %v3900_v5 = vadd.f32 %v657_v4, %v520_v1  ;;  %v483_v3 = vpop.f32.mrf.mxu0 }
  0xfa   : > { %v620_v2 = vpop.f32.mrf.mxu1 }
  0xfb   : > { %v3905_v12 = vadd.f32 %v620_v2, %v483_v3  ;;  %821 = vmatmul.bf16.gmra.mxu2 %v1414_v46  ;;  %1290 = vmatmul.bf16.gmra.mxu0 %v3773_v6  ;;  %v2872_v46 = vld [vmem:[%s3583_s8 + $0xc8] sm:$0xff] }
  0xfc   : > { %1056 = vmatmul.bf16.gmra.mxu3 %v3775_v7  ;;  %v3945_v53 = vpack.c.bf16 %v2872_v46, %v2871_v50  ;;  %v3423_v50 = vld [vmem:[%s4457_s1 + $0x190] sm:$0xff] }
  0xfd   : > { %1524 = vmatmul.bf16.gmra.mxu1 %v1415_v10  ;;  %v3431_v46 = vld [vmem:[%s4457_s1 + $0x1d0] sm:$0xff]  ;;  %1731 = vmatpush.bf16.msra.mxu2 %v3423_v50 }
  0xfe   : > { %v523_v13 = vpop.f32.mrf.mxu2  ;;  %1965 = vmatpush.bf16.msra.mxu3 %v3431_v46 }
  0xff   : > { %v660_v14 = vpop.f32.mrf.mxu3 }
 0x100   : > { %v3909_v16 = vadd.f32 %v660_v14, %v523_v13  ;;  %v485_v19 = vpop.f32.mrf.mxu0 }
 0x102   : > { %v622_v20 = vpop.f32.mrf.mxu1 }
 0x103   : > { %v3911_v18 = vadd.f32 %v622_v20, %v485_v19  ;;  %v2873_v20 = vld [vmem:[%s3583_s8 + $0xd8] sm:$0xff] }
 0x106   : > { %v525_v23 = vpop.f32.mrf.mxu2 }
 0x107   : > { %v662_v27 = vpop.f32.mrf.mxu3 }
 0x108   : > { %v3915_v28 = vadd.f32 %v662_v27, %v525_v23  ;;  %v488_v7 = vpop.f32.mrf.mxu0  ;;  %v2954_v23 = vld [vmem:[%s3583_s8 + $0xe1] sm:$0xff] }
 0x109   : > { %v3033_v27 = vld [vmem:[%s3583_s8 + $0xda] sm:$0xff] }
 0x10a   : > { %v625_v30 = vpop.f32.mrf.mxu1 }
 0x10b   : > { %v3919_v6 = vadd.f32 %v625_v30, %v488_v7  ;;  %826 = vmatmul.bf16.gmra.mxu2 %v1415_v10  ;;  %1295 = vmatmul.bf16.gmra.mxu0 %v3799_v24  ;;  %v3440_v24 = vld [vmem:[%s4457_s1 + $0x218] sm:$0xff]  ;;  %v3034_v7 = vld [vmem:[%s3583_s8 + $0xe2] sm:$0xff] }
 0x10c   : > { %1061 = vmatmul.bf16.gmra.mxu3 %v3801_v25  ;;  %2198 = vmatpush.bf16.msra.mxu0 %v3440_v24 }
 0x10d   : > { %1529 = vmatmul.bf16.gmra.mxu1 %v3917_v29 }
 0x10e   : > { %v528_v38 = vpop.f32.mrf.mxu2 }
 0x10f   : > { %v665_v39 = vpop.f32.mrf.mxu3 }
 0x110   : > { %v3930_v25 = vadd.f32 %v665_v39, %v528_v38  ;;  %v490_v42 = vpop.f32.mrf.mxu0  ;;  %v3972_v38 = vpack.c.bf16 %v2874_v21, %v2873_v20  ;;  %v3974_v39 = vpack.c.bf16 %v2954_v23, %v2953_v22  ;;  %v3036_v20 = vld [vmem:[%s3583_s8 + $0xfa] sm:$0xff] }
 0x112   : > { %v627_v51 = vpop.f32.mrf.mxu1 }
 0x113   : > { %v3932_v44 = vadd.f32 %v627_v51, %v490_v42  ;;  %v3976_v42 = vpack.c.bf16 %v3034_v7, %v3033_v27 }
 0x116   : > { %v530_v55 = vpop.f32.mrf.mxu2 }
 0x117   : > { %v667_v56 = vpop.f32.mrf.mxu3 }
 0x118   : > { %v3943_v59 = vadd.f32 %v667_v56, %v530_v55  ;;  %v493_v0 = vpop.f32.mrf.mxu0 }
 0x11a   : > { %v630_v1 = vpop.f32.mrf.mxu1 }
 0x11b   : > { %v3951_v4 = vadd.f32 %v630_v1, %v493_v0  ;;  %831 = vmatmul.bf16.gmra.mxu2 %v3917_v29  ;;  %1300 = vmatmul.bf16.gmra.mxu0 %v3947_v62  ;;  %v3439_v1 = vld [vmem:[%s4457_s1 + $0x210] sm:$0xff] }
 0x11c   : > { %1066 = vmatmul.bf16.gmra.mxu3 %v3945_v53  ;;  %2199 = vmatpush.bf16.msra.mxu0 %v3439_v1 }
 0x11d   : > { %1534 = vmatmul.bf16.gmra.mxu1 %v3949_v52 }
 0x11e   : > { %v533_v10 = vpop.f32.mrf.mxu2 }
 0x11f   : > { %v670_v3 = vpop.f32.mrf.mxu3 }
 0x120   : > { %v3960_v2 = vadd.f32 %v670_v3, %v533_v10  ;;  %v495_v13 = vpop.f32.mrf.mxu0  ;;  %v2876_v10 = vld [vmem:[%s3583_s8 + $0xf8] sm:$0xff] }
 0x121   : > { %v2955_v3 = vld [vmem:[%s3583_s8 + $0xf1] sm:$0xff]  ;;  %v4001_v27 = vpack.c.bf16 %v2876_v10, %v2875_v9  ;;  %v2877_v9 = vld [vmem:[%s3583_s8 + $0x108] sm:$0xff] }
 0x122   : > { %v632_v14 = vpop.f32.mrf.mxu1  ;;  %v2878_v10 = vld [vmem:[%s3583_s8 + $0x110] sm:$0xff] }
 0x123   : > { %v3962_v19 = vadd.f32 %v632_v14, %v495_v13  ;;  %v2956_v13 = vld [vmem:[%s3583_s8 + $0xf9] sm:$0xff] }
 0x124   : > { %v3035_v14 = vld [vmem:[%s3583_s8 + $0xf2] sm:$0xff]  ;;  %v4003_v7 = vpack.c.bf16 %v2956_v13, %v2955_v3  ;;  %v2957_v3 = vld [vmem:[%s3583_s8 + $0x109] sm:$0xff] }
 0x125   : > { %v2958_v13 = vld [vmem:[%s3583_s8 + $0x111] sm:$0xff] }
 0x126   : > { %v535_v30 = vpop.f32.mrf.mxu2 }
 0x127   : > { %v672_v32 = vpop.f32.mrf.mxu3 }
 0x128   : > { %v3970_v33 = vadd.f32 %v672_v32, %v535_v30  ;;  %v1266_v51 = vpop.f32.mrf.mxu0  ;;  %v4005_v30 = vpack.c.bf16 %v3036_v20, %v3035_v14  ;;  %v3037_v14 = vld [vmem:[%s3583_s8 + $0x10a] sm:$0xff]  ;;  %v3038_v20 = vld [vmem:[%s3583_s8 + $0x112] sm:$0xff] }
 0x12a   : > { %v1500_v24 = vpop.f32.mrf.mxu1 }
 0x12b   : > { %836 = vmatmul.bf16.gmra.mxu2 %v3949_v52  ;;  %1305 = vmatmul.bf16.gmra.mxu0 %v3974_v39 }
 0x12c   : > { %1071 = vmatmul.bf16.gmra.mxu3 %v3972_v38 }
 0x12d   : > { %1539 = vmatmul.bf16.gmra.mxu1 %v3976_v42 }
 0x12e   : > { %v797_v47 = vpop.f32.mrf.mxu2 }
 0x12f   : > { %v1032_v35 = vpop.f32.mrf.mxu3  ;;  %v877_v34 = vadd.f32 %v797_v47, %v3809_v36 }
 0x130   : > { %v1268_v55 = vpop.f32.mrf.mxu0 }
 0x131   : > { %v1112_v54 = vadd.f32 %v1032_v35, %v877_v34 }
 0x132   : > { %v1502_v56 = vpop.f32.mrf.mxu1 }
 0x133   : > { %v1346_v0 = vadd.f32 %v1266_v51, %v1112_v54 }
 0x135   : > { %v3998_v21 = vadd.f32 %v1500_v24, %v1346_v0 }
 0x136   : > { %v799_v22 = vpop.f32.mrf.mxu2 }
 0x137   : > { %v1034_v23 = vpop.f32.mrf.mxu3  ;;  %v878_v36 = vadd.f32 %v799_v22, %v3821_v43  ;;  %v3447_v43 = vld [vmem:[%s4460_s4 + $0x10] sm:$0xff] }
 0x138   : > { %v1271_v51 = vpop.f32.mrf.mxu0  ;;  %2472 = vmatpush.bf16.msra.mxu1 %v3447_v43 }
 0x139   : > { %v1113_v32 = vadd.f32 %v1034_v23, %v878_v36 }
 0x13a   : > { %v1505_v50 = vpop.f32.mrf.mxu1 }
 0x13b   : > { %v1347_v46 = vadd.f32 %v1268_v55, %v1113_v32  ;;  %841 = vmatmul.bf16.gmra.mxu2 %v3976_v42  ;;  %1310 = vmatmul.bf16.gmra.mxu0 %v4003_v7  ;;  %v952_v32 = vpack.c.bf16 %v2878_v10, %v2877_v9 }
 0x13c   : > { %1076 = vmatmul.bf16.gmra.mxu3 %v4001_v27 }
 0x13d   : > { %1544 = vmatmul.bf16.gmra.mxu1 %v4005_v30  ;;  %v4014_v24 = vadd.f32 %v1502_v56, %v1347_v46  ;;  %v4026_v46 = vpack.c.bf16 %v2958_v13, %v2957_v3 }
 0x13e   : > { %v802_v47 = vpop.f32.mrf.mxu2 }
 0x13f   : > { %v1037_v35 = vpop.f32.mrf.mxu3  ;;  %v879_v34 = vadd.f32 %v802_v47, %v3833_v57  ;;  %v4028_v57 = vpack.c.bf16 %v3038_v20, %v3037_v14  ;;  %v3438_v14 = vld [vmem:[%s4457_s1 + $0x208] sm:$0xff]  ;;  %v2879_v20 = vld [vmem:[%s3583_s8 + $0x120] sm:$0xff] }
 0x140   : > { %v1273_v55 = vpop.f32.mrf.mxu0  ;;  %2200 = vmatpush.bf16.msra.mxu0 %v3438_v14 }
 0x141   : > { %v1114_v54 = vadd.f32 %v1037_v35, %v879_v34 }
 0x142   : > { %v1507_v0 = vpop.f32.mrf.mxu1 }
 0x143   : > { %v1348_v1 = vadd.f32 %v1271_v51, %v1114_v54 }
 0x145   : > { %v4023_v22 = vadd.f32 %v1505_v50, %v1348_v1  ;;  %v3422_v50 = vld [vmem:[%s4457_s1 + $0x188] sm:$0xff] }
 0x146   : > { %v804_v23 = vpop.f32.mrf.mxu2  ;;  %1732 = vmatpush.bf16.msra.mxu2 %v3422_v50 }
 0x147   : > { %v1039_v36 = vpop.f32.mrf.mxu3  ;;  %v880_v56 = vadd.f32 %v804_v23, %v3839_v63  ;;  %v3430_v63 = vld [vmem:[%s4457_s1 + $0x1c8] sm:$0xff] }
 0x148   : > { %v1276_v47 = vpop.f32.mrf.mxu0  ;;  %1966 = vmatpush.bf16.msra.mxu3 %v3430_v63  ;;  %v2880_v23 = vld [vmem:[%s3583_s8 + $0x128] sm:$0xff] }
 0x149   : > { %v1115_v43 = vadd.f32 %v1039_v36, %v880_v56  ;;  %v2959_v36 = vld [vmem:[%s3583_s8 + $0x121] sm:$0xff]  ;;  %v2960_v56 = vld [vmem:[%s3583_s8 + $0x129] sm:$0xff]  ;;  %v4054_v63 = vpack.c.bf16 %v2880_v23, %v2879_v20 }
 0x14a   : > { %v1510_v51 = vpop.f32.mrf.mxu1 }
 0x14b   : > { %v1349_v35 = vadd.f32 %v1273_v55, %v1115_v43  ;;  %846 = vmatmul.bf16.gmra.mxu2 %v4005_v30  ;;  %1315 = vmatmul.bf16.gmra.mxu0 %v4026_v46  ;;  %4467 = vst [vmem:[#allocation4_spill] sm:$0xff] %v4054_v63 }
 0x14c   : > { %1081 = vmatmul.bf16.gmra.mxu3 %v952_v32  ;;  %v3039_v32 = vld [vmem:[%s3583_s8 + $0x122] sm:$0xff] }
 0x14d   : > { %1549 = vmatmul.bf16.gmra.mxu1 %v4028_v57  ;;  %v4039_v34 = vadd.f32 %v1507_v0, %v1349_v35  ;;  %v3040_v0 = vld [vmem:[%s3583_s8 + $0x12a] sm:$0xff] }
 0x14e   : > { %v807_v54 = vpop.f32.mrf.mxu2 }
 0x14f   : > { %4465 = vst [vmem:[#allocation2_spill] sm:$0xff] %v4039_v34  ;;  %v1042_v55 = vpop.f32.mrf.mxu3  ;;  %v881_v1 = vadd.f32 %v807_v54, %v3845_v11  ;;  %v4058_v54 = vpack.c.bf16 %v3040_v0, %v3039_v32  ;;  %v2881_v32 = vld [vmem:[%s3583_s8 + $0x138] sm:$0xff]  ;;  %v2882_v0 = vld [vmem:[%s3583_s8 + $0x140] sm:$0xff] }
 0x150   : > { %v1278_v10 = vpop.f32.mrf.mxu0 }
 0x151   : > { %v1116_v9 = vadd.f32 %v1042_v55, %v881_v1 }
 0x152   : > { %v1512_v3 = vpop.f32.mrf.mxu1 }
 0x153   : > { %v1350_v13 = vadd.f32 %v1276_v47, %v1116_v9  ;;  %v4056_v47 = vpack.c.bf16 %v2960_v56, %v2959_v36 }
 0x155   : > { %v4051_v43 = vadd.f32 %v1510_v51, %v1350_v13  ;;  %4468 = vst [vmem:[#allocation5_spill] sm:$0xff] %v4056_v47 }
 0x156   : > { %v809_v35 = vpop.f32.mrf.mxu2 }
 0x157   : > { %4466 = vst [vmem:[#allocation3_spill] sm:$0xff] %v4051_v43  ;;  %v1044_v50 = vpop.f32.mrf.mxu3  ;;  %v882_v11 = vadd.f32 %v809_v35, %v3857_v17  ;;  %v3446_v17 = vld [vmem:[%s4460_s4 + $0x8] sm:$0xff]  ;;  %v2961_v35 = vld [vmem:[%s3583_s8 + $0x139] sm:$0xff] }
 0x158   : > { %v1281_v1 = vpop.f32.mrf.mxu0  ;;  %2473 = vmatpush.bf16.msra.mxu1 %v3446_v17 }
 0x159   : > { %v1117_v55 = vadd.f32 %v1044_v50, %v882_v11  ;;  %v2962_v50 = vld [vmem:[%s3583_s8 + $0x141] sm:$0xff] }
 0x15a   : > { %v1515_v9 = vpop.f32.mrf.mxu1  ;;  %v3041_v11 = vld [vmem:[%s3583_s8 + $0x13a] sm:$0xff] }
 0x15b   : > { %v1351_v34 = vadd.f32 %v1278_v10, %v1117_v55  ;;  %851 = vmatmul.bf16.gmra.mxu2 %v4028_v57  ;;  %1320 = vmatmul.bf16.gmra.mxu0 %v4056_v47  ;;  %v3042_v55 = vld [vmem:[%s3583_s8 + $0x142] sm:$0xff] }
 0x15c   : > { %1086 = vmatmul.bf16.gmra.mxu3 %v4054_v63  ;;  %v4079_v63 = vpack.c.bf16 %v3042_v55, %v3041_v11  ;;  %v2884_v11 = vld [vmem:[%s3583_s8 + $0x158] sm:$0xff] }
 0x15d   : > { %1554 = vmatmul.bf16.gmra.mxu1 %v4058_v54  ;;  %v4067_v51 = vadd.f32 %v1512_v3, %v1351_v34  ;;  %v954_v3 = vpack.c.bf16 %v2882_v0, %v2881_v32  ;;  %v2963_v55 = vld [vmem:[%s3583_s8 + $0x151] sm:$0xff] }
 0x15e   : > { %v812_v10 = vpop.f32.mrf.mxu2 }
 0x15f   : > { %4469 = vst [vmem:[#allocation6_spill] sm:$0xff] %v4067_v51  ;;  %v1047_v13 = vpop.f32.mrf.mxu3  ;;  %v883_v14 = vadd.f32 %v812_v10, %v3869_v31  ;;  %v1188_v51 = vpack.c.bf16 %v2962_v50, %v2961_v35  ;;  %v3437_v35 = vld [vmem:[%s4457_s1 + $0x200] sm:$0xff]  ;;  %v2883_v50 = vld [vmem:[%s3583_s8 + $0x150] sm:$0xff] }
 0x160   : > { %v1283_v23 = vpop.f32.mrf.mxu0  ;;  %2201 = vmatpush.bf16.msra.mxu0 %v3437_v35 }
 0x161   : > { %v1118_v20 = vadd.f32 %v1047_v13, %v883_v14 }
 0x162   : > { %v1517_v36 = vpop.f32.mrf.mxu1 }
 0x163   : > { %v1352_v56 = vadd.f32 %v1281_v1, %v1118_v20 }
 0x165   : > { %v4076_v43 = vadd.f32 %v1515_v9, %v1352_v56  ;;  %v3421_v9 = vld [vmem:[%s4457_s1 + $0x180] sm:$0xff] }
 0x166   : > { %v814_v47 = vpop.f32.mrf.mxu2  ;;  %1733 = vmatpush.bf16.msra.mxu2 %v3421_v9  ;;  %v955_v9 = vpack.c.bf16 %v2884_v11, %v2883_v50 }
 0x167   : > { %v1049_v17 = vpop.f32.mrf.mxu3  ;;  %v884_v34 = vadd.f32 %v814_v47, %v3875_v40  ;;  %v3429_v40 = vld [vmem:[%s4457_s1 + $0x1c0] sm:$0xff] }
 0x168   : > { %v1286_v10 = vpop.f32.mrf.mxu0  ;;  %1967 = vmatpush.bf16.msra.mxu3 %v3429_v40 }
 0x169   : > { %v1119_v31 = vadd.f32 %v1049_v17, %v884_v34  ;;  %v2964_v17 = vld [vmem:[%s3583_s8 + $0x159] sm:$0xff] }
 0x16a   : > { %v1520_v13 = vpop.f32.mrf.mxu1  ;;  %v3043_v34 = vld [vmem:[%s3583_s8 + $0x152] sm:$0xff]  ;;  %v1189_v40 = vpack.c.bf16 %v2964_v17, %v2963_v55 }
 0x16b   : > { %v1353_v1 = vadd.f32 %v1283_v23, %v1119_v31  ;;  %856 = vmatmul.bf16.gmra.mxu2 %v4058_v54  ;;  %1325 = vmatmul.bf16.gmra.mxu0 %v1188_v51 }
 0x16c   : > { %1091 = vmatmul.bf16.gmra.mxu3 %v954_v3 }
 0x16d   : > { %1559 = vmatmul.bf16.gmra.mxu1 %v4079_v63  ;;  %v4089_v47 = vadd.f32 %v1517_v36, %v1353_v1  ;;  %v3044_v36 = vld [vmem:[%s3583_s8 + $0x15a] sm:$0xff] }
 0x16e   : > { %v817_v14 = vpop.f32.mrf.mxu2 }
 0x16f   : > { %v1052_v20 = vpop.f32.mrf.mxu3  ;;  %v885_v23 = vadd.f32 %v817_v14, %v3881_v49 }
 0x170   : > { %v1288_v51 = vpop.f32.mrf.mxu0 }
 0x171   : > { %v1120_v56 = vadd.f32 %v1052_v20, %v885_v23 }
 0x172   : > { %v1522_v32 = vpop.f32.mrf.mxu1 }
 0x173   : > { %v1354_v0 = vadd.f32 %v1286_v10, %v1120_v56  ;;  %v1423_v10 = vpack.c.bf16 %v3044_v36, %v3043_v34  ;;  %v2885_v34 = vld [vmem:[%s3583_s8 + $0x168] sm:$0xff]  ;;  %v2886_v36 = vld [vmem:[%s3583_s8 + $0x170] sm:$0xff] }
 0x175   : > { %v4101_v3 = vadd.f32 %v1520_v13, %v1354_v0  ;;  %v3445_v13 = vld [vmem:[%s4460_s4] sm:$0xff] }
 0x176   : > { %v819_v31 = vpop.f32.mrf.mxu2  ;;  %2474 = vmatpush.bf16.msra.mxu1 %v3445_v13 }
 0x177   : > { %4470 = vst [vmem:[#allocation7_spill] sm:$0xff] %v4101_v3  ;;  %v1054_v1 = vpop.f32.mrf.mxu3  ;;  %v886_v49 = vadd.f32 %v819_v31, %v3893_v61  ;;  %v2965_v31 = vld [vmem:[%s3583_s8 + $0x169] sm:$0xff] }
 0x178   : > { %v1291_v20 = vpop.f32.mrf.mxu0 }
 0x179   : > { %v1121_v14 = vadd.f32 %v1054_v1, %v886_v49  ;;  %v2966_v1 = vld [vmem:[%s3583_s8 + $0x171] sm:$0xff] }
 0x17a   : > { %v1525_v23 = vpop.f32.mrf.mxu1  ;;  %v3045_v49 = vld [vmem:[%s3583_s8 + $0x16a] sm:$0xff] }
 0x17b   : > { %v1355_v56 = vadd.f32 %v1288_v51, %v1121_v14  ;;  %861 = vmatmul.bf16.gmra.mxu2 %v4079_v63  ;;  %1330 = vmatmul.bf16.gmra.mxu0 %v1189_v40 }
 0x17c   : > { %1096 = vmatmul.bf16.gmra.mxu3 %v955_v9  ;;  %v3046_v9 = vld [vmem:[%s3583_s8 + $0x172] sm:$0xff] }
 0x17d   : > { %1564 = vmatmul.bf16.gmra.mxu1 %v1423_v10  ;;  %v4108_v61 = vadd.f32 %v1522_v32, %v1355_v56  ;;  %v956_v56 = vpack.c.bf16 %v2886_v36, %v2885_v34  ;;  %v1424_v3 = vpack.c.bf16 %v3046_v9, %v3045_v49  ;;  %v2888_v49 = vld [vmem:[%s3583_s8 + $0x188] sm:$0xff] }
 0x17e   : > { %v822_v0 = vpop.f32.mrf.mxu2  ;;  %v2968_v9 = vld [vmem:[%s3583_s8 + $0x189] sm:$0xff] }
 0x17f   : > { %4471 = vst [vmem:[#allocation8_spill] sm:$0xff] %v4108_v61  ;;  %v1057_v35 = vpop.f32.mrf.mxu3  ;;  %v887_v51 = vadd.f32 %v822_v0, %v3905_v12  ;;  %v1190_v61 = vpack.c.bf16 %v2966_v1, %v2965_v31  ;;  %v2887_v1 = vld [vmem:[%s3583_s8 + $0x180] sm:$0xff] }
 0x180   : > { %v1293_v11 = vpop.f32.mrf.mxu0 }
 0x181   : > { %v1122_v50 = vadd.f32 %v1057_v35, %v887_v51 }
 0x182   : > { %v1527_v55 = vpop.f32.mrf.mxu1 }
 0x183   : > { %v1356_v17 = vadd.f32 %v1291_v20, %v1122_v50 }
 0x185   : > { %v4117_v40 = vadd.f32 %v1525_v23, %v1356_v17 }
 0x186   : > { %v824_v14 = vpop.f32.mrf.mxu2 }
 0x187   : > { %v1059_v13 = vpop.f32.mrf.mxu3  ;;  %v888_v32 = vadd.f32 %v824_v14, %v3911_v18  ;;  %v3048_v14 = vld [vmem:[%s3583_s8 + $0x18a] sm:$0xff] }
 0x188   : > { %v1296_v0 = vpop.f32.mrf.mxu0 }
 0x189   : > { %v1123_v12 = vadd.f32 %v1059_v13, %v888_v32 }
 0x18a   : > { %v1530_v20 = vpop.f32.mrf.mxu1 }
 0x18b   : > { %v1357_v35 = vadd.f32 %v1293_v11, %v1123_v12  ;;  %866 = vmatmul.bf16.gmra.mxu2 %v1423_v10  ;;  %1335 = vmatmul.bf16.gmra.mxu0 %v1190_v61  ;;  %v2967_v11 = vld [vmem:[%s3583_s8 + $0x181] sm:$0xff] }
 0x18c   : > { %1101 = vmatmul.bf16.gmra.mxu3 %v956_v56  ;;  %v3047_v10 = vld [vmem:[%s3583_s8 + $0x182] sm:$0xff]  ;;  %v957_v56 = vpack.c.bf16 %v2888_v49, %v2887_v1  ;;  %v1191_v12 = vpack.c.bf16 %v2968_v9, %v2967_v11  ;;  %v3177_v11 = vld [vmem:[%s3583_s8 + $0x31] sm:$0xff]  ;;  %v3178_v9 = vld [vmem:[%s3583_s8 + $0x39] sm:$0xff] }
 0x18d   : > { %1569 = vmatmul.bf16.gmra.mxu1 %v1424_v3  ;;  %v4120_v23 = vadd.f32 %v1527_v55, %v1357_v35 }
 0x18e   : > { %v827_v18 = vpop.f32.mrf.mxu2 }
 0x18f   : > { %v1062_v51 = vpop.f32.mrf.mxu3  ;;  %v889_v50 = vadd.f32 %v827_v18, %v3919_v6  ;;  %v1425_v6 = vpack.c.bf16 %v3048_v14, %v3047_v10  ;;  %v3257_v10 = vld [vmem:[%s3583_s8 + $0x32] sm:$0xff]  ;;  %v3258_v14 = vld [vmem:[%s3583_s8 + $0x3a] sm:$0xff] }
 0x190   : > { %v1298_v34 = vpop.f32.mrf.mxu0 }
 0x191   : > { %v1124_v17 = vadd.f32 %v1062_v51, %v889_v50 }
 0x192   : > { %v1532_v36 = vpop.f32.mrf.mxu1 }
 0x193   : > { %v1358_v31 = vadd.f32 %v1296_v0, %v1124_v17 }
 0x195   : > { %v4129_v13 = vadd.f32 %v1530_v20, %v1358_v31 }
 0x196   : > { %v829_v61 = vpop.f32.mrf.mxu2 }
 0x197   : > { %v1064_v32 = vpop.f32.mrf.mxu3  ;;  %v890_v55 = vadd.f32 %v829_v61, %v3932_v44  ;;  %v2352_v61 = vld [vmem:[%s4141_s18 + $0x8] sm:$0xff] }
 0x198   : > { %v1301_v18 = vpop.f32.mrf.mxu0 }
 0x199   : > { %v1125_v35 = vadd.f32 %v1064_v32, %v890_v55 }
 0x19a   : > { %v1535_v0 = vpop.f32.mrf.mxu1 }
 0x19b   : > { %v1359_v51 = vadd.f32 %v1298_v34, %v1125_v35  ;;  %871 = vmatmul.bf16.gmra.mxu2 %v1424_v3  ;;  %1340 = vmatmul.bf16.gmra.mxu0 %v1191_v12  ;;  %v3097_v34 = vld [vmem:[%s3583_s8 + $0x30] sm:$0xff]  ;;  %v1879_v35 = vpack.c.bf16 %v3178_v9, %v3177_v11 }
 0x19c   : > { %1106 = vmatmul.bf16.gmra.mxu3 %v957_v56 }
 0x19d   : > { %1574 = vmatmul.bf16.gmra.mxu1 %v1425_v6  ;;  %v4132_v44 = vadd.f32 %v1532_v36, %v1359_v51  ;;  %v3098_v36 = vld [vmem:[%s3583_s8 + $0x38] sm:$0xff]  ;;  %v2113_v51 = vpack.c.bf16 %v3258_v14, %v3257_v10  ;;  %v3100_v14 = vld [vmem:[%s3583_s8 + $0x50] sm:$0xff] }
 0x19e   : > { %v832_v20 = vpop.f32.mrf.mxu2  ;;  %v1645_v6 = vpack.c.bf16 %v3098_v36, %v3097_v34 }
 0x19f   : > { %v1067_v50 = vpop.f32.mrf.mxu3  ;;  %v891_v17 = vadd.f32 %v832_v20, %v3951_v4  ;;  %v2351_v4 = vld [vmem:[%s4141_s18] sm:$0xff] }
 0x1a0   : > { %v1303_v1 = vpop.f32.mrf.mxu0  ;;  %v2383_v20 = vpack.c.bf16 %v2352_v61, %v2351_v4  ;;  %v3179_v4 = vld [vmem:[%s3583_s8 + $0x49] sm:$0xff]  ;;  %v3180_v61 = vld [vmem:[%s3583_s8 + $0x51] sm:$0xff] }
 0x1a1   : > { %v1126_v31 = vadd.f32 %v1067_v50, %v891_v17 }
 0x1a2   : > { %v1537_v49 = vpop.f32.mrf.mxu1 }
 0x1a3   : > { %v1360_v3 = vadd.f32 %v1301_v18, %v1126_v31 }
 0x1a5   : > { %v4151_v32 = vadd.f32 %v1535_v0, %v1360_v3 }
 0x1a6   : > { %v834_v55 = vpop.f32.mrf.mxu2 }
 0x1a7   : > { %v1069_v56 = vpop.f32.mrf.mxu3  ;;  %v892_v12 = vadd.f32 %v834_v55, %v3962_v19  ;;  %v3259_v55 = vld [vmem:[%s3583_s8 + $0x4a] sm:$0xff] }
 0x1a8   : > { %v1306_v18 = vpop.f32.mrf.mxu0 }
 0x1a9   : > { %v1127_v50 = vadd.f32 %v1069_v56, %v892_v12  ;;  %v3260_v56 = vld [vmem:[%s3583_s8 + $0x52] sm:$0xff] }
 0x1aa   : > { %v1540_v17 = vpop.f32.mrf.mxu1  ;;  %v2353_v12 = vld [vmem:[%s4141_s18 + $0x10] sm:$0xff] }
 0x1ab   : > { %v1361_v31 = vadd.f32 %v1303_v1, %v1127_v50  ;;  %1734 = vmatmul.bf16.vlgmr.msra.gmra.mxu2 %v1645_v6  ;;  %2202 = vmatmul.bf16.vlgmr.msra.gmra.mxu0 %v2113_v51  ;;  %v3099_v1 = vld [vmem:[%s3583_s8 + $0x48] sm:$0xff]  ;;  %v2354_v6 = vld [vmem:[%s4141_s18 + $0x18] sm:$0xff] }
 0x1ac   : > { %1968 = vmatmul.bf16.vlgmr.msra.gmra.mxu3 %v1879_v35  ;;  %v1646_v50 = vpack.c.bf16 %v3100_v14, %v3099_v1 }
 0x1ad   : > { %2475 = vmatmul.bf16.vlgmr.msra.gmra.mxu1 %v2383_v20  ;;  %v4154_v19 = vadd.f32 %v1537_v49, %v1361_v31  ;;  %v2114_v31 = vpack.c.bf16 %v3260_v56, %v3259_v55  ;;  %v3102_v56 = vld [vmem:[%s3583_s8 + $0x68] sm:$0xff] }
 0x1ae   : > { %v837_v0 = vpop.f32.mrf.mxu2 }
 0x1af   : > { %v1072_v3 = vpop.f32.mrf.mxu3  ;;  %v893_v34 = vadd.f32 %v837_v0, %v3819_v41  ;;  %v1880_v41 = vpack.c.bf16 %v3180_v61, %v3179_v4  ;;  %v2384_v0 = vpack.c.bf16 %v2354_v6, %v2353_v12  ;;  %v3181_v12 = vld [vmem:[%s3583_s8 + $0x61] sm:$0xff]  ;;  %v3182_v6 = vld [vmem:[%s3583_s8 + $0x69] sm:$0xff] }
 0x1b0   : > { %v1308_v11 = vpop.f32.mrf.mxu0 }
 0x1b1   : > { %v1128_v36 = vadd.f32 %v1072_v3, %v893_v34 }
 0x1b2   : > { %v1542_v9 = vpop.f32.mrf.mxu1 }
 0x1b3   : > { %v1362_v10 = vadd.f32 %v1306_v18, %v1128_v36 }
 0x1b5   : > { %v4165_v35 = vadd.f32 %v1540_v17, %v1362_v10 }
 0x1b6   : > { %v839_v49 = vpop.f32.mrf.mxu2 }
 0x1b7   : > { %v1074_v51 = vpop.f32.mrf.mxu3  ;;  %v894_v20 = vadd.f32 %v839_v49, %v3828_v48  ;;  %v3261_v49 = vld [vmem:[%s3583_s8 + $0x62] sm:$0xff] }
 0x1b8   : > { %v1311_v18 = vpop.f32.mrf.mxu0 }
 0x1b9   : > { %v1129_v3 = vadd.f32 %v1074_v51, %v894_v20  ;;  %v3262_v51 = vld [vmem:[%s3583_s8 + $0x6a] sm:$0xff]  ;;  %v2355_v20 = vld [vmem:[%s4141_s18 + $0x20] sm:$0xff] }
 0x1ba   : > { %v1545_v34 = vpop.f32.mrf.mxu1 }
 0x1bb   : > { %v1363_v36 = vadd.f32 %v1308_v11, %v1129_v3  ;;  %1739 = vmatmul.bf16.gmra.mxu2 %v1646_v50  ;;  %2207 = vmatmul.bf16.gmra.mxu0 %v2114_v31  ;;  %v3101_v11 = vld [vmem:[%s3583_s8 + $0x60] sm:$0xff]  ;;  %v2356_v50 = vld [vmem:[%s4141_s18 + $0x28] sm:$0xff] }
 0x1bc   : > { %1973 = vmatmul.bf16.gmra.mxu3 %v1880_v41  ;;  %v1647_v3 = vpack.c.bf16 %v3102_v56, %v3101_v11 }
 0x1bd   : > { %2480 = vmatmul.bf16.gmra.mxu1 %v2384_v0  ;;  %v4168_v48 = vadd.f32 %v1542_v9, %v1363_v36  ;;  %v2115_v36 = vpack.c.bf16 %v3262_v51, %v3261_v49  ;;  %v3104_v51 = vld [vmem:[%s3583_s8 + $0x80] sm:$0xff] }
 0x1be   : > { %v842_v17 = vpop.f32.mrf.mxu2 }
 0x1bf   : > { %v1077_v10 = vpop.f32.mrf.mxu3  ;;  %v895_v1 = vadd.f32 %v842_v17, %v3837_v60  ;;  %v1881_v60 = vpack.c.bf16 %v3182_v6, %v3181_v12  ;;  %v2385_v17 = vpack.c.bf16 %v2356_v50, %v2355_v20  ;;  %v3183_v20 = vld [vmem:[%s3583_s8 + $0x79] sm:$0xff]  ;;  %v3184_v50 = vld [vmem:[%s3583_s8 + $0x81] sm:$0xff] }
 0x1c0   : > { %v1313_v4 = vpop.f32.mrf.mxu0 }
 0x1c1   : > { %v1130_v14 = vadd.f32 %v1077_v10, %v895_v1 }
 0x1c2   : > { %v1547_v61 = vpop.f32.mrf.mxu1 }
 0x1c3   : > { %v1364_v55 = vadd.f32 %v1311_v18, %v1130_v14 }
 0x1c5   : > { %v4179_v41 = vadd.f32 %v1545_v34, %v1364_v55 }
 0x1c6   : > { %v844_v9 = vpop.f32.mrf.mxu2 }
 0x1c7   : > { %v1079_v31 = vpop.f32.mrf.mxu3  ;;  %v896_v0 = vadd.f32 %v844_v9, %v3843_v8  ;;  %v3263_v9 = vld [vmem:[%s3583_s8 + $0x7a] sm:$0xff] }
 0x1c8   : > { %v1316_v18 = vpop.f32.mrf.mxu0 }
 0x1c9   : > { %v1131_v10 = vadd.f32 %v1079_v31, %v896_v0  ;;  %v3264_v31 = vld [vmem:[%s3583_s8 + $0x82] sm:$0xff]  ;;  %v2357_v0 = vld [vmem:[%s4141_s18 + $0x30] sm:$0xff] }
 0x1ca   : > { %v1550_v1 = vpop.f32.mrf.mxu1 }
 0x1cb   : > { %v1365_v14 = vadd.f32 %v1313_v4, %v1131_v10  ;;  %1744 = vmatmul.bf16.gmra.mxu2 %v1647_v3  ;;  %2212 = vmatmul.bf16.gmra.mxu0 %v2115_v36  ;;  %v3103_v4 = vld [vmem:[%s3583_s8 + $0x78] sm:$0xff] }
 0x1cc   : > { %1978 = vmatmul.bf16.gmra.mxu3 %v1881_v60  ;;  %v2358_v3 = vld [vmem:[%s4141_s18 + $0x38] sm:$0xff]  ;;  %v1648_v10 = vpack.c.bf16 %v3104_v51, %v3103_v4 }
 0x1cd   : > { %2485 = vmatmul.bf16.gmra.mxu1 %v2385_v17  ;;  %v4182_v8 = vadd.f32 %v1547_v61, %v1365_v14  ;;  %v2116_v14 = vpack.c.bf16 %v3264_v31, %v3263_v9  ;;  %v3106_v31 = vld [vmem:[%s3583_s8 + $0x98] sm:$0xff] }
 0x1ce   : > { %v847_v34 = vpop.f32.mrf.mxu2 }
 0x1cf   : > { %v1082_v55 = vpop.f32.mrf.mxu3  ;;  %v897_v11 = vadd.f32 %v847_v34, %v3855_v15  ;;  %v1882_v15 = vpack.c.bf16 %v3184_v50, %v3183_v20  ;;  %v2386_v34 = vpack.c.bf16 %v2358_v3, %v2357_v0  ;;  %v3185_v0 = vld [vmem:[%s3583_s8 + $0x91] sm:$0xff]  ;;  %v3186_v3 = vld [vmem:[%s3583_s8 + $0x99] sm:$0xff] }
 0x1d0   : > { %v1318_v12 = vpop.f32.mrf.mxu0 }
 0x1d1   : > { %v1132_v56 = vadd.f32 %v1082_v55, %v897_v11 }
 0x1d2   : > { %v1552_v6 = vpop.f32.mrf.mxu1 }
 0x1d3   : > { %v1366_v49 = vadd.f32 %v1316_v18, %v1132_v56 }
 0x1d5   : > { %v4193_v60 = vadd.f32 %v1550_v1, %v1366_v49 }
 0x1d6   : > { %v849_v61 = vpop.f32.mrf.mxu2 }
 0x1d7   : > { %v1084_v36 = vpop.f32.mrf.mxu3  ;;  %v898_v17 = vadd.f32 %v849_v61, %v3864_v26  ;;  %v3265_v61 = vld [vmem:[%s3583_s8 + $0x92] sm:$0xff] }
 0x1d8   : > { %v1321_v18 = vpop.f32.mrf.mxu0 }
 0x1d9   : > { %v1133_v55 = vadd.f32 %v1084_v36, %v898_v17  ;;  %v3266_v36 = vld [vmem:[%s3583_s8 + $0x9a] sm:$0xff] }
 0x1da   : > { %v1555_v11 = vpop.f32.mrf.mxu1  ;;  %v2359_v17 = vld [vmem:[%s4141_s18 + $0x40] sm:$0xff] }
 0x1db   : > { %v1367_v56 = vadd.f32 %v1318_v12, %v1133_v55  ;;  %1749 = vmatmul.bf16.gmra.mxu2 %v1648_v10  ;;  %2217 = vmatmul.bf16.gmra.mxu0 %v2116_v14  ;;  %v3105_v12 = vld [vmem:[%s3583_s8 + $0x90] sm:$0xff]  ;;  %v2360_v10 = vld [vmem:[%s4141_s18 + $0x48] sm:$0xff] }
 0x1dc   : > { %1983 = vmatmul.bf16.gmra.mxu3 %v1882_v15  ;;  %v1649_v55 = vpack.c.bf16 %v3106_v31, %v3105_v12 }
 0x1dd   : > { %2490 = vmatmul.bf16.gmra.mxu1 %v2386_v34  ;;  %v4196_v26 = vadd.f32 %v1552_v6, %v1367_v56  ;;  %v2117_v56 = vpack.c.bf16 %v3266_v36, %v3265_v61  ;;  %v3107_v36 = vld [vmem:[%s3583_s8 + $0xa8] sm:$0xff] }
 0x1de   : > { %v852_v1 = vpop.f32.mrf.mxu2 }
 0x1df   : > { %v1087_v49 = vpop.f32.mrf.mxu3  ;;  %v899_v4 = vadd.f32 %v852_v1, %v3873_v37  ;;  %v1883_v37 = vpack.c.bf16 %v3186_v3, %v3185_v0  ;;  %v2387_v1 = vpack.c.bf16 %v2360_v10, %v2359_v17  ;;  %v3108_v17 = vld [vmem:[%s3583_s8 + $0xb0] sm:$0xff] }
 0x1e0   : > { %v1323_v20 = vpop.f32.mrf.mxu0  ;;  %v3188_v10 = vld [vmem:[%s3583_s8 + $0xb1] sm:$0xff] }
 0x1e1   : > { %v1134_v51 = vadd.f32 %v1087_v49, %v899_v4 }
 0x1e2   : > { %v1557_v50 = vpop.f32.mrf.mxu1 }
 0x1e3   : > { %v1368_v9 = vadd.f32 %v1321_v18, %v1134_v51 }
 0x1e5   : > { %v4207_v15 = vadd.f32 %v1555_v11, %v1368_v9 }
 0x1e6   : > { %v854_v6 = vpop.f32.mrf.mxu2 }
 0x1e7   : > { %v1089_v14 = vpop.f32.mrf.mxu3  ;;  %v900_v34 = vadd.f32 %v854_v6, %v3879_v45  ;;  %v2361_v6 = vld [vmem:[%s4141_s18 + $0x50] sm:$0xff] }
 0x1e8   : > { %v1326_v18 = vpop.f32.mrf.mxu0 }
 0x1e9   : > { %v1135_v49 = vadd.f32 %v1089_v14, %v900_v34  ;;  %v2362_v14 = vld [vmem:[%s4141_s18 + $0x58] sm:$0xff] }
 0x1ea   : > { %v1560_v4 = vpop.f32.mrf.mxu1 }
 0x1eb   : > { %v1369_v51 = vadd.f32 %v1323_v20, %v1135_v49  ;;  %1754 = vmatmul.bf16.gmra.mxu2 %v1649_v55  ;;  %2222 = vmatmul.bf16.gmra.mxu0 %v2117_v56  ;;  %v3187_v20 = vld [vmem:[%s3583_s8 + $0xa9] sm:$0xff]  ;;  %v1650_v56 = vpack.c.bf16 %v3108_v17, %v3107_v36  ;;  %v2388_v49 = vpack.c.bf16 %v2362_v14, %v2361_v6 }
 0x1ec   : > { %1988 = vmatmul.bf16.gmra.mxu3 %v1883_v37 }
 0x1ed   : > { %2495 = vmatmul.bf16.gmra.mxu1 %v2387_v1  ;;  %v4210_v11 = vadd.f32 %v1557_v50, %v1369_v51  ;;  %v1884_v1 = vpack.c.bf16 %v3188_v10, %v3187_v20  ;;  %v2363_v20 = vld [vmem:[%s4141_s18 + $0x60] sm:$0xff]  ;;  %v2364_v10 = vld [vmem:[%s4141_s18 + $0x68] sm:$0xff] }
 0x1ee   : > { %v857_v45 = vpop.f32.mrf.mxu2 }
 0x1ef   : > { %v1092_v9 = vpop.f32.mrf.mxu3  ;;  %v901_v12 = vadd.f32 %v857_v45, %v3891_v58 }
 0x1f0   : > { %v1328_v0 = vpop.f32.mrf.mxu0 }
 0x1f1   : > { %v1136_v31 = vadd.f32 %v1092_v9, %v901_v12 }
 0x1f2   : > { %v1562_v3 = vpop.f32.mrf.mxu1 }
 0x1f3   : > { %v1370_v61 = vadd.f32 %v1326_v18, %v1136_v31 }
 0x1f5   : > { %v4219_v34 = vadd.f32 %v1560_v4, %v1370_v61 }
 0x1f6   : > { %v859_v55 = vpop.f32.mrf.mxu2 }
 0x1f7   : > { %v1094_v37 = vpop.f32.mrf.mxu3  ;;  %v902_v50 = vadd.f32 %v859_v55, %v3900_v5 }
 0x1f8   : > { %v1331_v51 = vpop.f32.mrf.mxu0 }
 0x1f9   : > { %v1137_v58 = vadd.f32 %v1094_v37, %v902_v50 }
 0x1fa   : > { %v1565_v18 = vpop.f32.mrf.mxu1 }
 0x1fb   : > { %v1371_v45 = vadd.f32 %v1328_v0, %v1137_v58  ;;  %1759 = vmatmul.bf16.gmra.mxu2 %v1650_v56  ;;  %2227 = vmatmul.bf16.gmra.mxu0 %v3917_v29  ;;  %v2389_v29 = vpack.c.bf16 %v2364_v10, %v2363_v20 }
 0x1fc   : > { %1993 = vmatmul.bf16.gmra.mxu3 %v1884_v1 }
 0x1fd   : > { %2500 = vmatmul.bf16.gmra.mxu1 %v2388_v49  ;;  %v4223_v4 = vadd.f32 %v1562_v3, %v1371_v45 }
 0x1fe   : > { %v862_v9 = vpop.f32.mrf.mxu2 }
 0x1ff   : > { %v1097_v12 = vpop.f32.mrf.mxu3  ;;  %v903_v5 = vadd.f32 %v862_v9, %v3909_v16  ;;  %v2365_v9 = vld [vmem:[%s4141_s18 + $0x70] sm:$0xff] }
 0x200   : > { %v1333_v61 = vpop.f32.mrf.mxu0 }
 0x201   : > { %v1138_v31 = vadd.f32 %v1097_v12, %v903_v5  ;;  %v2366_v12 = vld [vmem:[%s4141_s18 + $0x78] sm:$0xff] }
 0x202   : > { %v1567_v36 = vpop.f32.mrf.mxu1 }
 0x203   : > { %v1372_v17 = vadd.f32 %v1331_v51, %v1138_v31 }
 0x205   : > { %v4228_v6 = vadd.f32 %v1565_v18, %v1372_v17 }
 0x206   : > { %v864_v0 = vpop.f32.mrf.mxu2 }
 0x207   : > { %v1099_v14 = vpop.f32.mrf.mxu3  ;;  %v904_v55 = vadd.f32 %v864_v0, %v3915_v28 }
 0x208   : > { %v1336_v3 = vpop.f32.mrf.mxu0 }
 0x209   : > { %v1139_v37 = vadd.f32 %v1099_v14, %v904_v55 }
 0x20a   : > { %v1570_v50 = vpop.f32.mrf.mxu1 }
 0x20b   : > { %v1373_v56 = vadd.f32 %v1333_v61, %v1139_v37  ;;  %1764 = vmatmul.bf16.gmra.mxu2 %v3945_v53  ;;  %2232 = vmatmul.bf16.gmra.mxu0 %v3949_v52  ;;  %v2390_v52 = vpack.c.bf16 %v2366_v12, %v2365_v9 }
 0x20c   : > { %1998 = vmatmul.bf16.gmra.mxu3 %v3947_v62 }
 0x20d   : > { %2505 = vmatmul.bf16.gmra.mxu1 %v2389_v29  ;;  %v4234_v16 = vadd.f32 %v1567_v36, %v1373_v56 }
 0x20e   : > { %v867_v1 = vpop.f32.mrf.mxu2 }
 0x20f   : > { %v1102_v49 = vpop.f32.mrf.mxu3  ;;  %v905_v28 = vadd.f32 %v867_v1, %v3930_v25 }
 0x210   : > { %v1338_v51 = vpop.f32.mrf.mxu0 }
 0x211   : > { %v1140_v58 = vadd.f32 %v1102_v49, %v905_v28 }
 0x212   : > { %v1572_v18 = vpop.f32.mrf.mxu1 }
 0x213   : > { %v1374_v45 = vadd.f32 %v1336_v3, %v1140_v58  ;;  %v2367_v3 = vld [vmem:[%s4141_s18 + $0x80] sm:$0xff] }
 0x215   : > { %v4239_v5 = vadd.f32 %v1570_v50, %v1374_v45  ;;  %v2368_v50 = vld [vmem:[%s4141_s18 + $0x88] sm:$0xff]  ;;  %v4261_v45 = vld [vmem:[%s4461_s5] ss:$0 sm:$0xff] }
 0x216   : > { %v869_v53 = vpop.f32.mrf.mxu2 }
 0x217   : > { %v1104_v31 = vpop.f32.mrf.mxu3  ;;  %v906_v62 = vadd.f32 %v869_v53, %v3943_v59 }
 0x218   : > { %v1341_v36 = vpop.f32.mrf.mxu0 }
 0x219   : > { %v1141_v61 = vadd.f32 %v1104_v31, %v906_v62  ;;  %v3115_v62 = vld [vmem:[%s3583_s8 + $0x108] sm:$0xff] }
 0x21a   : > { %v1575_v17 = vpop.f32.mrf.mxu1 }
 0x21b   : > { %v1375_v20 = vadd.f32 %v1338_v51, %v1141_v61  ;;  %1769 = vmatmul.bf16.gmra.mxu2 %v3972_v38  ;;  %2237 = vmatmul.bf16.gmra.mxu0 %v3976_v42  ;;  %v2391_v42 = vpack.c.bf16 %v2368_v50, %v2367_v3 }
 0x21c   : > { %2003 = vmatmul.bf16.gmra.mxu3 %v3974_v39 }
 0x21d   : > { %2510 = vmatmul.bf16.gmra.mxu1 %v2390_v52  ;;  %v4245_v25 = vadd.f32 %v1572_v18, %v1375_v20  ;;  %v3116_v52 = vld [vmem:[%s3583_s8 + $0x110] sm:$0xff] }
 0x21e   : > { %v872_v10 = vpop.f32.mrf.mxu2 }
 0x21f   : > { %v1107_v0 = vpop.f32.mrf.mxu3  ;;  %v907_v59 = vadd.f32 %v872_v10, %v3960_v2 }
 0x220   : > { %v1343_v55 = vpop.f32.mrf.mxu0 }
 0x221   : > { %v1142_v14 = vadd.f32 %v1107_v0, %v907_v59  ;;  %v1654_v59 = vpack.c.bf16 %v3116_v52, %v3115_v62 }
 0x222   : > { %v1577_v29 = vpop.f32.mrf.mxu1 }
 0x223   : > { %v1376_v37 = vadd.f32 %v1341_v36, %v1142_v14  ;;  %v2369_v36 = vld [vmem:[%s4141_s18 + $0x90] sm:$0xff] }
 0x225   : > { %v4250_v56 = vadd.f32 %v1575_v17, %v1376_v37  ;;  %v2370_v17 = vld [vmem:[%s4141_s18 + $0x98] sm:$0xff] }
 0x226   : > { %v874_v38 = vpop.f32.mrf.mxu2  ;;  %v2392_v14 = vpack.c.bf16 %v2370_v17, %v2369_v36 }
 0x227   : > { %v1109_v1 = vpop.f32.mrf.mxu3  ;;  %v908_v39 = vadd.f32 %v874_v38, %v3970_v33 }
 0x228   : > { %v2203_v28 = vpop.f32.mrf.mxu0 }
 0x229   : > { %v1143_v49 = vadd.f32 %v1109_v1, %v908_v39 }
 0x22a   : > { %v2476_v58 = vpop.f32.mrf.mxu1 }
 0x22b   : > { %v1377_v51 = vadd.f32 %v1343_v55, %v1143_v49  ;;  %1774 = vmatmul.bf16.gmra.mxu2 %v4001_v27  ;;  %2242 = vmatmul.bf16.gmra.mxu0 %v4005_v30  ;;  %v2477_v53 = vadd.f32 %v4261_v45, %v2476_v58 }
 0x22c   : > { %2008 = vmatmul.bf16.gmra.mxu3 %v4003_v7  ;;  %v4267_v7 = vld [vmem:[%s4458_s2] ss:$0 sm:$0xff] }
 0x22d   : > { %2515 = vmatmul.bf16.gmra.mxu1 %v2391_v42  ;;  %v4256_v2 = vadd.f32 %v1577_v29, %v1377_v51 }
 0x22e   : > { %v1735_v18 = vpop.f32.mrf.mxu2 }
 0x22f   : > { %v1969_v33 = vpop.f32.mrf.mxu3  ;;  %v1815_v9 = vadd.f32 %v1735_v18, %v3998_v21 }
 0x230   : > { %v2205_v30 = vpop.f32.mrf.mxu0 }
 0x231   : > { %v2049_v27 = vadd.f32 %v1969_v33, %v1815_v9  ;;  %v2371_v9 = vld [vmem:[%s4141_s18 + $0xa0] sm:$0xff] }
 0x232   : > { %v2478_v12 = vpop.f32.mrf.mxu1 }
 0x233   : > { %v2283_v31 = vadd.f32 %v2203_v28, %v2049_v27  ;;  %v2372_v27 = vld [vmem:[%s4141_s18 + $0xa8] sm:$0xff] }
 0x234   : > { %v2393_v52 = vpack.c.bf16 %v2372_v27, %v2371_v9  ;;  %v4476_v27 = vld [vmem:[#allocation6_spill] sm:$0xff] }
 0x235   : > { %v2319_v61 = vadd.f32 %v4267_v7, %v2283_v31  ;;  %v4472_v31 = vld [vmem:[#allocation2_spill] sm:$0xff] }
 0x236   : > { %v1737_v20 = vpop.f32.mrf.mxu2 }
 0x237   : > { %v1971_v21 = vpop.f32.mrf.mxu3  ;;  %v2556_v10 = vadd.f32 %v2477_v53, %v2319_v61  ;;  %v1816_v0 = vadd.f32 %v1737_v20, %v4014_v24  ;;  %v2479_v24 = vadd.f32 %v4261_v45, %v2478_v12 }
 0x238   : > { %v2208_v37 = vpop.f32.mrf.mxu0 }
 0x239   : > { %v2588_v55 = vmax.f32 %v2556_v10, 0.0  ;;  %v2050_v29 = vadd.f32 %v1971_v21, %v1816_v0  ;;  %v4473_v21 = vld [vmem:[#allocation4_spill] sm:$0xff]  ;;  %v4474_v10 = vld [vmem:[#allocation5_spill] sm:$0xff] }
 0x23a   : > { %v2481_v3 = vpop.f32.mrf.mxu1 }
 0x23b   : > { %2620 = vst [vmem:[%s4281_s27] sm:$0xff] %v2588_v55  ;;  %v2284_v50 = vadd.f32 %v2205_v30, %v2050_v29  ;;  %1779 = vmatmul.bf16.gmra.mxu2 %v1654_v59  ;;  %2247 = vmatmul.bf16.gmra.mxu0 %v4028_v57 }
 0x23c   : > { %2013 = vmatmul.bf16.gmra.mxu3 %v4026_v46  ;;  %v2482_v46 = vadd.f32 %v4261_v45, %v2481_v3 }
 0x23d   : > { %2520 = vmatmul.bf16.gmra.mxu1 %v2392_v14  ;;  %v2320_v38 = vadd.f32 %v4267_v7, %v2284_v50 }
 0x23e   : > { %v1740_v1 = vpop.f32.mrf.mxu2 }
 0x23f   : > { %v1974_v39 = vpop.f32.mrf.mxu3  ;;  %v2557_v42 = vadd.f32 %v2479_v24, %v2320_v38  ;;  %v1817_v49 = vadd.f32 %v1740_v1, %v4023_v22 }
 0x240   : > { %v2210_v51 = vpop.f32.mrf.mxu0 }
 0x241   : > { %v2589_v28 = vmax.f32 %v2557_v42, 0.0  ;;  %v2051_v58 = vadd.f32 %v1974_v39, %v1817_v49  ;;  %v3119_v42 = vld [vmem:[%s3583_s8 + $0x138] sm:$0xff]  ;;  %v3120_v49 = vld [vmem:[%s3583_s8 + $0x140] sm:$0xff] }
 0x242   : > { %v2483_v18 = vpop.f32.mrf.mxu1 }
 0x243   : > { %2621 = vst [vmem:[%s4281_s27 + $0x8] sm:$0xff] %v2589_v28  ;;  %v2285_v57 = vadd.f32 %v2208_v37, %v2051_v58  ;;  %v2484_v0 = vadd.f32 %v4261_v45, %v2483_v18  ;;  %v4475_v37 = vld [vmem:[#allocation3_spill] sm:$0xff]  ;;  %v3199_v28 = vld [vmem:[%s3583_s8 + $0x139] sm:$0xff]  ;;  %v2373_v18 = vld [vmem:[%s4141_s18 + $0xb0] sm:$0xff] }
 0x244   : > { %v3200_v58 = vld [vmem:[%s3583_s8 + $0x141] sm:$0xff] }
 0x245   : > { %v2321_v33 = vadd.f32 %v4267_v7, %v2285_v57 }
 0x246   : > { %v1742_v30 = vpop.f32.mrf.mxu2 }
 0x247   : > { %v1976_v12 = vpop.f32.mrf.mxu3  ;;  %v2558_v53 = vadd.f32 %v2482_v46, %v2321_v33  ;;  %v1818_v62 = vadd.f32 %v1742_v30, %v4472_v31  ;;  %v2374_v46 = vld [vmem:[%s4141_s18 + $0xb8] sm:$0xff] }
 0x248   : > { %v2213_v36 = vpop.f32.mrf.mxu0  ;;  %v2394_v31 = vpack.c.bf16 %v2374_v46, %v2373_v18 }
 0x249   : > { %v2590_v22 = vmax.f32 %v2558_v53, 0.0  ;;  %v2052_v61 = vadd.f32 %v1976_v12, %v1818_v62  ;;  %v1656_v12 = vpack.c.bf16 %v3120_v49, %v3119_v42  ;;  %v1890_v53 = vpack.c.bf16 %v3200_v58, %v3199_v28  ;;  %v3282_v42 = vld [vmem:[%s3583_s8 + $0x15a] sm:$0xff] }
 0x24a   : > { %v2486_v17 = vpop.f32.mrf.mxu1  ;;  %v2375_v49 = vld [vmem:[%s4141_s18 + $0xc0] sm:$0xff] }
 0x24b   : > { %2622 = vst [vmem:[%s4281_s27 + $0x10] sm:$0xff] %v2590_v22  ;;  %v2286_v20 = vadd.f32 %v2210_v51, %v2052_v61  ;;  %1784 = vmatmul.bf16.gmra.mxu2 %v4473_v21  ;;  %2252 = vmatmul.bf16.gmra.mxu0 %v4058_v54  ;;  %v2487_v54 = vadd.f32 %v4261_v45, %v2486_v17 }
 0x24c   : > { %2018 = vmatmul.bf16.gmra.mxu3 %v4474_v10 }
 0x24d   : > { %2525 = vmatmul.bf16.gmra.mxu1 %v2393_v52  ;;  %v2322_v59 = vadd.f32 %v4267_v7, %v2286_v20 }
 0x24e   : > { %v1745_v14 = vpop.f32.mrf.mxu2 }
 0x24f   : > { %v1979_v55 = vpop.f32.mrf.mxu3  ;;  %v2559_v29 = vadd.f32 %v2484_v0, %v2322_v59  ;;  %v1819_v3 = vadd.f32 %v1745_v14, %v4475_v37 }
 0x250   : > { %v2215_v38 = vpop.f32.mrf.mxu0 }
 0x251   : > { %v2591_v50 = vmax.f32 %v2559_v29, 0.0  ;;  %v2053_v24 = vadd.f32 %v1979_v55, %v1819_v3 }
 0x252   : > { %v2488_v1 = vpop.f32.mrf.mxu1 }
 0x253   : > { %2623 = vst [vmem:[%s4281_s27 + $0x18] sm:$0xff] %v2591_v50  ;;  %v2287_v39 = vadd.f32 %v2213_v36, %v2053_v24  ;;  %v2489_v17 = vadd.f32 %v4261_v45, %v2488_v1  ;;  %v3121_v50 = vld [vmem:[%s3583_s8 + $0x150] sm:$0xff]  ;;  %v3122_v24 = vld [vmem:[%s3583_s8 + $0x158] sm:$0xff] }
 0x254   : > { %v3202_v1 = vld [vmem:[%s3583_s8 + $0x159] sm:$0xff]  ;;  %v1657_v46 = vpack.c.bf16 %v3122_v24, %v3121_v50 }
 0x255   : > { %v2323_v51 = vadd.f32 %v4267_v7, %v2287_v39  ;;  %v3284_v24 = vld [vmem:[%s3583_s8 + $0x172] sm:$0xff] }
 0x256   : > { %v1747_v57 = vpop.f32.mrf.mxu2 }
 0x257   : > { %v1981_v33 = vpop.f32.mrf.mxu3  ;;  %v2560_v9 = vadd.f32 %v2487_v54, %v2323_v51  ;;  %v1820_v30 = vadd.f32 %v1747_v57, %v4476_v27  ;;  %v3281_v54 = vld [vmem:[%s3583_s8 + $0x152] sm:$0xff] }
 0x258   : > { %v2218_v22 = vpop.f32.mrf.mxu0 }
 0x259   : > { %v2592_v62 = vmax.f32 %v2560_v9, 0.0  ;;  %v2054_v52 = vadd.f32 %v1981_v33, %v1820_v30  ;;  %v2125_v33 = vpack.c.bf16 %v3282_v42, %v3281_v54 }
 0x25a   : > { %v2491_v61 = vpop.f32.mrf.mxu1 }
 0x25b   : > { %2624 = vst [vmem:[%s4281_s27 + $0x20] sm:$0xff] %v2592_v62  ;;  %v2288_v36 = vadd.f32 %v2215_v38, %v2054_v52  ;;  %1789 = vmatmul.bf16.gmra.mxu2 %v1656_v12  ;;  %2257 = vmatmul.bf16.gmra.mxu0 %v4079_v63  ;;  %v2492_v37 = vadd.f32 %v4261_v45, %v2491_v61  ;;  %v3201_v38 = vld [vmem:[%s3583_s8 + $0x151] sm:$0xff] }
 0x25c   : > { %2023 = vmatmul.bf16.gmra.mxu3 %v1890_v53  ;;  %v1891_v57 = vpack.c.bf16 %v3202_v1, %v3201_v38  ;;  %v2377_v38 = vld [vmem:[%s4141_s18 + $0xd0] sm:$0xff]  ;;  %v2378_v1 = vld [vmem:[%s4141_s18 + $0xd8] sm:$0xff] }
 0x25d   : > { %2530 = vmatmul.bf16.gmra.mxu1 %v2394_v31  ;;  %v2324_v20 = vadd.f32 %v4267_v7, %v2288_v36  ;;  %v4477_v36 = vld [vmem:[#allocation7_spill] sm:$0xff] }
 0x25e   : > { %v1750_v21 = vpop.f32.mrf.mxu2 }
 0x25f   : > { %v1984_v10 = vpop.f32.mrf.mxu3  ;;  %v2561_v0 = vadd.f32 %v2489_v17, %v2324_v20  ;;  %v1821_v59 = vadd.f32 %v1750_v21, %v4076_v43  ;;  %v2376_v43 = vld [vmem:[%s4141_s18 + $0xc8] sm:$0xff] }
 0x260   : > { %v2220_v63 = vpop.f32.mrf.mxu0  ;;  %v2395_v9 = vpack.c.bf16 %v2376_v43, %v2375_v49  ;;  %v4478_v49 = vld [vmem:[#allocation8_spill] sm:$0xff] }
 0x261   : > { %v2593_v14 = vmax.f32 %v2561_v0, 0.0  ;;  %v2055_v55 = vadd.f32 %v1984_v10, %v1821_v59 }
 0x262   : > { %v2493_v29 = vpop.f32.mrf.mxu1 }
 0x263   : > { %2625 = vst [vmem:[%s4281_s27 + $0x28] sm:$0xff] %v2593_v14  ;;  %v2289_v3 = vadd.f32 %v2218_v22, %v2055_v55  ;;  %v3123_v55 = vld [vmem:[%s3583_s8 + $0x168] sm:$0xff] }
 0x265   : > { %v2325_v39 = vadd.f32 %v4267_v7, %v2289_v3  ;;  %v3283_v3 = vld [vmem:[%s3583_s8 + $0x16a] sm:$0xff] }
 0x266   : > { %v1752_v28 = vpop.f32.mrf.mxu2 }
 0x267   : > { %v1986_v58 = vpop.f32.mrf.mxu3  ;;  %v2562_v51 = vadd.f32 %v2492_v37, %v2325_v39  ;;  %v1822_v18 = vadd.f32 %v1752_v28, %v4089_v47  ;;  %v2494_v47 = vadd.f32 %v4261_v45, %v2493_v29  ;;  %v3203_v29 = vld [vmem:[%s3583_s8 + $0x169] sm:$0xff]  ;;  %v3204_v37 = vld [vmem:[%s3583_s8 + $0x171] sm:$0xff] }
 0x268   : > { %v2223_v12 = vpop.f32.mrf.mxu0 }
 0x269   : > { %v2594_v27 = vmax.f32 %v2562_v51, 0.0  ;;  %v2056_v30 = vadd.f32 %v1986_v58, %v1822_v18  ;;  %v1892_v58 = vpack.c.bf16 %v3204_v37, %v3203_v29  ;;  %v2126_v51 = vpack.c.bf16 %v3284_v24, %v3283_v3  ;;  %v2379_v29 = vld [vmem:[%s4141_s18 + $0xe0] sm:$0xff] }
 0x26a   : > { %v2496_v53 = vpop.f32.mrf.mxu1  ;;  %v2396_v18 = vpack.c.bf16 %v2378_v1, %v2377_v38 }
 0x26b   : > { %2626 = vst [vmem:[%s4281_s27 + $0x30] sm:$0xff] %v2594_v27  ;;  %v2290_v31 = vadd.f32 %v2220_v63, %v2056_v30  ;;  %1794 = vmatmul.bf16.gmra.mxu2 %v1657_v46  ;;  %2262 = vmatmul.bf16.gmra.mxu0 %v2125_v33  ;;  %v2497_v59 = vadd.f32 %v4261_v45, %v2496_v53  ;;  %v3124_v63 = vld [vmem:[%s3583_s8 + $0x170] sm:$0xff] }
 0x26c   : > { %2028 = vmatmul.bf16.gmra.mxu3 %v1891_v57  ;;  %v1658_v28 = vpack.c.bf16 %v3124_v63, %v3123_v55  ;;  %v3286_v63 = vld [vmem:[%s3583_s8 + $0x18a] sm:$0xff] }
 0x26d   : > { %2535 = vmatmul.bf16.gmra.mxu1 %v2395_v9  ;;  %v2326_v62 = vadd.f32 %v4267_v7, %v2290_v31 }
 0x26e   : > { %v1755_v52 = vpop.f32.mrf.mxu2 }
 0x26f   : > { %v1989_v22 = vpop.f32.mrf.mxu3  ;;  %v2563_v61 = vadd.f32 %v2494_v47, %v2326_v62  ;;  %v1823_v17 = vadd.f32 %v1755_v52, %v4477_v36 }
 0x270   : > { %v2225_v10 = vpop.f32.mrf.mxu0 }
 0x271   : > { %v2595_v20 = vmax.f32 %v2563_v61, 0.0  ;;  %v2057_v21 = vadd.f32 %v1989_v22, %v1823_v17 }
 0x272   : > { %v2498_v0 = vpop.f32.mrf.mxu1 }
 0x273   : > { %2627 = vst [vmem:[%s4281_s27 + $0x38] sm:$0xff] %v2595_v20  ;;  %v2291_v14 = vadd.f32 %v2223_v12, %v2057_v21  ;;  %v2499_v30 = vadd.f32 %v4261_v45, %v2498_v0  ;;  %v3125_v21 = vld [vmem:[%s3583_s8 + $0x180] sm:$0xff] }
 0x274   : > { %v3205_v0 = vld [vmem:[%s3583_s8 + $0x181] sm:$0xff] }
 0x275   : > { %v2327_v50 = vadd.f32 %v4267_v7, %v2291_v14  ;;  %v3285_v14 = vld [vmem:[%s3583_s8 + $0x182] sm:$0xff] }
 0x276   : > { %v1757_v54 = vpop.f32.mrf.mxu2 }
 0x277   : > { %v1991_v39 = vpop.f32.mrf.mxu3  ;;  %v2564_v42 = vadd.f32 %v2497_v59, %v2327_v50  ;;  %v1824_v43 = vadd.f32 %v1757_v54, %v4478_v49  ;;  %v3206_v59 = vld [vmem:[%s3583_s8 + $0x189] sm:$0xff]  ;;  %v2127_v54 = vpack.c.bf16 %v3286_v63, %v3285_v14 }
 0x278   : > { %v2228_v33 = vpop.f32.mrf.mxu0  ;;  %v1893_v1 = vpack.c.bf16 %v3206_v59, %v3205_v0 }
 0x279   : > { %v2596_v46 = vmax.f32 %v2564_v42, 0.0  ;;  %v2058_v57 = vadd.f32 %v1991_v39, %v1824_v43 }
 0x27a   : > { %v2501_v9 = vpop.f32.mrf.mxu1 }
 0x27b   : > { %2628 = vst [vmem:[%s4281_s27 + $0x40] sm:$0xff] %v2596_v46  ;;  %v2292_v27 = vadd.f32 %v2225_v10, %v2058_v57  ;;  %1799 = vmatmul.bf16.gmra.mxu2 %v1658_v28  ;;  %2267 = vmatmul.bf16.gmra.mxu0 %v2126_v51  ;;  %v2502_v17 = vadd.f32 %v4261_v45, %v2501_v9  ;;  %v3126_v10 = vld [vmem:[%s3583_s8 + $0x188] sm:$0xff] }
 0x27c   : > { %2033 = vmatmul.bf16.gmra.mxu3 %v1892_v58  ;;  %v1659_v38 = vpack.c.bf16 %v3126_v10, %v3125_v21 }
 0x27d   : > { %2540 = vmatmul.bf16.gmra.mxu1 %v2396_v18  ;;  %v2328_v12 = vadd.f32 %v4267_v7, %v2292_v27 }
 0x27e   : > { %v1760_v53 = vpop.f32.mrf.mxu2 }
 0x27f   : > { %v1994_v31 = vpop.f32.mrf.mxu3  ;;  %v2565_v47 = vadd.f32 %v2499_v30, %v2328_v12  ;;  %v1825_v62 = vadd.f32 %v1760_v53, %v4117_v40  ;;  %v2380_v40 = vld [vmem:[%s4141_s18 + $0xe8] sm:$0xff] }
 0x280   : > { %v2230_v61 = vpop.f32.mrf.mxu0  ;;  %v2397_v39 = vpack.c.bf16 %v2380_v40, %v2379_v29 }
 0x281   : > { %v2597_v52 = vmax.f32 %v2565_v47, 0.0  ;;  %v2059_v22 = vadd.f32 %v1994_v31, %v1825_v62  ;;  %v3127_v47 = vld [vmem:[%s3583_s8 + $0x198] sm:$0xff]  ;;  %v3128_v62 = vld [vmem:[%s3583_s8 + $0x1a0] sm:$0xff] }
 0x282   : > { %v2503_v36 = vpop.f32.mrf.mxu1  ;;  %v1660_v14 = vpack.c.bf16 %v3128_v62, %v3127_v47 }
 0x283   : > { %2629 = vst [vmem:[%s4281_s27 + $0x48] sm:$0xff] %v2597_v52  ;;  %v2293_v20 = vadd.f32 %v2228_v33, %v2059_v22  ;;  %v3207_v52 = vld [vmem:[%s3583_s8 + $0x199] sm:$0xff]  ;;  %v3208_v22 = vld [vmem:[%s3583_s8 + $0x1a1] sm:$0xff] }
 0x285   : > { %v2329_v55 = vadd.f32 %v4267_v7, %v2293_v20  ;;  %v2381_v20 = vld [vmem:[%s4141_s18 + $0xf0] sm:$0xff] }
 0x286   : > { %v1762_v37 = vpop.f32.mrf.mxu2 }
 0x287   : > { %v1996_v3 = vpop.f32.mrf.mxu3  ;;  %v2566_v50 = vadd.f32 %v2502_v17, %v2329_v55  ;;  %v1826_v24 = vadd.f32 %v1762_v37, %v4120_v23  ;;  %v2504_v23 = vadd.f32 %v4261_v45, %v2503_v36  ;;  %v3288_v17 = vld [vmem:[%s3583_s8 + $0x1a2] sm:$0xff]  ;;  %v1894_v55 = vpack.c.bf16 %v3208_v22, %v3207_v52 }
 0x288   : > { %v2233_v43 = vpop.f32.mrf.mxu0 }
 0x289   : > { %v2598_v42 = vmax.f32 %v2566_v50, 0.0  ;;  %v2060_v49 = vadd.f32 %v1996_v3, %v1826_v24 }
 0x28a   : > { %v2506_v28 = vpop.f32.mrf.mxu1 }
 0x28b   : > { %2630 = vst [vmem:[%s4281_s27 + $0x50] sm:$0xff] %v2598_v42  ;;  %v2294_v58 = vadd.f32 %v2230_v61, %v2060_v49  ;;  %1804 = vmatmul.bf16.gmra.mxu2 %v1659_v38  ;;  %2272 = vmatmul.bf16.gmra.mxu0 %v2127_v54  ;;  %v2507_v53 = vadd.f32 %v4261_v45, %v2506_v28  ;;  %v3287_v61 = vld [vmem:[%s3583_s8 + $0x19a] sm:$0xff] }
 0x28c   : > { %2038 = vmatmul.bf16.gmra.mxu3 %v1893_v1  ;;  %v2128_v63 = vpack.c.bf16 %v3288_v17, %v3287_v61 }
 0x28d   : > { %2545 = vmatmul.bf16.gmra.mxu1 %v2397_v39  ;;  %v2330_v51 = vadd.f32 %v4267_v7, %v2294_v58 }
 0x28e   : > { %v1765_v18 = vpop.f32.mrf.mxu2 }
 0x28f   : > { %v1999_v46 = vpop.f32.mrf.mxu3  ;;  %v2567_v57 = vadd.f32 %v2504_v23, %v2330_v51  ;;  %v1827_v33 = vadd.f32 %v1765_v18, %v4129_v13  ;;  %v2382_v13 = vld [vmem:[%s4141_s18 + $0xf8] sm:$0xff] }
 0x290   : > { %v2235_v30 = vpop.f32.mrf.mxu0  ;;  %v2398_v29 = vpack.c.bf16 %v2382_v13, %v2381_v20 }
 0x291   : > { %v2599_v9 = vmax.f32 %v2567_v57, 0.0  ;;  %v2061_v27 = vadd.f32 %v1999_v46, %v1827_v33 }
 0x292   : > { %v2508_v12 = vpop.f32.mrf.mxu1 }
 0x293   : > { %2631 = vst [vmem:[%s4281_s27 + $0x58] sm:$0xff] %v2599_v9  ;;  %v2295_v31 = vadd.f32 %v2233_v43, %v2061_v27  ;;  %v2509_v38 = vadd.f32 %v4261_v45, %v2508_v12 }
 0x295   : > { %v2331_v36 = vadd.f32 %v4267_v7, %v2295_v31 }
 0x296   : > { %v1767_v21 = vpop.f32.mrf.mxu2 }
 0x297   : > { %v2001_v10 = vpop.f32.mrf.mxu3  ;;  %v2568_v0 = vadd.f32 %v2507_v53, %v2331_v36  ;;  %v1828_v59 = vadd.f32 %v1767_v21, %v4132_v44 }
 0x298   : > { %v2238_v3 = vpop.f32.mrf.mxu0 }
 0x299   : > { %v2600_v40 = vmax.f32 %v2568_v0, 0.0  ;;  %v2062_v37 = vadd.f32 %v2001_v10, %v1828_v59 }
 0x29a   : > { %v2511_v50 = vpop.f32.mrf.mxu1 }
 0x29b   : > { %2632 = vst [vmem:[%s4281_s27 + $0x60] sm:$0xff] %v2600_v40  ;;  %v2296_v24 = vadd.f32 %v2235_v30, %v2062_v37  ;;  %1809 = vmatmul.bf16.gmra.mxu2 %v1660_v14  ;;  %2277 = vmatmul.bf16.gmra.mxu0 %v2128_v63  ;;  %v2512_v23 = vadd.f32 %v4261_v45, %v2511_v50 }
 0x29c   : > { %2043 = vmatmul.bf16.gmra.mxu3 %v1894_v55 }
 0x29d   : > { %2550 = vmatmul.bf16.gmra.mxu1 %v2398_v29  ;;  %v2332_v1 = vadd.f32 %v4267_v7, %v2296_v24 }
 0x29e   : > { %v1770_v44 = vpop.f32.mrf.mxu2 }
 0x29f   : > { %v2004_v54 = vpop.f32.mrf.mxu3  ;;  %v2569_v39 = vadd.f32 %v2509_v38, %v2332_v1  ;;  %v1829_v42 = vadd.f32 %v1770_v44, %v4151_v32 }
 0x2a0   : > { %v2240_v28 = vpop.f32.mrf.mxu0 }
 0x2a1   : > { %v2601_v49 = vmax.f32 %v2569_v39, 0.0  ;;  %v2063_v43 = vadd.f32 %v2004_v54, %v1829_v42 }
 0x2a2   : > { %v2513_v58 = vpop.f32.mrf.mxu1 }
 0x2a3   : > { %2633 = vst [vmem:[%s4281_s27 + $0x68] sm:$0xff] %v2601_v49  ;;  %v2297_v51 = vadd.f32 %v2238_v3, %v2063_v43  ;;  %v2514_v31 = vadd.f32 %v4261_v45, %v2513_v58 }
 0x2a5   : > { %v2333_v18 = vadd.f32 %v4267_v7, %v2297_v51 }
 0x2a6   : > { %v1772_v46 = vpop.f32.mrf.mxu2 }
 0x2a7   : > { %v2006_v57 = vpop.f32.mrf.mxu3  ;;  %v2570_v33 = vadd.f32 %v2512_v23, %v2333_v18  ;;  %v1830_v9 = vadd.f32 %v1772_v46, %v4154_v19 }
 0x2a8   : > { %v2243_v32 = vpop.f32.mrf.mxu0 }
 0x2a9   : > { %v2602_v27 = vmax.f32 %v2570_v33, 0.0  ;;  %v2064_v30 = vadd.f32 %v2006_v57, %v1830_v9 }
 0x2aa   : > { %v2516_v12 = vpop.f32.mrf.mxu1 }
 0x2ab   : > { %2634 = vst [vmem:[%s4281_s27 + $0x70] sm:$0xff] %v2602_v27  ;;  %v2298_v53 = vadd.f32 %v2240_v28, %v2064_v30  ;;  %v2517_v13 = vadd.f32 %v4261_v45, %v2516_v12 }
 0x2ad   : > { %v2334_v47 = vadd.f32 %v4267_v7, %v2298_v53 }
 0x2ae   : > { %v1775_v62 = vpop.f32.mrf.mxu2 }
 0x2af   : > { %v2009_v52 = vpop.f32.mrf.mxu3  ;;  %v2571_v22 = vadd.f32 %v2514_v31, %v2334_v47  ;;  %v1831_v61 = vadd.f32 %v1775_v62, %v4165_v35 }
 0x2b0   : > { %v2245_v19 = vpop.f32.mrf.mxu0 }
 0x2b1   : > { %v2603_v36 = vmax.f32 %v2571_v22, 0.0  ;;  %v2065_v17 = vadd.f32 %v2009_v52, %v1831_v61 }
 0x2b2   : > { %v2518_v20 = vpop.f32.mrf.mxu1 }
 0x2b3   : > { %2635 = vst [vmem:[%s4281_s27 + $0x78] sm:$0xff] %v2603_v36  ;;  %v2299_v21 = vadd.f32 %v2243_v32, %v2065_v17  ;;  %v2519_v3 = vadd.f32 %v4261_v45, %v2518_v20 }
 0x2b5   : > { %v2335_v10 = vadd.f32 %v4267_v7, %v2299_v21 }
 0x2b6   : > { %v1777_v0 = vpop.f32.mrf.mxu2 }
 0x2b7   : > { %v2011_v59 = vpop.f32.mrf.mxu3  ;;  %v2572_v14 = vadd.f32 %v2517_v13, %v2335_v10  ;;  %v1832_v55 = vadd.f32 %v1777_v0, %v4168_v48 }
 0x2b8   : > { %v2248_v35 = vpop.f32.mrf.mxu0 }
 0x2b9   : > { %v2604_v63 = vmax.f32 %v2572_v14, 0.0  ;;  %v2066_v29 = vadd.f32 %v2011_v59, %v1832_v55 }
 0x2ba   : > { %v2521_v40 = vpop.f32.mrf.mxu1 }
 0x2bb   : > { %2636 = vst [vmem:[%s4281_s27 + $0x80] sm:$0xff] %v2604_v63  ;;  %v2300_v37 = vadd.f32 %v2245_v19, %v2066_v29  ;;  %v2522_v49 = vadd.f32 %v4261_v45, %v2521_v40 }
 0x2bd   : > { %v2336_v50 = vadd.f32 %v4267_v7, %v2300_v37 }
 0x2be   : > { %v1780_v24 = vpop.f32.mrf.mxu2 }
 0x2bf   : > { %v2014_v38 = vpop.f32.mrf.mxu3  ;;  %v2573_v1 = vadd.f32 %v2519_v3, %v2336_v50  ;;  %v1833_v44 = vadd.f32 %v1780_v24, %v4179_v41 }
 0x2c0   : > { %v2250_v48 = vpop.f32.mrf.mxu0 }
 0x2c1   : > { %v2605_v54 = vmax.f32 %v2573_v1, 0.0  ;;  %v2067_v39 = vadd.f32 %v2014_v38, %v1833_v44 }
 0x2c2   : > { %v2523_v42 = vpop.f32.mrf.mxu1 }
 0x2c3   : > { %2637 = vst [vmem:[%s4281_s27 + $0x88] sm:$0xff] %v2605_v54  ;;  %v2301_v43 = vadd.f32 %v2248_v35, %v2067_v39  ;;  %v2524_v27 = vadd.f32 %v4261_v45, %v2523_v42 }
 0x2c5   : > { %v2337_v28 = vadd.f32 %v4267_v7, %v2301_v43 }
 0x2c6   : > { %v1782_v58 = vpop.f32.mrf.mxu2 }
 0x2c7   : > { %v2016_v23 = vpop.f32.mrf.mxu3  ;;  %v2574_v51 = vadd.f32 %v2522_v49, %v2337_v28  ;;  %v1834_v18 = vadd.f32 %v1782_v58, %v4182_v8 }
 0x2c8   : > { %v2253_v41 = vpop.f32.mrf.mxu0 }
 0x2c9   : > { %v2606_v46 = vmax.f32 %v2574_v51, 0.0  ;;  %v2068_v57 = vadd.f32 %v2016_v23, %v1834_v18 }
 0x2ca   : > { %v2526_v33 = vpop.f32.mrf.mxu1 }
 0x2cb   : > { %2638 = vst [vmem:[%s4281_s27 + $0x90] sm:$0xff] %v2606_v46  ;;  %v2302_v9 = vadd.f32 %v2250_v48, %v2068_v57  ;;  %v2527_v22 = vadd.f32 %v4261_v45, %v2526_v33 }
 0x2cd   : > { %v2338_v30 = vadd.f32 %v4267_v7, %v2302_v9 }
 0x2ce   : > { %v1785_v32 = vpop.f32.mrf.mxu2 }
 0x2cf   : > { %v2019_v12 = vpop.f32.mrf.mxu3  ;;  %v2575_v53 = vadd.f32 %v2524_v27, %v2338_v30  ;;  %v1835_v31 = vadd.f32 %v1785_v32, %v4193_v60 }
 0x2d0   : > { %v2255_v8 = vpop.f32.mrf.mxu0 }
 0x2d1   : > { %v2607_v47 = vmax.f32 %v2575_v53, 0.0  ;;  %v2069_v62 = vadd.f32 %v2019_v12, %v1835_v31 }
 0x2d2   : > { %v2528_v52 = vpop.f32.mrf.mxu1 }
 0x2d3   : > { %2639 = vst [vmem:[%s4281_s27 + $0x98] sm:$0xff] %v2607_v47  ;;  %v2303_v61 = vadd.f32 %v2253_v41, %v2069_v62  ;;  %v2529_v14 = vadd.f32 %v4261_v45, %v2528_v52 }
 0x2d5   : > { %v2339_v36 = vadd.f32 %v4267_v7, %v2303_v61 }
 0x2d6   : > { %v1787_v17 = vpop.f32.mrf.mxu2 }
 0x2d7   : > { %v2021_v19 = vpop.f32.mrf.mxu3  ;;  %v2576_v20 = vadd.f32 %v2527_v22, %v2339_v36  ;;  %v1836_v13 = vadd.f32 %v1787_v17, %v4196_v26 }
 0x2d8   : > { %v2258_v60 = vpop.f32.mrf.mxu0 }
 0x2d9   : > { %v2608_v21 = vmax.f32 %v2576_v20, 0.0  ;;  %v2070_v10 = vadd.f32 %v2021_v19, %v1836_v13 }
 0x2da   : > { %v2531_v0 = vpop.f32.mrf.mxu1 }
 0x2db   : > { %2640 = vst [vmem:[%s4281_s27 + $0xa0] sm:$0xff] %v2608_v21  ;;  %v2304_v59 = vadd.f32 %v2255_v8, %v2070_v10  ;;  %v2532_v24 = vadd.f32 %v4261_v45, %v2531_v0 }
 0x2dd   : > { %v2340_v55 = vadd.f32 %v4267_v7, %v2304_v59 }
 0x2de   : > { %v1790_v63 = vpop.f32.mrf.mxu2 }
 0x2df   : > { %v2024_v29 = vpop.f32.mrf.mxu3  ;;  %v2577_v35 = vadd.f32 %v2529_v14, %v2340_v55  ;;  %v1837_v40 = vadd.f32 %v1790_v63, %v4207_v15 }
 0x2e0   : > { %v2260_v26 = vpop.f32.mrf.mxu0 }
 0x2e1   : > { %v2609_v37 = vmax.f32 %v2577_v35, 0.0  ;;  %v2071_v3 = vadd.f32 %v2024_v29, %v1837_v40 }
 0x2e2   : > { %v2533_v50 = vpop.f32.mrf.mxu1 }
 0x2e3   : > { %2641 = vst [vmem:[%s4281_s27 + $0xa8] sm:$0xff] %v2609_v37  ;;  %v2305_v38 = vadd.f32 %v2258_v60, %v2071_v3  ;;  %v2534_v58 = vadd.f32 %v4261_v45, %v2533_v50 }
 0x2e5   : > { %v2341_v1 = vadd.f32 %v4267_v7, %v2305_v38 }
 0x2e6   : > { %v1792_v44 = vpop.f32.mrf.mxu2 }
 0x2e7   : > { %v2026_v54 = vpop.f32.mrf.mxu3  ;;  %v2578_v39 = vadd.f32 %v2532_v24, %v2341_v1  ;;  %v1838_v48 = vadd.f32 %v1792_v44, %v4210_v11 }
 0x2e8   : > { %v2263_v15 = vpop.f32.mrf.mxu0 }
 0x2e9   : > { %v2610_v42 = vmax.f32 %v2578_v39, 0.0  ;;  %v2072_v49 = vadd.f32 %v2026_v54, %v1838_v48 }
 0x2ea   : > { %v2536_v43 = vpop.f32.mrf.mxu1 }
 0x2eb   : > { %2642 = vst [vmem:[%s4281_s27 + $0xb0] sm:$0xff] %v2610_v42  ;;  %v2306_v28 = vadd.f32 %v2260_v26, %v2072_v49  ;;  %v2537_v27 = vadd.f32 %v4261_v45, %v2536_v43 }
 0x2ed   : > { %v2342_v23 = vadd.f32 %v4267_v7, %v2306_v28 }
 0x2ee   : > { %v1795_v51 = vpop.f32.mrf.mxu2 }
 0x2ef   : > { %v2029_v18 = vpop.f32.mrf.mxu3  ;;  %v2579_v46 = vadd.f32 %v2534_v58, %v2342_v23  ;;  %v1839_v57 = vadd.f32 %v1795_v51, %v4219_v34 }
 0x2f0   : > { %v2265_v11 = vpop.f32.mrf.mxu0 }
 0x2f1   : > { %v2611_v41 = vmax.f32 %v2579_v46, 0.0  ;;  %v2073_v33 = vadd.f32 %v2029_v18, %v1839_v57 }
 0x2f2   : > { %v2538_v9 = vpop.f32.mrf.mxu1 }
 0x2f3   : > { %2643 = vst [vmem:[%s4281_s27 + $0xb8] sm:$0xff] %v2611_v41  ;;  %v2307_v30 = vadd.f32 %v2263_v15, %v2073_v33  ;;  %v2539_v61 = vadd.f32 %v4261_v45, %v2538_v9 }
 0x2f5   : > { %v2343_v32 = vadd.f32 %v4267_v7, %v2307_v30 }
 0x2f6   : > { %v1797_v12 = vpop.f32.mrf.mxu2 }
 0x2f7   : > { %v2031_v53 = vpop.f32.mrf.mxu3  ;;  %v2580_v31 = vadd.f32 %v2537_v27, %v2343_v32  ;;  %v1840_v47 = vadd.f32 %v1797_v12, %v4223_v4 }
 0x2f8   : > { %v2268_v34 = vpop.f32.mrf.mxu0 }
 0x2f9   : > { %v2612_v62 = vmax.f32 %v2580_v31, 0.0  ;;  %v2074_v8 = vadd.f32 %v2031_v53, %v1840_v47 }
 0x2fa   : > { %v2541_v52 = vpop.f32.mrf.mxu1 }
 0x2fb   : > { %2644 = vst [vmem:[%s4281_s27 + $0xc0] sm:$0xff] %v2612_v62  ;;  %v2308_v22 = vadd.f32 %v2265_v11, %v2074_v8  ;;  %v2542_v0 = vadd.f32 %v4261_v45, %v2541_v52 }
 0x2fd   : > { %v2344_v36 = vadd.f32 %v4267_v7, %v2308_v22 }
 0x2fe   : > { %v1800_v17 = vpop.f32.mrf.mxu2 }
 0x2ff   : > { %v2034_v19 = vpop.f32.mrf.mxu3  ;;  %v2581_v20 = vadd.f32 %v2539_v61, %v2344_v36  ;;  %v1841_v13 = vadd.f32 %v1800_v17, %v4228_v6 }
 0x300   : > { %v2270_v4 = vpop.f32.mrf.mxu0 }
 0x301   : > { %v2613_v21 = vmax.f32 %v2581_v20, 0.0  ;;  %v2075_v10 = vadd.f32 %v2034_v19, %v1841_v13 }
 0x302   : > { %v2543_v60 = vpop.f32.mrf.mxu1 }
 0x303   : > { %2645 = vst [vmem:[%s4281_s27 + $0xc8] sm:$0xff] %v2613_v21  ;;  %v2309_v59 = vadd.f32 %v2268_v34, %v2075_v10  ;;  %v2544_v50 = vadd.f32 %v4261_v45, %v2543_v60 }
 0x305   : > { %v2345_v14 = vadd.f32 %v4267_v7, %v2309_v59 }
 0x306   : > { %v1802_v55 = vpop.f32.mrf.mxu2 }
 0x307   : > { %v2036_v63 = vpop.f32.mrf.mxu3  ;;  %v2582_v29 = vadd.f32 %v2542_v0, %v2345_v14  ;;  %v1842_v35 = vadd.f32 %v1802_v55, %v4234_v16 }
 0x308   : > { %v2273_v3 = vpop.f32.mrf.mxu0 }
 0x309   : > { %v2614_v40 = vmax.f32 %v2582_v29, 0.0  ;;  %v2076_v37 = vadd.f32 %v2036_v63, %v1842_v35 }
 0x30a   : > { %v2546_v26 = vpop.f32.mrf.mxu1 }
 0x30b   : > { %2646 = vst [vmem:[%s4281_s27 + $0xd0] sm:$0xff] %v2614_v40  ;;  %v2310_v6 = vadd.f32 %v2270_v4, %v2076_v37  ;;  %v2547_v16 = vadd.f32 %v4261_v45, %v2546_v26 }
 0x30d   : > { %v2346_v24 = vadd.f32 %v4267_v7, %v2310_v6 }
 0x30e   : > { %v1805_v38 = vpop.f32.mrf.mxu2 }
 0x30f   : > { %v2039_v1 = vpop.f32.mrf.mxu3  ;;  %v2583_v44 = vadd.f32 %v2544_v50, %v2346_v24  ;;  %v1843_v54 = vadd.f32 %v1805_v38, %v4239_v5 }
 0x310   : > { %v2275_v15 = vpop.f32.mrf.mxu0 }
 0x311   : > { %v2615_v39 = vmax.f32 %v2583_v44, 0.0  ;;  %v2077_v48 = vadd.f32 %v2039_v1, %v1843_v54 }
 0x312   : > { %v2548_v43 = vpop.f32.mrf.mxu1 }
 0x313   : > { %2647 = vst [vmem:[%s4281_s27 + $0xd8] sm:$0xff] %v2615_v39  ;;  %v2311_v42 = vadd.f32 %v2273_v3, %v2077_v48  ;;  %v2549_v57 = vadd.f32 %v4261_v45, %v2548_v43 }
 0x315   : > { %v2347_v49 = vadd.f32 %v4267_v7, %v2311_v42 }
 0x316   : > { %v1807_v28 = vpop.f32.mrf.mxu2 }
 0x317   : > { %v2041_v58 = vpop.f32.mrf.mxu3  ;;  %v2584_v23 = vadd.f32 %v2547_v16, %v2347_v49  ;;  %v1844_v51 = vadd.f32 %v1807_v28, %v4245_v25 }
 0x318   : > { %v2278_v30 = vpop.f32.mrf.mxu0 }
 0x319   : > { %v2616_v18 = vmax.f32 %v2584_v23, 0.0  ;;  %v2078_v46 = vadd.f32 %v2041_v58, %v1844_v51 }
 0x31a   : > { %v2551_v32 = vpop.f32.mrf.mxu1 }
 0x31b   : > { %2648 = vst [vmem:[%s4281_s27 + $0xe0] sm:$0xff] %v2616_v18  ;;  %v2312_v5 = vadd.f32 %v2275_v15, %v2078_v46  ;;  %v2552_v25 = vadd.f32 %v4261_v45, %v2551_v32 }
 0x31d   : > { %v2348_v41 = vadd.f32 %v4267_v7, %v2312_v5 }
 0x31e   : > { %v1810_v33 = vpop.f32.mrf.mxu2 }
 0x31f   : > { %v2044_v11 = vpop.f32.mrf.mxu3  ;;  %v2585_v9 = vadd.f32 %v2549_v57, %v2348_v41  ;;  %v1845_v27 = vadd.f32 %v1810_v33, %v4250_v56 }
 0x320   : > { %v2280_v56 = vpop.f32.mrf.mxu0 }
 0x321   : > { %v2617_v12 = vmax.f32 %v2585_v9, 0.0  ;;  %v2079_v53 = vadd.f32 %v2044_v11, %v1845_v27 }
 0x322   : > { %v2553_v36 = vpop.f32.mrf.mxu1 }
 0x323   : > { %2649 = vst [vmem:[%s4281_s27 + $0xe8] sm:$0xff] %v2617_v12  ;;  %v2313_v31 = vadd.f32 %v2278_v30, %v2079_v53  ;;  %v2554_v19 = vadd.f32 %v4261_v45, %v2553_v36 }
 0x325   : > { %v2349_v47 = vadd.f32 %v4267_v7, %v2313_v31 }
 0x326   : > { %v1812_v62 = vpop.f32.mrf.mxu2 }
 0x327   : > { %v2586_v8 = vadd.f32 %v2552_v25, %v2349_v47  ;;  %v1846_v34 = vadd.f32 %v1812_v62, %v4256_v2  ;;  %v2046_v52 = vpop.f32.mrf.mxu3 }
 0x329   : > { %v2618_v22 = vmax.f32 %v2586_v8, 0.0  ;;  %v2080_v61 = vadd.f32 %v2046_v52, %v1846_v34 }
 0x32b   : > { %2650 = vst [vmem:[%s4281_s27 + $0xf0] sm:$0xff] %v2618_v22  ;;  %v2314_v17 = vadd.f32 %v2280_v56, %v2080_v61 }
 0x32d   : > { %v2350_v20 = vadd.f32 %v4267_v7, %v2314_v17 }
 0x32f   : > { %v2587_v13 = vadd.f32 %v2554_v19, %v2350_v20 }
 0x331   : > { %v2619_v21 = vmax.f32 %v2587_v13, 0.0 }
 0x333   : > { %2651 = vst [vmem:[%s4281_s27 + $0xf8] sm:$0xff] %v2619_v21 }
 0x334 PF: > { %s16_s21 = sadd.s32 1, %s3486_s21  }
 0x335   : > { %p13_p4 = scmp.ge.s32.totalorder %s16_s21, 4  }
 0x337   :  { %15 = sbr.rel (!%p13_p4) target bundleno = 1 (0x1), region = 87 }

</bundles_post_ra>
